<compile_context>
chip_gen: v7x
topology: tpu7x:2x2x1
jax: 0.10.0
libtpu: 0.0.40
codegen_flags: <defaults>
</compile_context>

<pallas_src>
import math

import jax
import jax.numpy as jnp
from jax import lax
from jax.experimental import pallas as pl
from jax.experimental.pallas import tpu as pltpu


def lstm_score_kernel(x_ref, wih_ref, whh_ref, b_ref, wfc_ref, bfc_ref,
                      out_ref, xp_ref):
    """x_ref:   (T, TB, E)  bf16   time-major embedded inputs (one batch tile)
       wih_ref: (E, 4H)     bf16   W_ih^T   (gate order [i, f, o, g])
       whh_ref: (H, 4H)     bf16   W_hh^T   (gate order [i, f, o, g])
       b_ref:   (1, 4H)     f32    b_ih + b_hh (gate order [i, f, o, g])
       wfc_ref: (H, O)      bf16   W_fc^T
       bfc_ref: (1, O)      f32
       out_ref: (TB, O)     f32
       xp_ref:  (T, TB, 4H) f32    VMEM scratch for the staged input projection
    """
    T, TB, E = x_ref.shape
    H4 = whh_ref.shape[1]
    H = H4 // 4

    # ---- Input projection for all timesteps at once (single big MXU matmul) ----
    x = x_ref[...]                                               # (T, TB, E) bf16
    xp = jnp.dot(x.reshape(T * TB, E), wih_ref[...],
                 preferred_element_type=jnp.float32)             # (T*TB, 4H) f32
    xp_ref[...] = xp.reshape(T, TB, H4) + b_ref[...]             # + (b_ih + b_hh)

    whh = whh_ref[...]                                           # (H, 4H) bf16

    def step(t, carry):
        h, c = carry                                             # (TB, H) f32 each
        gates = xp_ref[t] + jnp.dot(h.astype(whh.dtype), whh,
                                    preferred_element_type=jnp.float32)  # (TB, 4H)
        # Gate order [i, f, o, g]: two contiguous, lane-aligned activation slabs.
        sig = jax.nn.sigmoid(gates[:, :3 * H])                   # i, f, o
        g = jnp.tanh(gates[:, 3 * H:])                           # g
        i = sig[:, 0 * H:1 * H]
        f = sig[:, 1 * H:2 * H]
        o = sig[:, 2 * H:3 * H]
        c_new = f * c + i * g
        h_new = o * jnp.tanh(c_new)
        return h_new, c_new

    h0 = jnp.zeros((TB, H), jnp.float32)
    c0 = jnp.zeros((TB, H), jnp.float32)
    # T is static and small: fully unroll so the LLO scheduler can overlap steps.
    h_T, _ = lax.fori_loop(0, T, step, (h0, c0), unroll=True)

    logits = jnp.dot(h_T.astype(wfc_ref.dtype), wfc_ref[...],
                     preferred_element_type=jnp.float32) + bfc_ref[...]   # (TB, O)
    out_ref[...] = jax.nn.sigmoid(logits)


def score_predictor_forward(input_ids, attention_mask, params, *, batch_tile=16):
    """input_ids: (B, T) int32, attention_mask: (B, T) (unused, as in the reference)."""
    del attention_mask  # not used by the PyTorch forward either

    emb = params["embedding"]            # (V, E) f32
    w_ih_t = params["w_ih_t"]            # (E, 4H) bf16 (pre-transposed, [i,f,o,g])
    w_hh_t = params["w_hh_t"]            # (H, 4H) bf16 (pre-transposed, [i,f,o,g])
    bias = params["bias"]                # (1, 4H) f32  (b_ih + b_hh, [i,f,o,g])
    w_fc_t = params["w_fc_t"]            # (H, O)  bf16
    b_fc2 = params["b_fc2"]              # (1, O)  f32

    B, T = input_ids.shape
    E = emb.shape[1]
    H4 = w_hh_t.shape[1]
    H = H4 // 4
    O = w_fc_t.shape[1]

    # Glue: embedding gather (padding_idx=0 row is zeroed in the table).
    # Gather directly into time-major layout (T, B, E); cast to bf16 for the MXU.
    x_emb = jnp.take(emb, jnp.transpose(input_ids), axis=0).astype(jnp.bfloat16)

    TB = min(batch_tile, B)
    assert B % TB == 0, "demo keeps B a multiple of the batch tile"
    grid = (B // TB,)

    out = pl.pallas_call(
        lstm_score_kernel,
        out_shape=jax.ShapeDtypeStruct((B, O), jnp.float32),
        grid_spec=pltpu.PrefetchScalarGridSpec(
            num_scalar_prefetch=0,
            grid=grid,
            in_specs=[
                pl.BlockSpec((T, TB, E), lambda i: (0, i, 0)),   # x_emb (time-major)
                pl.BlockSpec((E, H4), lambda i: (0, 0)),         # W_ih^T (resident)
                pl.BlockSpec((H, H4), lambda i: (0, 0)),         # W_hh^T (resident)
                pl.BlockSpec((1, H4), lambda i: (0, 0)),         # fused bias
                pl.BlockSpec((H, O), lambda i: (0, 0)),          # W_fc^T
                pl.BlockSpec((1, O), lambda i: (0, 0)),          # b_fc
            ],
            out_specs=pl.BlockSpec((TB, O), lambda i: (i, 0)),
            scratch_shapes=[pltpu.VMEM((T, TB, H4), jnp.float32)],
        ),
        compiler_params=pltpu.CompilerParams(
            dimension_semantics=("parallel",),
            vmem_limit_bytes=64 * 1024 * 1024,
        ),
    )(x_emb, w_ih_t, w_hh_t, bias, w_fc_t, b_fc2)
    return out


def _reorder_gates(w, hidden_dim):
    """PyTorch LSTM gate order [i, f, g, o] -> kernel order [i, f, o, g] along axis 0."""
    i = w[0 * hidden_dim:1 * hidden_dim]
    f = w[1 * hidden_dim:2 * hidden_dim]
    g = w[2 * hidden_dim:3 * hidden_dim]
    o = w[3 * hidden_dim:4 * hidden_dim]
    return jnp.concatenate([i, f, o, g], axis=0)


def init_params(key, vocab_size, embedding_dim, hidden_dim, output_dim):
    ks = jax.random.split(key, 7)
    # nn.Embedding: N(0,1), padding_idx row zeroed.
    emb = jax.random.normal(ks[0], (vocab_size, embedding_dim), jnp.float32)
    emb = emb.at[0].set(0.0)
    # nn.LSTM: U(-1/sqrt(H), 1/sqrt(H)); PyTorch gate order [i, f, g, o].
    k = 1.0 / math.sqrt(hidden_dim)
    w_ih = jax.random.uniform(ks[1], (4 * hidden_dim, embedding_dim), jnp.float32, -k, k)
    w_hh = jax.random.uniform(ks[2], (4 * hidden_dim, hidden_dim), jnp.float32, -k, k)
    b_ih = jax.random.uniform(ks[3], (4 * hidden_dim,), jnp.float32, -k, k)
    b_hh = jax.random.uniform(ks[4], (4 * hidden_dim,), jnp.float32, -k, k)
    # nn.Linear: U(-1/sqrt(H), 1/sqrt(H))
    w_fc = jax.random.uniform(ks[5], (output_dim, hidden_dim), jnp.float32, -k, k)
    b_fc = jax.random.uniform(ks[6], (output_dim,), jnp.float32, -k, k)

    # Hoisted per-call work: reorder gates to [i, f, o, g] (so in-kernel
    # activations hit two contiguous lane-aligned slabs), pre-transpose weights,
    # pre-fuse biases, pre-cast MXU inputs to bf16; biases / accumulation stay f32.
    w_ih = _reorder_gates(w_ih, hidden_dim)
    w_hh = _reorder_gates(w_hh, hidden_dim)
    b_sum = _reorder_gates(b_ih + b_hh, hidden_dim)

    return dict(
        embedding=emb,
        w_ih_t=jnp.transpose(w_ih).astype(jnp.bfloat16),          # (E, 4H)
        w_hh_t=jnp.transpose(w_hh).astype(jnp.bfloat16),          # (H, 4H)
        bias=b_sum.reshape(1, 4 * hidden_dim),                    # (1, 4H) f32
        w_fc_t=jnp.transpose(w_fc).astype(jnp.bfloat16),          # (H, O)
        b_fc2=b_fc.reshape(1, output_dim),                        # (1, O) f32
    )


if __name__ == "__main__":
    # Module default dims (embedding_dim=128, hidden_dim=256, output_dim=1),
    # small batch/seq for the demo; B=32 exercises a 2-step batch-parallel grid.
    VOCAB, E, H, O = 50, 128, 256, 1
    B, T = 32, 8

    root = jax.random.PRNGKey(0)
    k_params, k_ids = jax.random.split(root)
    params = init_params(k_params, VOCAB, E, H, O)

    input_ids = jax.random.randint(k_ids, (B, T), 0, VOCAB, dtype=jnp.int32)
    attention_mask = jnp.ones((B, T), dtype=jnp.int32)

    out = score_predictor_forward(input_ids, attention_mask, params, batch_tile=16)
    out = jax.block_until_ready(out)

    assert out.shape == (B, O), out.shape
    assert bool(jnp.all(jnp.isfinite(out))), "non-finite output"
    assert bool(jnp.all((out >= 0.0) & (out <= 1.0))), "sigmoid range violated"
    print("KERNEL_OK")
</pallas_src>

<mosaic_0001>
module attributes {stable_mosaic.version = 11 : i64} {
  func.func @lstm_score_kernel(%arg0: i32, %arg1: memref<8x16x128xbf16, #tpu.memory_space<vmem>>, %arg2: memref<128x1024xbf16, #tpu.memory_space<vmem>>, %arg3: memref<256x1024xbf16, #tpu.memory_space<vmem>>, %arg4: memref<1x1024xf32, #tpu.memory_space<vmem>>, %arg5: memref<256x1xbf16, #tpu.memory_space<vmem>>, %arg6: memref<1x1xf32, #tpu.memory_space<vmem>>, %arg7: memref<16x1xf32, #tpu.memory_space<vmem>>, %arg8: memref<8x16x1024xf32, #tpu.memory_space<vmem>>) attributes {dimension_semantics = [#tpu.dimension_semantics<parallel>], iteration_bounds = array<i64: 2>, scalar_prefetch = 0 : i64, scratch_operands = 1 : i64, tpu.core_type = #tpu.core_type<tc>, window_params = [{transform_indices = @transform_0, window_bounds = array<i64: 8, 16, 128>}, {pipeline_mode = #tpu.pipeline_mode<synchronous>, transform_indices = @transform_1, window_bounds = array<i64: 128, 1024>}, {pipeline_mode = #tpu.pipeline_mode<synchronous>, transform_indices = @transform_2, window_bounds = array<i64: 256, 1024>}, {pipeline_mode = #tpu.pipeline_mode<synchronous>, transform_indices = @transform_3, window_bounds = array<i64: 1, 1024>}, {pipeline_mode = #tpu.pipeline_mode<synchronous>, transform_indices = @transform_4, window_bounds = array<i64: 256, 1>}, {pipeline_mode = #tpu.pipeline_mode<synchronous>, transform_indices = @transform_5, window_bounds = array<i64: 1, 1>}, {transform_indices = @transform_6, window_bounds = array<i64: 16, 1>}]} {
    %c0 = arith.constant 0 : index
    %c0_0 = arith.constant 0 : index
    %c0_1 = arith.constant 0 : index
    %0 = vector.load %arg1[%c0, %c0_0, %c0_1] : memref<8x16x128xbf16, #tpu.memory_space<vmem>>, vector<8x16x128xbf16>
    %1 = vector.shape_cast %0 : vector<8x16x128xbf16> to vector<128x128xbf16>
    %c0_2 = arith.constant 0 : index
    %c0_3 = arith.constant 0 : index
    %2 = vector.load %arg2[%c0_2, %c0_3] : memref<128x1024xbf16, #tpu.memory_space<vmem>>, vector<128x1024xbf16>
    %cst = arith.constant dense<0.000000e+00> : vector<128x1024xf32>
    %3 = tpu.matmul %1, %2, %cst {dimension_numbers = #tpu.dot_dimension_numbers<[1], [0], [0], [1], [0, 0, 1, 1], [], []>} : vector<128x128xbf16>, vector<128x1024xbf16>, vector<128x1024xf32> -> vector<128x1024xf32>
    %4 = vector.shape_cast %3 : vector<128x1024xf32> to vector<8x16x1024xf32>
    %c0_4 = arith.constant 0 : index
    %c0_5 = arith.constant 0 : index
    %5 = vector.load %arg4[%c0_4, %c0_5] : memref<1x1024xf32, #tpu.memory_space<vmem>>, vector<1x1024xf32>
    %6 = vector.shape_cast %5 : vector<1x1024xf32> to vector<1x1x1024xf32>
    %7 = vector.broadcast %6 : vector<1x1x1024xf32> to vector<8x16x1024xf32>
    %8 = arith.addf %4, %7 : vector<8x16x1024xf32>
    %c0_6 = arith.constant 0 : index
    %c0_7 = arith.constant 0 : index
    %c0_8 = arith.constant 0 : index
    %9 = vector.load %arg8[%c0_6, %c0_7, %c0_8] : memref<8x16x1024xf32, #tpu.memory_space<vmem>>, vector<8x16x1024xf32>
    tpu.vector_store %arg8[%c0_6, %c0_7, %c0_8], %8 {strides = array<i32>} : memref<8x16x1024xf32, #tpu.memory_space<vmem>>, vector<8x16x1024xf32>,
    %c0_9 = arith.constant 0 : index
    %c0_10 = arith.constant 0 : index
    %10 = vector.load %arg3[%c0_9, %c0_10] : memref<256x1024xbf16, #tpu.memory_space<vmem>>, vector<256x1024xbf16>
    %cst_11 = arith.constant 0.000000e+00 : f32
    %11 = vector.broadcast %cst_11 : f32 to vector<16x256xf32>
    %cst_12 = arith.constant 0.000000e+00 : f32
    %12 = vector.broadcast %cst_12 : f32 to vector<16x256xf32>
    %c0_i32 = arith.constant 0 : i32
    %13 = arith.index_cast %c0_i32 : i32 to index
    %c0_13 = arith.constant 0 : index
    %c0_14 = arith.constant 0 : index
    %14 = vector.load %arg8[%13, %c0_13, %c0_14] : memref<8x16x1024xf32, #tpu.memory_space<vmem>>, vector<1x16x1024xf32>
    %15 = vector.shape_cast %14 : vector<1x16x1024xf32> to vector<16x1024xf32>
    %16 = arith.truncf %11 : vector<16x256xf32> to vector<16x256xbf16>
    %cst_15 = arith.constant dense<0.000000e+00> : vector<16x1024xf32>
    %17 = tpu.matmul %16, %10, %cst_15 {dimension_numbers = #tpu.dot_dimension_numbers<[1], [0], [0], [1], [0, 0, 1, 1], [], []>} : vector<16x256xbf16>, vector<256x1024xbf16>, vector<16x1024xf32> -> vector<16x1024xf32>
    %18 = arith.addf %15, %17 : vector<16x1024xf32>
    %19 = vector.extract_strided_slice %18 {offsets = [0, 0], sizes = [16, 768], strides = [1, 1]} : vector<16x1024xf32> to vector<16x768xf32>
    %20 = arith.negf %19 : vector<16x768xf32>
    %21 = math.exp %20 : vector<16x768xf32>
    %cst_16 = arith.constant 1.000000e+00 : f32
    %22 = vector.broadcast %cst_16 : f32 to vector<16x768xf32>
    %23 = arith.addf %22, %21 : vector<16x768xf32>
    %24 = arith.divf %22, %23 : vector<16x768xf32>
    %25 = vector.extract_strided_slice %18 {offsets = [0, 768], sizes = [16, 256], strides = [1, 1]} : vector<16x1024xf32> to vector<16x256xf32>
    %26 = math.tanh %25 : vector<16x256xf32>
    %27 = vector.extract_strided_slice %24 {offsets = [0, 0], sizes = [16, 256], strides = [1, 1]} : vector<16x768xf32> to vector<16x256xf32>
    %28 = vector.extract_strided_slice %24 {offsets = [0, 256], sizes = [16, 256], strides = [1, 1]} : vector<16x768xf32> to vector<16x256xf32>
    %29 = vector.extract_strided_slice %24 {offsets = [0, 512], sizes = [16, 256], strides = [1, 1]} : vector<16x768xf32> to vector<16x256xf32>
    %30 = arith.mulf %28, %12 : vector<16x256xf32>
    %31 = arith.mulf %27, %26 : vector<16x256xf32>
    %32 = arith.addf %30, %31 : vector<16x256xf32>
    %33 = math.tanh %32 : vector<16x256xf32>
    %34 = arith.mulf %29, %33 : vector<16x256xf32>
    %c1_i32 = arith.constant 1 : i32
    %35 = arith.index_cast %c1_i32 : i32 to index
    %c0_17 = arith.constant 0 : index
    %c0_18 = arith.constant 0 : index
    %36 = vector.load %arg8[%35, %c0_17, %c0_18] : memref<8x16x1024xf32, #tpu.memory_space<vmem>>, vector<1x16x1024xf32>
    %37 = vector.shape_cast %36 : vector<1x16x1024xf32> to vector<16x1024xf32>
    %38 = arith.truncf %34 : vector<16x256xf32> to vector<16x256xbf16>
    %cst_19 = arith.constant dense<0.000000e+00> : vector<16x1024xf32>
    %39 = tpu.matmul %38, %10, %cst_19 {dimension_numbers = #tpu.dot_dimension_numbers<[1], [0], [0], [1], [0, 0, 1, 1], [], []>} : vector<16x256xbf16>, vector<256x1024xbf16>, vector<16x1024xf32> -> vector<16x1024xf32>
    %40 = arith.addf %37, %39 : vector<16x1024xf32>
    %41 = vector.extract_strided_slice %40 {offsets = [0, 0], sizes = [16, 768], strides = [1, 1]} : vector<16x1024xf32> to vector<16x768xf32>
    %42 = arith.negf %41 : vector<16x768xf32>
    %43 = math.exp %42 : vector<16x768xf32>
    %cst_20 = arith.constant 1.000000e+00 : f32
    %44 = vector.broadcast %cst_20 : f32 to vector<16x768xf32>
    %45 = arith.addf %44, %43 : vector<16x768xf32>
    %46 = arith.divf %44, %45 : vector<16x768xf32>
    %47 = vector.extract_strided_slice %40 {offsets = [0, 768], sizes = [16, 256], strides = [1, 1]} : vector<16x1024xf32> to vector<16x256xf32>
    %48 = math.tanh %47 : vector<16x256xf32>
    %49 = vector.extract_strided_slice %46 {offsets = [0, 0], sizes = [16, 256], strides = [1, 1]} : vector<16x768xf32> to vector<16x256xf32>
    %50 = vector.extract_strided_slice %46 {offsets = [0, 256], sizes = [16, 256], strides = [1, 1]} : vector<16x768xf32> to vector<16x256xf32>
    %51 = vector.extract_strided_slice %46 {offsets = [0, 512], sizes = [16, 256], strides = [1, 1]} : vector<16x768xf32> to vector<16x256xf32>
    %52 = arith.mulf %50, %32 : vector<16x256xf32>
    %53 = arith.mulf %49, %48 : vector<16x256xf32>
    %54 = arith.addf %52, %53 : vector<16x256xf32>
    %55 = math.tanh %54 : vector<16x256xf32>
    %56 = arith.mulf %51, %55 : vector<16x256xf32>
    %c2_i32 = arith.constant 2 : i32
    %57 = arith.index_cast %c2_i32 : i32 to index
    %c0_21 = arith.constant 0 : index
    %c0_22 = arith.constant 0 : index
    %58 = vector.load %arg8[%57, %c0_21, %c0_22] : memref<8x16x1024xf32, #tpu.memory_space<vmem>>, vector<1x16x1024xf32>
    %59 = vector.shape_cast %58 : vector<1x16x1024xf32> to vector<16x1024xf32>
    %60 = arith.truncf %56 : vector<16x256xf32> to vector<16x256xbf16>
    %cst_23 = arith.constant dense<0.000000e+00> : vector<16x1024xf32>
    %61 = tpu.matmul %60, %10, %cst_23 {dimension_numbers = #tpu.dot_dimension_numbers<[1], [0], [0], [1], [0, 0, 1, 1], [], []>} : vector<16x256xbf16>, vector<256x1024xbf16>, vector<16x1024xf32> -> vector<16x1024xf32>
    %62 = arith.addf %59, %61 : vector<16x1024xf32>
    %63 = vector.extract_strided_slice %62 {offsets = [0, 0], sizes = [16, 768], strides = [1, 1]} : vector<16x1024xf32> to vector<16x768xf32>
    %64 = arith.negf %63 : vector<16x768xf32>
    %65 = math.exp %64 : vector<16x768xf32>
    %cst_24 = arith.constant 1.000000e+00 : f32
    %66 = vector.broadcast %cst_24 : f32 to vector<16x768xf32>
    %67 = arith.addf %66, %65 : vector<16x768xf32>
    %68 = arith.divf %66, %67 : vector<16x768xf32>
    %69 = vector.extract_strided_slice %62 {offsets = [0, 768], sizes = [16, 256], strides = [1, 1]} : vector<16x1024xf32> to vector<16x256xf32>
    %70 = math.tanh %69 : vector<16x256xf32>
    %71 = vector.extract_strided_slice %68 {offsets = [0, 0], sizes = [16, 256], strides = [1, 1]} : vector<16x768xf32> to vector<16x256xf32>
    %72 = vector.extract_strided_slice %68 {offsets = [0, 256], sizes = [16, 256], strides = [1, 1]} : vector<16x768xf32> to vector<16x256xf32>
    %73 = vector.extract_strided_slice %68 {offsets = [0, 512], sizes = [16, 256], strides = [1, 1]} : vector<16x768xf32> to vector<16x256xf32>
    %74 = arith.mulf %72, %54 : vector<16x256xf32>
    %75 = arith.mulf %71, %70 : vector<16x256xf32>
    %76 = arith.addf %74, %75 : vector<16x256xf32>
    %77 = math.tanh %76 : vector<16x256xf32>
    %78 = arith.mulf %73, %77 : vector<16x256xf32>
    %c3_i32 = arith.constant 3 : i32
    %79 = arith.index_cast %c3_i32 : i32 to index
    %c0_25 = arith.constant 0 : index
    %c0_26 = arith.constant 0 : index
    %80 = vector.load %arg8[%79, %c0_25, %c0_26] : memref<8x16x1024xf32, #tpu.memory_space<vmem>>, vector<1x16x1024xf32>
    %81 = vector.shape_cast %80 : vector<1x16x1024xf32> to vector<16x1024xf32>
    %82 = arith.truncf %78 : vector<16x256xf32> to vector<16x256xbf16>
    %cst_27 = arith.constant dense<0.000000e+00> : vector<16x1024xf32>
    %83 = tpu.matmul %82, %10, %cst_27 {dimension_numbers = #tpu.dot_dimension_numbers<[1], [0], [0], [1], [0, 0, 1, 1], [], []>} : vector<16x256xbf16>, vector<256x1024xbf16>, vector<16x1024xf32> -> vector<16x1024xf32>
    %84 = arith.addf %81, %83 : vector<16x1024xf32>
    %85 = vector.extract_strided_slice %84 {offsets = [0, 0], sizes = [16, 768], strides = [1, 1]} : vector<16x1024xf32> to vector<16x768xf32>
    %86 = arith.negf %85 : vector<16x768xf32>
    %87 = math.exp %86 : vector<16x768xf32>
    %cst_28 = arith.constant 1.000000e+00 : f32
    %88 = vector.broadcast %cst_28 : f32 to vector<16x768xf32>
    %89 = arith.addf %88, %87 : vector<16x768xf32>
    %90 = arith.divf %88, %89 : vector<16x768xf32>
    %91 = vector.extract_strided_slice %84 {offsets = [0, 768], sizes = [16, 256], strides = [1, 1]} : vector<16x1024xf32> to vector<16x256xf32>
    %92 = math.tanh %91 : vector<16x256xf32>
    %93 = vector.extract_strided_slice %90 {offsets = [0, 0], sizes = [16, 256], strides = [1, 1]} : vector<16x768xf32> to vector<16x256xf32>
    %94 = vector.extract_strided_slice %90 {offsets = [0, 256], sizes = [16, 256], strides = [1, 1]} : vector<16x768xf32> to vector<16x256xf32>
    %95 = vector.extract_strided_slice %90 {offsets = [0, 512], sizes = [16, 256], strides = [1, 1]} : vector<16x768xf32> to vector<16x256xf32>
    %96 = arith.mulf %94, %76 : vector<16x256xf32>
    %97 = arith.mulf %93, %92 : vector<16x256xf32>
    %98 = arith.addf %96, %97 : vector<16x256xf32>
    %99 = math.tanh %98 : vector<16x256xf32>
    %100 = arith.mulf %95, %99 : vector<16x256xf32>
    %c4_i32 = arith.constant 4 : i32
    %101 = arith.index_cast %c4_i32 : i32 to index
    %c0_29 = arith.constant 0 : index
    %c0_30 = arith.constant 0 : index
    %102 = vector.load %arg8[%101, %c0_29, %c0_30] : memref<8x16x1024xf32, #tpu.memory_space<vmem>>, vector<1x16x1024xf32>
    %103 = vector.shape_cast %102 : vector<1x16x1024xf32> to vector<16x1024xf32>
    %104 = arith.truncf %100 : vector<16x256xf32> to vector<16x256xbf16>
    %cst_31 = arith.constant dense<0.000000e+00> : vector<16x1024xf32>
    %105 = tpu.matmul %104, %10, %cst_31 {dimension_numbers = #tpu.dot_dimension_numbers<[1], [0], [0], [1], [0, 0, 1, 1], [], []>} : vector<16x256xbf16>, vector<256x1024xbf16>, vector<16x1024xf32> -> vector<16x1024xf32>
    %106 = arith.addf %103, %105 : vector<16x1024xf32>
    %107 = vector.extract_strided_slice %106 {offsets = [0, 0], sizes = [16, 768], strides = [1, 1]} : vector<16x1024xf32> to vector<16x768xf32>
    %108 = arith.negf %107 : vector<16x768xf32>
    %109 = math.exp %108 : vector<16x768xf32>
    %cst_32 = arith.constant 1.000000e+00 : f32
    %110 = vector.broadcast %cst_32 : f32 to vector<16x768xf32>
    %111 = arith.addf %110, %109 : vector<16x768xf32>
    %112 = arith.divf %110, %111 : vector<16x768xf32>
    %113 = vector.extract_strided_slice %106 {offsets = [0, 768], sizes = [16, 256], strides = [1, 1]} : vector<16x1024xf32> to vector<16x256xf32>
    %114 = math.tanh %113 : vector<16x256xf32>
    %115 = vector.extract_strided_slice %112 {offsets = [0, 0], sizes = [16, 256], strides = [1, 1]} : vector<16x768xf32> to vector<16x256xf32>
    %116 = vector.extract_strided_slice %112 {offsets = [0, 256], sizes = [16, 256], strides = [1, 1]} : vector<16x768xf32> to vector<16x256xf32>
    %117 = vector.extract_strided_slice %112 {offsets = [0, 512], sizes = [16, 256], strides = [1, 1]} : vector<16x768xf32> to vector<16x256xf32>
    %118 = arith.mulf %116, %98 : vector<16x256xf32>
    %119 = arith.mulf %115, %114 : vector<16x256xf32>
    %120 = arith.addf %118, %119 : vector<16x256xf32>
    %121 = math.tanh %120 : vector<16x256xf32>
    %122 = arith.mulf %117, %121 : vector<16x256xf32>
    %c5_i32 = arith.constant 5 : i32
    %123 = arith.index_cast %c5_i32 : i32 to index
    %c0_33 = arith.constant 0 : index
    %c0_34 = arith.constant 0 : index
    %124 = vector.load %arg8[%123, %c0_33, %c0_34] : memref<8x16x1024xf32, #tpu.memory_space<vmem>>, vector<1x16x1024xf32>
    %125 = vector.shape_cast %124 : vector<1x16x1024xf32> to vector<16x1024xf32>
    %126 = arith.truncf %122 : vector<16x256xf32> to vector<16x256xbf16>
    %cst_35 = arith.constant dense<0.000000e+00> : vector<16x1024xf32>
    %127 = tpu.matmul %126, %10, %cst_35 {dimension_numbers = #tpu.dot_dimension_numbers<[1], [0], [0], [1], [0, 0, 1, 1], [], []>} : vector<16x256xbf16>, vector<256x1024xbf16>, vector<16x1024xf32> -> vector<16x1024xf32>
    %128 = arith.addf %125, %127 : vector<16x1024xf32>
    %129 = vector.extract_strided_slice %128 {offsets = [0, 0], sizes = [16, 768], strides = [1, 1]} : vector<16x1024xf32> to vector<16x768xf32>
    %130 = arith.negf %129 : vector<16x768xf32>
    %131 = math.exp %130 : vector<16x768xf32>
    %cst_36 = arith.constant 1.000000e+00 : f32
    %132 = vector.broadcast %cst_36 : f32 to vector<16x768xf32>
    %133 = arith.addf %132, %131 : vector<16x768xf32>
    %134 = arith.divf %132, %133 : vector<16x768xf32>
    %135 = vector.extract_strided_slice %128 {offsets = [0, 768], sizes = [16, 256], strides = [1, 1]} : vector<16x1024xf32> to vector<16x256xf32>
    %136 = math.tanh %135 : vector<16x256xf32>
    %137 = vector.extract_strided_slice %134 {offsets = [0, 0], sizes = [16, 256], strides = [1, 1]} : vector<16x768xf32> to vector<16x256xf32>
    %138 = vector.extract_strided_slice %134 {offsets = [0, 256], sizes = [16, 256], strides = [1, 1]} : vector<16x768xf32> to vector<16x256xf32>
    %139 = vector.extract_strided_slice %134 {offsets = [0, 512], sizes = [16, 256], strides = [1, 1]} : vector<16x768xf32> to vector<16x256xf32>
    %140 = arith.mulf %138, %120 : vector<16x256xf32>
    %141 = arith.mulf %137, %136 : vector<16x256xf32>
    %142 = arith.addf %140, %141 : vector<16x256xf32>
    %143 = math.tanh %142 : vector<16x256xf32>
    %144 = arith.mulf %139, %143 : vector<16x256xf32>
    %c6_i32 = arith.constant 6 : i32
    %145 = arith.index_cast %c6_i32 : i32 to index
    %c0_37 = arith.constant 0 : index
    %c0_38 = arith.constant 0 : index
    %146 = vector.load %arg8[%145, %c0_37, %c0_38] : memref<8x16x1024xf32, #tpu.memory_space<vmem>>, vector<1x16x1024xf32>
    %147 = vector.shape_cast %146 : vector<1x16x1024xf32> to vector<16x1024xf32>
    %148 = arith.truncf %144 : vector<16x256xf32> to vector<16x256xbf16>
    %cst_39 = arith.constant dense<0.000000e+00> : vector<16x1024xf32>
    %149 = tpu.matmul %148, %10, %cst_39 {dimension_numbers = #tpu.dot_dimension_numbers<[1], [0], [0], [1], [0, 0, 1, 1], [], []>} : vector<16x256xbf16>, vector<256x1024xbf16>, vector<16x1024xf32> -> vector<16x1024xf32>
    %150 = arith.addf %147, %149 : vector<16x1024xf32>
    %151 = vector.extract_strided_slice %150 {offsets = [0, 0], sizes = [16, 768], strides = [1, 1]} : vector<16x1024xf32> to vector<16x768xf32>
    %152 = arith.negf %151 : vector<16x768xf32>
    %153 = math.exp %152 : vector<16x768xf32>
    %cst_40 = arith.constant 1.000000e+00 : f32
    %154 = vector.broadcast %cst_40 : f32 to vector<16x768xf32>
    %155 = arith.addf %154, %153 : vector<16x768xf32>
    %156 = arith.divf %154, %155 : vector<16x768xf32>
    %157 = vector.extract_strided_slice %150 {offsets = [0, 768], sizes = [16, 256], strides = [1, 1]} : vector<16x1024xf32> to vector<16x256xf32>
    %158 = math.tanh %157 : vector<16x256xf32>
    %159 = vector.extract_strided_slice %156 {offsets = [0, 0], sizes = [16, 256], strides = [1, 1]} : vector<16x768xf32> to vector<16x256xf32>
    %160 = vector.extract_strided_slice %156 {offsets = [0, 256], sizes = [16, 256], strides = [1, 1]} : vector<16x768xf32> to vector<16x256xf32>
    %161 = vector.extract_strided_slice %156 {offsets = [0, 512], sizes = [16, 256], strides = [1, 1]} : vector<16x768xf32> to vector<16x256xf32>
    %162 = arith.mulf %160, %142 : vector<16x256xf32>
    %163 = arith.mulf %159, %158 : vector<16x256xf32>
    %164 = arith.addf %162, %163 : vector<16x256xf32>
    %165 = math.tanh %164 : vector<16x256xf32>
    %166 = arith.mulf %161, %165 : vector<16x256xf32>
    %c7_i32 = arith.constant 7 : i32
    %167 = arith.index_cast %c7_i32 : i32 to index
    %c0_41 = arith.constant 0 : index
    %c0_42 = arith.constant 0 : index
    %168 = vector.load %arg8[%167, %c0_41, %c0_42] : memref<8x16x1024xf32, #tpu.memory_space<vmem>>, vector<1x16x1024xf32>
    %169 = vector.shape_cast %168 : vector<1x16x1024xf32> to vector<16x1024xf32>
    %170 = arith.truncf %166 : vector<16x256xf32> to vector<16x256xbf16>
    %cst_43 = arith.constant dense<0.000000e+00> : vector<16x1024xf32>
    %171 = tpu.matmul %170, %10, %cst_43 {dimension_numbers = #tpu.dot_dimension_numbers<[1], [0], [0], [1], [0, 0, 1, 1], [], []>} : vector<16x256xbf16>, vector<256x1024xbf16>, vector<16x1024xf32> -> vector<16x1024xf32>
    %172 = arith.addf %169, %171 : vector<16x1024xf32>
    %173 = vector.extract_strided_slice %172 {offsets = [0, 0], sizes = [16, 768], strides = [1, 1]} : vector<16x1024xf32> to vector<16x768xf32>
    %174 = arith.negf %173 : vector<16x768xf32>
    %175 = math.exp %174 : vector<16x768xf32>
    %cst_44 = arith.constant 1.000000e+00 : f32
    %176 = vector.broadcast %cst_44 : f32 to vector<16x768xf32>
    %177 = arith.addf %176, %175 : vector<16x768xf32>
    %178 = arith.divf %176, %177 : vector<16x768xf32>
    %179 = vector.extract_strided_slice %172 {offsets = [0, 768], sizes = [16, 256], strides = [1, 1]} : vector<16x1024xf32> to vector<16x256xf32>
    %180 = math.tanh %179 : vector<16x256xf32>
    %181 = vector.extract_strided_slice %178 {offsets = [0, 0], sizes = [16, 256], strides = [1, 1]} : vector<16x768xf32> to vector<16x256xf32>
    %182 = vector.extract_strided_slice %178 {offsets = [0, 256], sizes = [16, 256], strides = [1, 1]} : vector<16x768xf32> to vector<16x256xf32>
    %183 = vector.extract_strided_slice %178 {offsets = [0, 512], sizes = [16, 256], strides = [1, 1]} : vector<16x768xf32> to vector<16x256xf32>
    %184 = arith.mulf %182, %164 : vector<16x256xf32>
    %185 = arith.mulf %181, %180 : vector<16x256xf32>
    %186 = arith.addf %184, %185 : vector<16x256xf32>
    %187 = math.tanh %186 : vector<16x256xf32>
    %188 = arith.mulf %183, %187 : vector<16x256xf32>
    %c8_i32 = arith.constant 8 : i32
    %189 = arith.truncf %188 : vector<16x256xf32> to vector<16x256xbf16>
    %c0_45 = arith.constant 0 : index
    %c0_46 = arith.constant 0 : index
    %190 = vector.load %arg5[%c0_45, %c0_46] : memref<256x1xbf16, #tpu.memory_space<vmem>>, vector<256x1xbf16>
    %cst_47 = arith.constant dense<0.000000e+00> : vector<16x1xf32>
    %191 = tpu.matmul %189, %190, %cst_47 {dimension_numbers = #tpu.dot_dimension_numbers<[1], [0], [0], [1], [0, 0, 1, 1], [], []>} : vector<16x256xbf16>, vector<256x1xbf16>, vector<16x1xf32> -> vector<16x1xf32>
    %c0_48 = arith.constant 0 : index
    %c0_49 = arith.constant 0 : index
    %192 = vector.load %arg6[%c0_48, %c0_49] : memref<1x1xf32, #tpu.memory_space<vmem>>, vector<1x1xf32>
    %193 = vector.broadcast %192 : vector<1x1xf32> to vector<16x1xf32>
    %194 = arith.addf %191, %193 : vector<16x1xf32>
    %195 = arith.negf %194 : vector<16x1xf32>
    %196 = math.exp %195 : vector<16x1xf32>
    %cst_50 = arith.constant 1.000000e+00 : f32
    %197 = vector.broadcast %cst_50 : f32 to vector<16x1xf32>
    %198 = arith.addf %197, %196 : vector<16x1xf32>
    %199 = arith.divf %197, %198 : vector<16x1xf32>
    %c0_51 = arith.constant 0 : index
    %c0_52 = arith.constant 0 : index
    %200 = vector.load %arg7[%c0_51, %c0_52] : memref<16x1xf32, #tpu.memory_space<vmem>>, vector<16x1xf32>
    tpu.vector_store %arg7[%c0_51, %c0_52], %199 {strides = array<i32>} : memref<16x1xf32, #tpu.memory_space<vmem>>, vector<16x1xf32>,
    return
  }
  func.func @transform_0(%arg0: i32) -> (i32, i32, i32) {
    %c0_i32 = arith.constant 0 : i32
    %c0_i32_0 = arith.constant 0 : i32
    %c0_i32_1 = arith.constant 0 : i32
    return %c0_i32, %arg0, %c0_i32_0 : i32, i32, i32
  }
  func.func @transform_1(%arg0: i32) -> (i32, i32) {
    %c0_i32 = arith.constant 0 : i32
    %c0_i32_0 = arith.constant 0 : i32
    %c0_i32_1 = arith.constant 0 : i32
    return %c0_i32, %c0_i32_0 : i32, i32
  }
  func.func @transform_2(%arg0: i32) -> (i32, i32) {
    %c0_i32 = arith.constant 0 : i32
    %c0_i32_0 = arith.constant 0 : i32
    %c0_i32_1 = arith.constant 0 : i32
    return %c0_i32, %c0_i32_0 : i32, i32
  }
  func.func @transform_3(%arg0: i32) -> (i32, i32) {
    %c0_i32 = arith.constant 0 : i32
    %c0_i32_0 = arith.constant 0 : i32
    %c0_i32_1 = arith.constant 0 : i32
    return %c0_i32, %c0_i32_0 : i32, i32
  }
  func.func @transform_4(%arg0: i32) -> (i32, i32) {
    %c0_i32 = arith.constant 0 : i32
    %c0_i32_0 = arith.constant 0 : i32
    %c0_i32_1 = arith.constant 0 : i32
    return %c0_i32, %c0_i32_0 : i32, i32
  }
  func.func @transform_5(%arg0: i32) -> (i32, i32) {
    %c0_i32 = arith.constant 0 : i32
    %c0_i32_0 = arith.constant 0 : i32
    %c0_i32_1 = arith.constant 0 : i32
    return %c0_i32, %c0_i32_0 : i32, i32
  }
  func.func @transform_6(%arg0: i32) -> (i32, i32) {
    %c0_i32 = arith.constant 0 : i32
    %c0_i32_0 = arith.constant 0 : i32
    return %arg0, %c0_i32 : i32, i32
  }
}

</mosaic_0001>

<bundles_post_ra>
// kernel: tpu_custom_call.1
= control target key start
LH: loop header
LB: loop body
LE: loop exit
PB: predicated region body
PF: predicated region fallthrough
CT: control target
= control target key end

     0   :  { %s8503_s0 = inlined_call_operand.hbm [shape: bf16[8,32,128], index: 0, kind: input, shape index: {}]   ;;  %s8504_s1 = inlined_call_operand.hbm [shape: bf16[128,1024], index: 1, kind: input, shape index: {}]   ;;  %s8505_s2 = inlined_call_operand.hbm [shape: bf16[256,1024], index: 2, kind: input, shape index: {}]   ;;  %s8506_s3 = inlined_call_operand.hbm [shape: f32[1,1024], index: 3, kind: input, shape index: {}]   ;;  %s8507_s4 = inlined_call_operand.hbm [shape: bf16[256,1], index: 4, kind: input, shape index: {}]   ;;  %s8508_s5 = inlined_call_operand.<no memory space> [shape: f32[1,1], index: 5, kind: input, shape index: {}]   ;;  %s8509_s6 = inlined_call_operand.hbm [shape: f32[32,1], index: 6, kind: output, shape index: {}]  }
   0x1   :  { %v11_v0 = vstv %s8508_s5 }
   0x2   :  { %12 = vst [vmem:[#allocation3] sm:$0x1] %v11_v0 }
   0x3   :  { %13 = vsyncpa [#allocation5], 0 }
   0x4   :  { %15 = vsyncpa [#allocation5 + $0x1], 0 }
   0x5   :  { %16 = vsyncpa [#allocation8], 0 }
   0x6   :  { %17 = vsyncpa [#allocation11], 0 }
   0x7   :  { %18 = vsyncpa [#allocation6], 0 }
   0x8   :  { %20 = vsyncpa [#allocation6 + $0x1], 0  ;;  %s6570_s23 = smov 0   ;;  %s6572_s24 = smov 0  }
   0x9   :  { %s6574_s25 = smov 0   ;;  %s6576_s26 = smov 0  }
   0xa LB: > { %s6591_s5 = sadd.s32 4294967295, %s6512_s26   ;;  %s5061_s27 = sadd.s32 4294967294, %s6512_s26   ;;  %s6512_s26 = sphi %s6576_s26, %s9670_s26   ;;  %s6508_s25 = sphi %s6574_s25, %s9674_s25   ;;  %s6504_s24 = sphi %s6572_s24, %s9673_s24   ;;  %s6500_s23 = sphi %s6570_s23, %s9672_s23  }
   0xb   : > { %s6595_s28 = sadd.s32 1, %s6512_s26   ;;  %s33_s29 = sadd.s32 1, %s6508_s25 }
   0xc   : > { %8853 = sst [smem:[#allocation21_spill]] %s6595_s28  ;;  %s30_s30 = ssub.s32 %s6512_s26, %s6595_s28 }
   0xd   : > { %p40_p0 = scmp.ne.s32.totalorder %s6508_s25, %s6504_s24  ;;  %p31_p1 = scmp.eq.s32.totalorder %s30_s30, 0 }
   0xe   : > { %p41_p2 = scmp.eq.s32.totalorder %s6512_s26, 0  ;;  %p46_p3 = scmp.ne.s32.totalorder %s6504_s24, %s6500_s23 }
   0xf   : > { %p8510_p4 = scmp.eq.s32.totalorder %s6591_s5, 0  ;;  %p175_p7 = scmp.eq.s32.totalorder %s6591_s5, 1 }
  0x10   : > { %s6607_s7 = scalar_select %p31_p1, %s6508_s25, %s33_s29  }
  0x11   : > { %p6609_p5 = por %p41_p2, %p40_p0  ;;  %p6615_p6 = por %p8510_p4, %p46_p3 }
  0x12   : > { %8854 = sst [smem:[#allocation22_spill]] %s6607_s7  ;;  %p181_p8 = scmp.eq.s32.totalorder %s5061_s27, 1 }
  0x13   : > { %s8855_s8 = scalar_select %p6609_p5, 1, 0 }
  0x14   : > { %s8856_s9 = scalar_select %p6615_p6, 1, 0 }
  0x15   : > { %p5062_p9 = scmp.ge.s32.totalorder %s6512_s26, 1  ;;  %p188_p10 = scmp.lt.s32.totalorder %s6512_s26, 3 }
  0x16   : > { %p6622_p11 = por %p175_p7, %p40_p0  ;;  %p6626_p12 = por %p181_p8, %p46_p3 }
  0x17   : > { %p6630_p13 = pnand %p5062_p9, %p188_p10  ;;  %s6514_s13 = smov [#allocation7]  }
  0x18   : > { %s8857_s10 = scalar_select %p6622_p11, 1, 0 }
  0x19   : > { %s8858_s11 = scalar_select %p6626_p12, 1, 0 }
  0x1a   : > { %s8859_s12 = scalar_select %p6630_p13, 1, 0 }
  0x1b   : > { %p5707_p1 = pneg %p6630_p13  ;;  %s200_s14 = sshll.u32 %s6514_s13, 4  ;;  %s201_s14 = int_to_ptr.vmem [resolvable:$true] %s200_s14 }
  0x1c   : > { %s6515_s16 = smov [#allocation10]   ;;  %s6326_s20 = scalar_lea.hbm %s8504_s1, 8192 }
  0x1d   : > { %p6638_p2 = pnand %p5707_p1, %p8510_p4  ;;  %s227_s17 = sshll.u32 %s6515_s16, 4  ;;  %s6642_s17 = int_to_ptr.vmem [resolvable:$true] %s227_s17 }
  0x1e   : > { %p6327_p0 = scmp.ne.s32.totalorder %s8504_s1, %s6326_s20  ;;  %p6333_p9 = scmp.lt.u32.totalorder %s6326_s20, %s8504_s1 }
  0x1f   : > { %p6652_p3 = pneg %p6638_p2 }
  0x21   : > { %p6329_p7 = pnand %p6652_p3, %p6327_p0 }
  0x23   : > { %p6330_p8 = pneg %p6329_p7 }
  0x25   : > { %p6335_p10 = pnand %p6333_p9, %p6330_p8 }
  0x27   : > { %6338 = shalt.err (!%p6335_p10)
}
  0x28   : > { %s6339_s13 = scalar_lea.vmem %s201_s14, 8192  ;;  %p6347_p11 = scmp.lt.s32.totalorder %s201_s14, %s201_s14 }
  0x29   : > { %p6340_p1 = scmp.ne.s32.totalorder %s201_s14, %s6339_s13  ;;  %p6348_p6 = scmp.lt.s32.totalorder %s6339_s13, %s6339_s13 }
  0x2b   : > { %p6342_p4 = pnand %p6340_p1, %p6652_p3  ;;  %p6349_p13 = por %p6348_p6, %p6347_p11 }
  0x2d   : > { %p6343_p12 = pneg %p6342_p4 }
  0x2f   : > { %p6350_p5 = pnand %p6349_p13, %p6343_p12 }
  0x31   : > { %6353 = shalt.err (!%p6350_p5)
}
  0x32   : > { %s8517_s16 = smov 512   ;;  %s8518_s18 = smov 32  }
  0x33   : > { %5710 = dma.hbm_to_vmem [thread:$0]  (!%p6638_p2), %s8504_s1, 8192, %s201_s14, [#allocation8], %s8517_s16, %s8517_s16, %s8518_s18  }
  0x34   : > { %s6354_s29 = scalar_lea.hbm %s8506_s3, 128 }
  0x35   : > { %p6355_p4 = scmp.ne.s32.totalorder %s8506_s3, %s6354_s29  ;;  %p6361_p11 = scmp.lt.u32.totalorder %s6354_s29, %s8506_s3 }
  0x37   : > { %p6357_p5 = pnand %p6355_p4, %p6652_p3 }
  0x39   : > { %p6358_p6 = pneg %p6357_p5 }
  0x3b   : > { %p6363_p12 = pnand %p6361_p11, %p6358_p6 }
  0x3d   : > { %6366 = shalt.err (!%p6363_p12)
}
  0x3e   : > { %s6367_s14 = scalar_lea.vmem %s6642_s17, 128  ;;  %p6375_p8 = scmp.lt.s32.totalorder %s6642_s17, %s6642_s17 }
  0x3f   : > { %p6368_p13 = scmp.ne.s32.totalorder %s6642_s17, %s6367_s14  ;;  %p6376_p9 = scmp.lt.s32.totalorder %s6367_s14, %s6367_s14 }
  0x41   : > { %p6370_p0 = pnand %p6368_p13, %p6652_p3  ;;  %p6377_p10 = por %p6376_p9, %p6375_p8 }
  0x43   : > { %p6371_p7 = pneg %p6370_p0 }
  0x45   : > { %p6378_p1 = pnand %p6377_p10, %p6371_p7 }
  0x47   : > { %6381 = shalt.err (!%p6378_p1)
}
  0x48   : > { %5716 = dma.hbm_to_vmem [thread:$0]  (!%p6638_p2), %s8506_s3, 128, %s6642_s17, [#allocation11]  }
  0x49   : > { %s6518_s19 = smov [#allocation9]   ;;  %s6519_s21 = smov [#allocation12]  }
  0x4a   : > { %s213_s20 = sshll.u32 %s6518_s19, 4  ;;  %s237_s22 = sshll.u32 %s6519_s21, 4  ;;  %s214_s20 = int_to_ptr.vmem [resolvable:$true] %s213_s20  ;;  %s238_s22 = int_to_ptr.vmem [resolvable:$true] %s237_s22 }
  0x4b   : > { %s6382_s13 = scalar_lea.hbm %s8505_s2, 16384 }
  0x4c   : > { %p6383_p4 = scmp.ne.s32.totalorder %s8505_s2, %s6382_s13  ;;  %p6389_p11 = scmp.lt.u32.totalorder %s6382_s13, %s8505_s2 }
  0x4e   : > { %p6385_p5 = pnand %p6383_p4, %p6652_p3 }
  0x50   : > { %p6386_p6 = pneg %p6385_p5 }
  0x52   : > { %p6391_p12 = pnand %p6389_p11, %p6386_p6 }
  0x54   : > { %6394 = shalt.err (!%p6391_p12)
}
  0x55   : > { %s6395_s17 = scalar_lea.vmem %s214_s20, 16384  ;;  %p6403_p8 = scmp.lt.s32.totalorder %s214_s20, %s214_s20 }
  0x56   : > { %p6396_p13 = scmp.ne.s32.totalorder %s214_s20, %s6395_s17  ;;  %p6404_p9 = scmp.lt.s32.totalorder %s6395_s17, %s6395_s17 }
  0x58   : > { %p6398_p0 = pnand %p6396_p13, %p6652_p3  ;;  %p6405_p10 = por %p6404_p9, %p6403_p8 }
  0x5a   : > { %p6399_p7 = pneg %p6398_p0 }
  0x5c   : > { %p6406_p1 = pnand %p6405_p10, %p6399_p7 }
  0x5e   : > { %6409 = shalt.err (!%p6406_p1)
}
  0x5f   : > { %s8862_s16 = smov 32   ;;  %s8863_s7 = smov 512  }
  0x60   : > { %5713 = dma.hbm_to_vmem [thread:$0]  (!%p6638_p2), %s8505_s2, 16384, %s214_s20, [#allocation8], %s8863_s7, %s8863_s7, %s8862_s16  }
  0x61   : > { %s6410_s30 = scalar_lea.hbm %s8507_s4, 2048 }
  0x62   : > { %p6411_p4 = scmp.ne.s32.totalorder %s8507_s4, %s6410_s30  ;;  %p6417_p11 = scmp.lt.u32.totalorder %s6410_s30, %s8507_s4 }
  0x64   : > { %p6413_p5 = pnand %p6411_p4, %p6652_p3 }
  0x66   : > { %p6414_p6 = pneg %p6413_p5 }
  0x68   : > { %p6419_p12 = pnand %p6417_p11, %p6414_p6 }
  0x6a   : > { %6422 = shalt.err (!%p6419_p12)
}
  0x6b   : > { %s6423_s18 = scalar_lea.vmem %s238_s22, 2048  ;;  %p6431_p8 = scmp.lt.s32.totalorder %s238_s22, %s238_s22 }
  0x6c   : > { %p6424_p13 = scmp.ne.s32.totalorder %s238_s22, %s6423_s18  ;;  %p6432_p9 = scmp.lt.s32.totalorder %s6423_s18, %s6423_s18 }
  0x6e   : > { %p6426_p0 = pnand %p6424_p13, %p6652_p3  ;;  %p6433_p10 = por %p6432_p9, %p6431_p8 }
  0x70   : > { %p6427_p7 = pneg %p6426_p0 }
  0x72   : > { %p6434_p1 = pnand %p6433_p10, %p6427_p7 }
  0x74   : > { %6437 = shalt.err (!%p6434_p1)
}
  0x75   : > { %s6520_s20 = smov 64   ;;  %s6521_s16 = smov 4  }
  0x76   : > { %5719 = dma.hbm_to_vmem [thread:$0]  (!%p6638_p2), %s8507_s4, 2048, %s238_s22, [#allocation11], %s6520_s20, %s6520_s20, %s6521_s16  }
  0x77   : > { %p5067_p4 = scmp.ge.s32.totalorder %s6512_s26, 2 }
  0x79   : > { %250 = sbr.rel (%p5067_p4) target bundleno = 143 (0x8f), region = 36 }
  0x80   : > { %s254_s27 = sand.u32 1, %s6508_s25   ;;  %s5400_s21 = sshll.u32 %s6512_s26, 7 }
  0x81   : > { %s5068_s15 = sshll.u32 %s254_s27, 6  ;;  %s264_s22 = scalar_lea.hbm %s8503_s0, %s5400_s21 }
  0x82   : > { %p8864_p2 = scmp.ne.s32.totalorder %s8855_s8, 0  ;;  %s258_s14 = scalar_lea.vmem [#allocation4], %s5068_s15 }
  0x83   : > { %s277_s28 = sshll.u32 %s258_s14, 4  ;;  %s6522_s18 = smov 256   ;;  %s278_s28 = int_to_ptr.vmem [resolvable:$true] %s277_s28 }
  0x84   : > { %s5688_s13 = scalar_select %p8864_p2, [#allocation0], [#allocation16] }
  0x85   : > { %5689 = sst [smem:[#allocation15]] (%p8864_p2), %s6522_s18  ;;  %s6523_s20 = smov 128  }
  0x86   : > { %s269_s17 = sld [smem:[%s5688_s13]]   ;;  %s6524_s16 = smov 2  }
  0x87   : > { %5690 = sst [smem:[#allocation15 + $0x1]] (%p8864_p2), %s6523_s20  ;;  %s6525_s7 = smov 64  }
  0x88   : > { %5691 = sst [smem:[#allocation15 + $0x2]] (%p8864_p2), %s6524_s16  ;;  %s6526_s21 = smov 4  }
  0x89   : > { %5692 = sst [smem:[#allocation15 + $0x3]] (%p8864_p2), %s6525_s7  ;;  %s255_s29 = scalar_lea.sflag [#allocation5], %s254_s27 }
  0x8a   : > { %5693 = sst [smem:[#allocation15 + $0x4]] (%p8864_p2), %s6525_s7  ;;  %s6527_s30 = smov [#allocation14]  }
  0x8b   : > { %5694 = sst [smem:[#allocation15 + $0x5]] (%p8864_p2), %s6526_s21 }
  0x8c   : > { %s5071_s19 = sshll.u32 %s269_s17, 26 }
  0x8d   : > { %s5072_s15 = sadd.s32 134217728, %s5071_s19 }
  0x8e   : > { %5695 = dma.general (%p8864_p2), %s264_s22, 1024, %s278_s28, %s255_s29, %s6527_s30, [#allocation15], %s5072_s15, 0  }
  0x8f PF: > { %p8865_p3 = scmp.ne.s32.totalorder %s8859_s12, 0 }
  0x91   : > { %302 = sbr.rel (%p8865_p3) target bundleno = 3115 (0xc2b), region = 44 }
  0x98   : > { %s6760_s13 = sand.u32 1, %s6504_s24   ;;  %p8866_p5 = scmp.ne.s32.totalorder %s8856_s9, 0 }
  0x99   : > { %s5074_s14 = sshll.u32 %s6760_s13, 6  ;;  %s305_s17 = scalar_lea.sflag [#allocation5], %s6760_s13 }
  0x9a   : > { %s6764_s18 = scalar_lea.vmem [#allocation4], %s5074_s14 }
  0x9b   : > { %6483 = dma.done.wait (%p8866_p5), %s305_s17, 1024  }
  0x9c   : > { %6485 = vsyncadd (%p8866_p5), %s305_s17, 4294966272  ;;  %p8867_p6 = scmp.eq.s32.totalorder %s6591_s5, 0 }
  0x9e   : > { %6487 = dma.done.wait (%p8867_p6), [#allocation8], 24576   ;;  %p8868_p11 = pmov %p8867_p6 }
  0x9f   : > { %p8869_p12 = pmov %p8867_p6 }
  0xa0   : > { %6489 = vsyncadd (%p8868_p11), [#allocation8], 4294942720 }
  0xa1   : > { %6491 = dma.done.wait (%p8869_p12), [#allocation11], 2176   ;;  %p8870_p13 = pmov %p8867_p6 }
  0xa2   : > { %v8523_v1 = vmov 0   ;;  %v372_v2 = vld [vmem:[#allocation7] sm:$0xff]  ;;  %v373_v4 = vld [vmem:[#allocation7 + $0x8] sm:$0xff]  ;;  %v374_v0 = vld [vmem:[#allocation7 + $0x10] sm:$0xff]  ;;  %s5079_s8 = sshll.u32 %s6760_s13, 4  ;;  %s5401_s9 = sshll.u32 %s6591_s5, 8 }
  0xa3   : > { %6493 = vsyncadd (%p8870_p13), [#allocation11], 4294965120  ;;  %836 = vmatprep.mubr.bf16.mxu0 %v8523_v1  ;;  %949 = vmatprep.mubr.bf16.mxu1 %v8523_v1  ;;  %v376_v3 = vld [vmem:[#allocation7 + $0x20] sm:$0xff]  ;;  %v377_v6 = vld [vmem:[#allocation7 + $0x28] sm:$0xff]  ;;  %s352_s12 = scalar_lea.vmem [#allocation13], %s5079_s8  ;;  %vm4933_vm0 = vcmask 7168   ;;  %s8457_s20 = scalar_lea.hbm %s8509_s6, %s5401_s9 }
  0xa4   : > { %v5089_v5 = vcombine.high %v372_v2, %v376_v3  ;;  %v5088_v7 = vcombine.low %v372_v2, %v376_v3  ;;  %v380_v8 = vld [vmem:[#allocation7 + $0x40] sm:$0xff]  ;;  %v5091_v10 = vcombine.high %v373_v4, %v377_v6  ;;  %v5090_v11 = vcombine.low %v373_v4, %v377_v6  ;;  %v381_v13 = vld [vmem:[#allocation7 + $0x48] sm:$0xff]  ;;  %v378_v2 = vld [vmem:[#allocation7 + $0x30] sm:$0xff]  ;;  %s4950_s27 = sshll.u32 %s352_s12, 4  ;;  %s4937_s16 = scalar_lea.sflag [#allocation6], %s6760_s13  ;;  %s8459_s27 = int_to_ptr.vmem [resolvable:$true] %s4950_s27 }
  0xa5   : > { %v384_v9 = vld [vmem:[#allocation7 + $0x60] sm:$0xff]  ;;  %v385_v14 = vld [vmem:[#allocation7 + $0x68] sm:$0xff]  ;;  %v375_v3 = vld [vmem:[#allocation7 + $0x18] sm:$0xff]  ;;  %s6438_s7 = scalar_lea.vmem %s8459_s27, 256  ;;  %p9668_p7 = scmp.ne.s32.totalorder %s8857_s10, 0 }
  0xa6   : > { %v5097_v12 = vcombine.high %v380_v8, %v384_v9  ;;  %v388_v15 = vld [vmem:[#allocation7 + $0x80] sm:$0xff]  ;;  %804 = vmatprep.subr.bf16.mxu0 %v5089_v5  ;;  %v5099_v16 = vcombine.high %v381_v13, %v385_v14  ;;  %v389_v18 = vld [vmem:[#allocation7 + $0x88] sm:$0xff]  ;;  %917 = vmatprep.subr.bf16.mxu1 %v5091_v10  ;;  %v5096_v20 = vcombine.low %v380_v8, %v384_v9  ;;  %v379_v4 = vld [vmem:[#allocation7 + $0x38] sm:$0xff]  ;;  %p6439_p0 = scmp.ne.s32.totalorder %s8459_s27, %s6438_s7  ;;  %s6529_s5 = smov [#allocation13]  }
  0xa7   : > { %v392_v17 = vld [vmem:[#allocation7 + $0xa0] sm:$0xff]  ;;  %v393_v19 = vld [vmem:[#allocation7 + $0xa8] sm:$0xff]  ;;  %805 = vmatpush1.bf16.msra.mxu0 %v5088_v7  ;;  %918 = vmatpush1.bf16.msra.mxu1 %v5090_v11  ;;  %v5098_v21 = vcombine.low %v381_v13, %v385_v14  ;;  %v5093_v7 = vcombine.high %v374_v0, %v378_v2  ;;  %v5095_v8 = vcombine.high %v375_v3, %v379_v4  ;;  %v382_v10 = vld [vmem:[#allocation7 + $0x50] sm:$0xff]  ;;  %s6442_s19 = sshll.u32 %s6529_s5, 4  ;;  %s6443_s19 = int_to_ptr.vmem [resolvable:$false] %s6442_s19 }
  0xa8   : > { %806 = vmatprep.subr.bf16.mxu0 %v5097_v12  ;;  %v5105_v22 = vcombine.high %v388_v15, %v392_v17  ;;  %919 = vmatprep.subr.bf16.mxu1 %v5099_v16  ;;  %v5107_v23 = vcombine.high %v389_v18, %v393_v19  ;;  %v396_v24 = vld [vmem:[#allocation7 + $0xc0] sm:$0xff]  ;;  %v397_v26 = vld [vmem:[#allocation7 + $0xc8] sm:$0xff]  ;;  %v5104_v28 = vcombine.low %v388_v15, %v392_v17  ;;  %v386_v11 = vld [vmem:[#allocation7 + $0x70] sm:$0xff]  ;;  %p6440_p8 = pnand %p6439_p0, %p9668_p7  ;;  %s6444_s21 = scalar_lea.vmem %s6443_s19, 512 }
  0xa9   : > { %v400_v25 = vld [vmem:[#allocation7 + $0xe0] sm:$0xff]  ;;  %v401_v27 = vld [vmem:[#allocation7 + $0xe8] sm:$0xff]  ;;  %v5106_v29 = vcombine.low %v389_v18, %v393_v19  ;;  %v5092_v12 = vcombine.low %v374_v0, %v378_v2  ;;  %v383_v13 = vld [vmem:[#allocation7 + $0x58] sm:$0xff]  ;;  %v5094_v15 = vcombine.low %v375_v3, %v379_v4  ;;  %v5101_v16 = vcombine.high %v382_v10, %v386_v11  ;;  %p6445_p10 = scmp.lt.s32.totalorder %s8459_s27, %s6443_s19  ;;  %p6446_p1 = scmp.lt.s32.totalorder %s6444_s21, %s6438_s7 }
  0xaa   : > { %v5113_v30 = vcombine.high %v396_v24, %v400_v25  ;;  %v5115_v31 = vcombine.high %v397_v26, %v401_v27  ;;  %v404_v32 = vld [vmem:[#allocation7 + $0x100] sm:$0xff]  ;;  %v405_v34 = vld [vmem:[#allocation7 + $0x108] sm:$0xff]  ;;  %v5112_v36 = vcombine.low %v396_v24, %v400_v25  ;;  %v5114_v37 = vcombine.low %v397_v26, %v401_v27  ;;  %v387_v14 = vld [vmem:[#allocation7 + $0x78] sm:$0xff]  ;;  %p6441_p9 = pneg %p6440_p8 }
  0xab   : > { %807 = vmatpush1.bf16.msra.mxu0 %v5096_v20  ;;  %920 = vmatpush1.bf16.msra.mxu1 %v5098_v21  ;;  %v408_v33 = vld [vmem:[#allocation7 + $0x120] sm:$0xff]  ;;  %v409_v35 = vld [vmem:[#allocation7 + $0x128] sm:$0xff]  ;;  %v390_v17 = vld [vmem:[#allocation7 + $0x90] sm:$0xff]  ;;  %v5103_v19 = vcombine.high %v383_v13, %v387_v14  ;;  %p6447_p2 = por %p6446_p1, %p6445_p10 }
  0xac   : > { %808 = vmatprep.subr.bf16.mxu0 %v5105_v22  ;;  %921 = vmatprep.subr.bf16.mxu1 %v5107_v23  ;;  %v5121_v38 = vcombine.high %v404_v32, %v408_v33  ;;  %v5123_v39 = vcombine.high %v405_v34, %v409_v35  ;;  %v412_v40 = vld [vmem:[#allocation7 + $0x140] sm:$0xff]  ;;  %v413_v42 = vld [vmem:[#allocation7 + $0x148] sm:$0xff]  ;;  %v5120_v44 = vcombine.low %v404_v32, %v408_v33  ;;  %v394_v18 = vld [vmem:[#allocation7 + $0xb0] sm:$0xff] }
  0xad   : > { %v416_v41 = vld [vmem:[#allocation7 + $0x160] sm:$0xff]  ;;  %v417_v43 = vld [vmem:[#allocation7 + $0x168] sm:$0xff]  ;;  %v5122_v45 = vcombine.low %v405_v34, %v409_v35  ;;  %v391_v20 = vld [vmem:[#allocation7 + $0x98] sm:$0xff]  ;;  %v5100_v22 = vcombine.low %v382_v10, %v386_v11  ;;  %v5102_v23 = vcombine.low %v383_v13, %v387_v14  ;;  %v5109_v24 = vcombine.high %v390_v17, %v394_v18  ;;  %p6448_p3 = pnand %p6447_p2, %p6441_p9 }
  0xae   : > { %v5129_v46 = vcombine.high %v412_v40, %v416_v41  ;;  %v5131_v47 = vcombine.high %v413_v42, %v417_v43  ;;  %v420_v48 = vld [vmem:[#allocation7 + $0x180] sm:$0xff]  ;;  %v421_v50 = vld [vmem:[#allocation7 + $0x188] sm:$0xff]  ;;  %v5128_v52 = vcombine.low %v412_v40, %v416_v41  ;;  %v5130_v53 = vcombine.low %v413_v42, %v417_v43  ;;  %v395_v21 = vld [vmem:[#allocation7 + $0xb8] sm:$0xff] }
  0xaf   : > { %809 = vmatpush1.bf16.msra.mxu0 %v5104_v28  ;;  %922 = vmatpush1.bf16.msra.mxu1 %v5106_v29  ;;  %v424_v49 = vld [vmem:[#allocation7 + $0x1a0] sm:$0xff]  ;;  %v425_v51 = vld [vmem:[#allocation7 + $0x1a8] sm:$0xff]  ;;  %v5111_v25 = vcombine.high %v391_v20, %v395_v21  ;;  %v398_v27 = vld [vmem:[#allocation7 + $0xd0] sm:$0xff]  ;;  %v5110_v32 = vcombine.low %v391_v20, %v395_v21 }
  0xb0   : > { %810 = vmatprep.subr.bf16.mxu0 %v5113_v30  ;;  %923 = vmatprep.subr.bf16.mxu1 %v5115_v31  ;;  %v5137_v54 = vcombine.high %v420_v48, %v424_v49  ;;  %v428_v55 = vld [vmem:[#allocation7 + $0x1c0] sm:$0xff]  ;;  %v5139_v56 = vcombine.high %v421_v50, %v425_v51  ;;  %v429_v58 = vld [vmem:[#allocation7 + $0x1c8] sm:$0xff]  ;;  %v5136_v60 = vcombine.low %v420_v48, %v424_v49  ;;  %v402_v28 = vld [vmem:[#allocation7 + $0xf0] sm:$0xff] }
  0xb1   : > { %v432_v57 = vld [vmem:[#allocation7 + $0x1e0] sm:$0xff]  ;;  %v433_v59 = vld [vmem:[#allocation7 + $0x1e8] sm:$0xff]  ;;  %v5138_v61 = vcombine.low %v421_v50, %v425_v51  ;;  %v399_v29 = vld [vmem:[#allocation7 + $0xd8] sm:$0xff]  ;;  %v5108_v31 = vcombine.low %v390_v17, %v394_v18  ;;  %v5117_v33 = vcombine.high %v398_v27, %v402_v28 }
  0xb2   : > { %v5145_v62 = vcombine.high %v428_v55, %v432_v57  ;;  %v5147_v63 = vcombine.high %v429_v58, %v433_v59  ;;  %v5144_v5 = vcombine.low %v428_v55, %v432_v57  ;;  %v5146_v6 = vcombine.low %v429_v58, %v433_v59  ;;  %v6781_v9 = vld [vmem:[%s6764_s18] sm:$0xff]   ;;  %v6788_v26 = vld [vmem:[%s6764_s18 + $0x8] sm:$0xff]   ;;  %v403_v30 = vld [vmem:[#allocation7 + $0xf8] sm:$0xff] }
  0xb3   : > { %811 = vmatpush1.bf16.msra.mxu0 %v5112_v36  ;;  %924 = vmatpush1.bf16.msra.mxu1 %v5114_v37  ;;  %v5119_v34 = vcombine.high %v399_v29, %v403_v30  ;;  %v406_v35 = vld [vmem:[#allocation7 + $0x110] sm:$0xff]  ;;  %v407_v37 = vld [vmem:[#allocation7 + $0x118] sm:$0xff]  ;;  %v5118_v40 = vcombine.low %v399_v29, %v403_v30  ;;  %v1559_v10 = vld [vmem:[#allocation9 + $0x28] sm:$0xff] }
  0xb4   : > { %812 = vmatprep.subr.bf16.mxu0 %v5121_v38  ;;  %925 = vmatprep.subr.bf16.mxu1 %v5123_v39  ;;  %v410_v36 = vld [vmem:[#allocation7 + $0x130] sm:$0xff]  ;;  %v411_v38 = vld [vmem:[#allocation7 + $0x138] sm:$0xff]  ;;  %v5116_v39 = vcombine.low %v398_v27, %v402_v28  ;;  %v1566_v20 = vld [vmem:[#allocation9 + $0x60] sm:$0xff] }
  0xb5   : > { %v5125_v41 = vcombine.high %v406_v35, %v410_v36  ;;  %v6795_v42 = vld [vmem:[%s6764_s18 + $0x10] sm:$0xff]   ;;  %v5127_v43 = vcombine.high %v407_v37, %v411_v38  ;;  %v5124_v48 = vcombine.low %v406_v35, %v410_v36  ;;  %v5126_v49 = vcombine.low %v407_v37, %v411_v38  ;;  %v427_v55 = vld [vmem:[#allocation7 + $0x1b8] sm:$0xff]  ;;  %v1563_v21 = vld [vmem:[#allocation9 + $0x48] sm:$0xff] }
  0xb6   : > { %v6802_v59 = vld [vmem:[%s6764_s18 + $0x18] sm:$0xff]   ;;  %v6829_v17 = vld [vmem:[%s6764_s18 + $0x30] sm:$0xff]   ;;  %v1570_v28 = vld [vmem:[#allocation9 + $0x80] sm:$0xff] }
  0xb7   : > { %813 = vmatpush1.bf16.msra.mxu0 %v5120_v44  ;;  %926 = vmatpush1.bf16.msra.mxu1 %v5122_v45  ;;  %v414_v44 = vld [vmem:[#allocation7 + $0x150] sm:$0xff]  ;;  %v435_v0 = vld [vmem:[#allocation7 + $0x1f8] sm:$0xff]  ;;  %v1574_v29 = vld [vmem:[#allocation9 + $0xa0] sm:$0xff] }
  0xb8   : > { %814 = vmatprep.subr.bf16.mxu0 %v5129_v46  ;;  %927 = vmatprep.subr.bf16.mxu1 %v5131_v47  ;;  %v418_v45 = vld [vmem:[#allocation7 + $0x170] sm:$0xff]  ;;  %v415_v46 = vld [vmem:[#allocation7 + $0x158] sm:$0xff]  ;;  %v1571_v30 = vld [vmem:[#allocation9 + $0x88] sm:$0xff] }
  0xb9   : > { %v419_v47 = vld [vmem:[#allocation7 + $0x178] sm:$0xff]  ;;  %v5133_v50 = vcombine.high %v414_v44, %v418_v45  ;;  %v1578_v36 = vld [vmem:[#allocation9 + $0xc0] sm:$0xff]  ;;  %v1579_v37 = vld [vmem:[#allocation9 + $0xc8] sm:$0xff] }
  0xba   : > { %v5135_v51 = vcombine.high %v415_v46, %v419_v47  ;;  %v5134_v57 = vcombine.low %v415_v46, %v419_v47  ;;  %v6836_v18 = vld [vmem:[%s6764_s18 + $0x38] sm:$0xff]   ;;  %v1583_v38 = vld [vmem:[#allocation9 + $0xe8] sm:$0xff] }
  0xbb   : > { %815 = vmatpush1.bf16.msra.mxu0 %v5128_v52  ;;  %928 = vmatpush1.bf16.msra.mxu1 %v5130_v53  ;;  %v422_v52 = vld [vmem:[#allocation7 + $0x190] sm:$0xff]  ;;  %v1587_v46 = vld [vmem:[#allocation9 + $0x108] sm:$0xff] }
  0xbc   : > { %816 = vmatprep.subr.bf16.mxu0 %v5137_v54  ;;  %929 = vmatprep.subr.bf16.mxu1 %v5139_v56  ;;  %v426_v53 = vld [vmem:[#allocation7 + $0x1b0] sm:$0xff]  ;;  %v423_v54 = vld [vmem:[#allocation7 + $0x198] sm:$0xff]  ;;  %v5132_v56 = vcombine.low %v414_v44, %v418_v45  ;;  %v1586_v44 = vld [vmem:[#allocation9 + $0x100] sm:$0xff] }
  0xbd   : > { %v5141_v58 = vcombine.high %v422_v52, %v426_v53  ;;  %v5140_v2 = vcombine.low %v422_v52, %v426_v53  ;;  %v5142_v3 = vcombine.low %v423_v54, %v427_v55  ;;  %v1590_v45 = vld [vmem:[#allocation9 + $0x120] sm:$0xff]  ;;  %v1591_v47 = vld [vmem:[#allocation9 + $0x128] sm:$0xff] }
  0xbe   : > { %v1594_v52 = vld [vmem:[#allocation9 + $0x140] sm:$0xff]  ;;  %v1595_v53 = vld [vmem:[#allocation9 + $0x148] sm:$0xff] }
  0xbf   : > { %817 = vmatpush1.bf16.msra.mxu0 %v5136_v60  ;;  %930 = vmatpush1.bf16.msra.mxu1 %v5138_v61  ;;  %v5143_v60 = vcombine.high %v423_v54, %v427_v55  ;;  %v430_v61 = vld [vmem:[#allocation7 + $0x1d0] sm:$0xff]  ;;  %v1599_v54 = vld [vmem:[#allocation9 + $0x168] sm:$0xff]  ;;  %v6895_v55 = vcombine.low %v1586_v44, %v1590_v45 }
  0xc0   : > { %818 = vmatprep.subr.bf16.mxu0 %v5145_v62  ;;  %931 = vmatprep.subr.bf16.mxu1 %v5147_v63  ;;  %v434_v62 = vld [vmem:[#allocation7 + $0x1f0] sm:$0xff]  ;;  %v431_v63 = vld [vmem:[#allocation7 + $0x1d8] sm:$0xff] }
  0xc1   : > { %v5149_v4 = vcombine.high %v430_v61, %v434_v62  ;;  %v5148_v11 = vcombine.low %v430_v61, %v434_v62  ;;  %v5150_v13 = vcombine.low %v431_v63, %v435_v0  ;;  %8889 = vst [vmem:[#allocation41_spill] sm:$0xff] %v6895_v55  ;;  %v1606_v61 = vld [vmem:[#allocation9 + $0x1a0] sm:$0xff]  ;;  %v1603_v62 = vld [vmem:[#allocation9 + $0x188] sm:$0xff] }
  0xc3   : > { %819 = vmatpush1.bf16.msra.mxu0 %v5144_v5  ;;  %932 = vmatpush1.bf16.msra.mxu1 %v5146_v6  ;;  %v1554_v5 = vld [vmem:[#allocation9] sm:$0xff]  ;;  %v5151_v6 = vcombine.high %v431_v63, %v435_v0  ;;  %v1607_v63 = vld [vmem:[#allocation9 + $0x1a8] sm:$0xff] }
  0xc4   : > { %1030 = vmatprep.subr.bf16.mxu0 %v5093_v7  ;;  %1143 = vmatprep.subr.bf16.mxu1 %v5095_v8  ;;  %v1558_v7 = vld [vmem:[#allocation9 + $0x20] sm:$0xff]  ;;  %v1555_v8 = vld [vmem:[#allocation9 + $0x8] sm:$0xff] }
  0xc5   : > { %v6811_v14 = vcombine.high %v1554_v5, %v1558_v7 }
  0xc6   : > { %837 = vmatmul.mubr.bf16.vlgmr.msra.gmra.mrb[0].mxu0 %v6781_v9  ;;  %950 = vmatmul.mubr.bf16.vlgmr.msra.gmra.mrb[0].mxu1 %v6781_v9 }
  0xc7   : > { %1031 = vmatpush1.bf16.msra.mxu0 %v5092_v12  ;;  %1144 = vmatpush1.bf16.msra.mxu1 %v5094_v15  ;;  %v6809_v12 = vld [vmem:[%s6764_s18 + $0x20] sm:$0xff]   ;;  %8871 = vst [vmem:[#allocation23_spill] sm:$0xff] %v6811_v14  ;;  %v6813_v15 = vcombine.high %v1555_v8, %v1559_v10 }
  0xc8   : > { %846 = vmatprep.mubr.bf16.mxu0 %v8523_v1  ;;  %959 = vmatprep.mubr.bf16.mxu1 %v8523_v1 }
  0xc9   : > { %1032 = vmatprep.subr.bf16.mxu0 %v5101_v16  ;;  %1145 = vmatprep.subr.bf16.mxu1 %v5103_v19  ;;  %8872 = vst [vmem:[#allocation24_spill] sm:$0xff] %v6813_v15  ;;  %v6822_v16 = vld [vmem:[%s6764_s18 + $0x28] sm:$0xff]   ;;  %v1562_v19 = vld [vmem:[#allocation9 + $0x40] sm:$0xff] }
  0xcb   : > { %1033 = vmatpush1.bf16.msra.mxu0 %v5100_v22  ;;  %1146 = vmatpush1.bf16.msra.mxu1 %v5102_v23  ;;  %v1567_v22 = vld [vmem:[#allocation9 + $0x68] sm:$0xff]  ;;  %v6842_v23 = vcombine.low %v1554_v5, %v1558_v7  ;;  %v1610_v5 = vld [vmem:[#allocation9 + $0x1c0] sm:$0xff] }
  0xcc   : > { %1034 = vmatprep.subr.bf16.mxu0 %v5109_v24  ;;  %1147 = vmatprep.subr.bf16.mxu1 %v5111_v25  ;;  %v6844_v24 = vcombine.low %v1555_v8, %v1559_v10  ;;  %v6846_v25 = vcombine.high %v1562_v19, %v1566_v20  ;;  %v6848_v27 = vcombine.high %v1563_v21, %v1567_v22  ;;  %v1615_v7 = vld [vmem:[#allocation9 + $0x1e8] sm:$0xff] }
  0xcd   : > { %8873 = vst [vmem:[#allocation25_spill] sm:$0xff] %v6842_v23  ;;  %v6927_v10 = vcombine.low %v1603_v62, %v1607_v63 }
  0xce   : > { %847 = vmatmul.mubr.bf16.gmra.mrb[4].mxu0 %v6788_v26  ;;  %960 = vmatmul.mubr.bf16.gmra.mrb[4].mxu1 %v6788_v26  ;;  %8874 = vst [vmem:[#allocation26_spill] sm:$0xff] %v6844_v24  ;;  %8875 = vst [vmem:[#allocation27_spill] sm:$0xff] %v6846_v25 }
  0xcf   : > { %856 = vmatprep.mubr.bf16.mxu0 %v8523_v1  ;;  %969 = vmatprep.mubr.bf16.mxu1 %v8523_v1  ;;  %8876 = vst [vmem:[#allocation28_spill] sm:$0xff] %v6848_v27  ;;  %8898 = vst [vmem:[#allocation50_spill] sm:$0xff] %v6927_v10 }
  0xd0   : > { %1035 = vmatpush1.bf16.msra.mxu0 %v5108_v31  ;;  %1148 = vmatpush1.bf16.msra.mxu1 %v5110_v32  ;;  %v1575_v31 = vld [vmem:[#allocation9 + $0xa8] sm:$0xff]  ;;  %v6853_v32 = vcombine.low %v1562_v19, %v1566_v20  ;;  %v1618_v19 = vld [vmem:[#allocation9 + $0x200] sm:$0xff] }
  0xd1   : > { %1036 = vmatprep.subr.bf16.mxu0 %v5117_v33  ;;  %1149 = vmatprep.subr.bf16.mxu1 %v5119_v34  ;;  %v6857_v33 = vcombine.low %v1563_v21, %v1567_v22  ;;  %v6859_v34 = vcombine.high %v1570_v28, %v1574_v29  ;;  %v6863_v35 = vcombine.high %v1571_v30, %v1575_v31  ;;  %v1622_v20 = vld [vmem:[#allocation9 + $0x220] sm:$0xff]  ;;  %v1619_v21 = vld [vmem:[#allocation9 + $0x208] sm:$0xff] }
  0xd2   : > { %8877 = vst [vmem:[#allocation29_spill] sm:$0xff] %v6853_v32  ;;  %v1623_v22 = vld [vmem:[#allocation9 + $0x228] sm:$0xff] }
  0xd3   : > { %8878 = vst [vmem:[#allocation30_spill] sm:$0xff] %v6857_v33  ;;  %8879 = vst [vmem:[#allocation31_spill] sm:$0xff] %v6859_v34 }
  0xd4   : > { %1037 = vmatpush1.bf16.msra.mxu0 %v5116_v39  ;;  %1150 = vmatpush1.bf16.msra.mxu1 %v5118_v40  ;;  %8880 = vst [vmem:[#allocation32_spill] sm:$0xff] %v6863_v35  ;;  %v6867_v39 = vcombine.low %v1570_v28, %v1574_v29  ;;  %v6871_v40 = vcombine.low %v1571_v30, %v1575_v31 }
  0xd5   : > { %1038 = vmatprep.subr.bf16.mxu0 %v5125_v41  ;;  %1151 = vmatprep.subr.bf16.mxu1 %v5127_v43  ;;  %v6876_v43 = vcombine.high %v1579_v37, %v1583_v38  ;;  %v6943_v30 = vcombine.high %v1618_v19, %v1622_v20  ;;  %v6947_v31 = vcombine.high %v1619_v21, %v1623_v22 }
  0xd6   : > { %857 = vmatmul.mubr.bf16.gmra.mrb[8].mxu0 %v6795_v42  ;;  %970 = vmatmul.mubr.bf16.gmra.mrb[8].mxu1 %v6795_v42  ;;  %8881 = vst [vmem:[#allocation33_spill] sm:$0xff] %v6867_v39  ;;  %8882 = vst [vmem:[#allocation34_spill] sm:$0xff] %v6871_v40 }
  0xd7   : > { %866 = vmatprep.mubr.bf16.mxu0 %v8523_v1  ;;  %979 = vmatprep.mubr.bf16.mxu1 %v8523_v1  ;;  %8884 = vst [vmem:[#allocation36_spill] sm:$0xff] %v6876_v43  ;;  %8903 = vst [vmem:[#allocation55_spill] sm:$0xff] %v6943_v30 }
  0xd8   : > { %1039 = vmatpush1.bf16.msra.mxu0 %v5124_v48  ;;  %1152 = vmatpush1.bf16.msra.mxu1 %v5126_v49  ;;  %v6885_v49 = vcombine.low %v1579_v37, %v1583_v38  ;;  %8904 = vst [vmem:[#allocation56_spill] sm:$0xff] %v6947_v31  ;;  %v1631_v37 = vld [vmem:[#allocation9 + $0x268] sm:$0xff]  ;;  %v6951_v38 = vcombine.low %v1618_v19, %v1622_v20 }
  0xd9   : > { %1040 = vmatprep.subr.bf16.mxu0 %v5133_v50  ;;  %1153 = vmatprep.subr.bf16.mxu1 %v5135_v51  ;;  %v6887_v50 = vcombine.high %v1586_v44, %v1590_v45  ;;  %v6891_v51 = vcombine.high %v1587_v46, %v1591_v47  ;;  %v6955_v44 = vcombine.low %v1619_v21, %v1623_v22  ;;  %v1650_v21 = vld [vmem:[#allocation9 + $0x300] sm:$0xff] }
  0xda   : > { %8886 = vst [vmem:[#allocation38_spill] sm:$0xff] %v6885_v49  ;;  %8905 = vst [vmem:[#allocation57_spill] sm:$0xff] %v6951_v38  ;;  %v1654_v22 = vld [vmem:[#allocation9 + $0x320] sm:$0xff] }
  0xdb   : > { %8887 = vst [vmem:[#allocation39_spill] sm:$0xff] %v6887_v50  ;;  %8888 = vst [vmem:[#allocation40_spill] sm:$0xff] %v6891_v51 }
  0xdc   : > { %1041 = vmatpush1.bf16.msra.mxu0 %v5132_v56  ;;  %1154 = vmatpush1.bf16.msra.mxu1 %v5134_v57  ;;  %v6899_v56 = vcombine.low %v1587_v46, %v1591_v47  ;;  %8906 = vst [vmem:[#allocation58_spill] sm:$0xff] %v6955_v44  ;;  %v1634_v47 = vld [vmem:[#allocation9 + $0x280] sm:$0xff] }
  0xdd   : > { %1042 = vmatprep.subr.bf16.mxu0 %v5141_v58  ;;  %1155 = vmatprep.subr.bf16.mxu1 %v5143_v60  ;;  %v6904_v58 = vcombine.high %v1595_v53, %v1599_v54  ;;  %v1602_v60 = vld [vmem:[#allocation9 + $0x180] sm:$0xff] }
  0xde   : > { %867 = vmatmul.mubr.bf16.gmra.mrb[12].mxu0 %v6802_v59  ;;  %980 = vmatmul.mubr.bf16.gmra.mrb[12].mxu1 %v6802_v59  ;;  %8890 = vst [vmem:[#allocation42_spill] sm:$0xff] %v6899_v56  ;;  %v6923_v8 = vcombine.low %v1602_v60, %v1606_v61 }
  0xdf   : > { %876 = vmatprep.mubr.bf16.mxu0 %v8523_v1  ;;  %989 = vmatprep.mubr.bf16.mxu1 %v8523_v1  ;;  %8892 = vst [vmem:[#allocation44_spill] sm:$0xff] %v6904_v58 }
  0xe0   : > { %1043 = vmatpush1.bf16.msra.mxu0 %v5140_v2  ;;  %1156 = vmatpush1.bf16.msra.mxu1 %v5142_v3  ;;  %v6913_v2 = vcombine.low %v1595_v53, %v1599_v54  ;;  %v6915_v3 = vcombine.high %v1602_v60, %v1606_v61  ;;  %8897 = vst [vmem:[#allocation49_spill] sm:$0xff] %v6923_v8  ;;  %v1639_v53 = vld [vmem:[#allocation9 + $0x2a8] sm:$0xff] }
  0xe1   : > { %1044 = vmatprep.subr.bf16.mxu0 %v5149_v4  ;;  %1157 = vmatprep.subr.bf16.mxu1 %v5151_v6  ;;  %v6919_v4 = vcombine.high %v1603_v62, %v1607_v63  ;;  %v1611_v6 = vld [vmem:[#allocation9 + $0x1c8] sm:$0xff]  ;;  %v1642_v63 = vld [vmem:[#allocation9 + $0x2c0] sm:$0xff] }
  0xe2   : > { %8894 = vst [vmem:[#allocation46_spill] sm:$0xff] %v6913_v2  ;;  %8895 = vst [vmem:[#allocation47_spill] sm:$0xff] %v6915_v3  ;;  %v6941_v29 = vcombine.low %v1611_v6, %v1615_v7 }
  0xe3   : > { %8896 = vst [vmem:[#allocation48_spill] sm:$0xff] %v6919_v4 }
  0xe4   : > { %1045 = vmatpush1.bf16.msra.mxu0 %v5148_v11  ;;  %1158 = vmatpush1.bf16.msra.mxu1 %v5150_v13  ;;  %v6932_v13 = vcombine.high %v1611_v6, %v1615_v7  ;;  %8902 = vst [vmem:[#allocation54_spill] sm:$0xff] %v6941_v29 }
  0xe5   : > { %2338 = vmatprep.subr.bf16.mxu0 %v6811_v14  ;;  %2381 = vmatprep.subr.bf16.mxu1 %v6813_v15 }
  0xe6   : > { %877 = vmatmul.mubr.bf16.gmra.mrb[16].mxu0 %v6809_v12  ;;  %990 = vmatmul.mubr.bf16.gmra.mrb[16].mxu1 %v6809_v12  ;;  %8900 = vst [vmem:[#allocation52_spill] sm:$0xff] %v6932_v13 }
  0xe7   : > { %886 = vmatprep.mubr.bf16.mxu0 %v8523_v1  ;;  %999 = vmatprep.mubr.bf16.mxu1 %v8523_v1 }
  0xee   : > { %887 = vmatmul.mubr.bf16.gmra.mrb[20].mxu0 %v6822_v16  ;;  %1000 = vmatmul.mubr.bf16.gmra.mrb[20].mxu1 %v6822_v16 }
  0xef   : > { %896 = vmatprep.mubr.bf16.mxu0 %v8523_v1  ;;  %1009 = vmatprep.mubr.bf16.mxu1 %v8523_v1 }
  0xf6   : > { %897 = vmatmul.mubr.bf16.gmra.mrb[24].mxu0 %v6829_v17  ;;  %1010 = vmatmul.mubr.bf16.gmra.mrb[24].mxu1 %v6829_v17 }
  0xf7   : > { %906 = vmatprep.mubr.bf16.mxu0 %v8523_v1  ;;  %1019 = vmatprep.mubr.bf16.mxu1 %v8523_v1 }
  0xfe   : > { %907 = vmatmul.mubr.bf16.gmra.mrb[28].mxu0 %v6836_v18  ;;  %1020 = vmatmul.mubr.bf16.gmra.mrb[28].mxu1 %v6836_v18 }
  0xff   : > { %1062 = vmatprep.mubr.bf16.mxu0 %v8523_v1  ;;  %1175 = vmatprep.mubr.bf16.mxu1 %v8523_v1 }
 0x106   : > { %1063 = vmatmul.mubr.bf16.vlgmr.msra.gmra.mrb[32].mxu0 %v6781_v9  ;;  %1176 = vmatmul.mubr.bf16.vlgmr.msra.gmra.mrb[32].mxu1 %v6781_v9  ;;  %v1582_v9 = vld [vmem:[#allocation9 + $0xe0] sm:$0xff] }
 0x107   : > { %2339 = vmatpush1.bf16.msra.mxu0 %v6842_v23  ;;  %2382 = vmatpush1.bf16.msra.mxu1 %v6844_v24  ;;  %v6873_v41 = vcombine.high %v1578_v36, %v1582_v9  ;;  %v6881_v48 = vcombine.low %v1578_v36, %v1582_v9  ;;  %v1626_v36 = vld [vmem:[#allocation9 + $0x240] sm:$0xff]  ;;  %v1627_v9 = vld [vmem:[#allocation9 + $0x248] sm:$0xff] }
 0x108   : > { %2340 = vmatprep.subr.bf16.mxu0 %v6846_v25  ;;  %2383 = vmatprep.subr.bf16.mxu1 %v6848_v27  ;;  %v6960_v46 = vcombine.high %v1627_v9, %v1631_v37  ;;  %v6969_v60 = vcombine.low %v1627_v9, %v1631_v37 }
 0x109   : > { %1072 = vmatprep.mubr.bf16.mxu0 %v8523_v1  ;;  %1185 = vmatprep.mubr.bf16.mxu1 %v8523_v1  ;;  %8883 = vst [vmem:[#allocation35_spill] sm:$0xff] %v6873_v41  ;;  %8885 = vst [vmem:[#allocation37_spill] sm:$0xff] %v6881_v48 }
 0x10a   : > { %8908 = vst [vmem:[#allocation60_spill] sm:$0xff] %v6960_v46  ;;  %8910 = vst [vmem:[#allocation62_spill] sm:$0xff] %v6969_v60 }
 0x10b   : > { %2341 = vmatpush1.bf16.msra.mxu0 %v6853_v32  ;;  %2384 = vmatpush1.bf16.msra.mxu1 %v6857_v33 }
 0x10c   : > { %2342 = vmatprep.subr.bf16.mxu0 %v6859_v34  ;;  %2385 = vmatprep.subr.bf16.mxu1 %v6863_v35 }
 0x10e   : > { %1073 = vmatmul.mubr.bf16.gmra.mrb[36].mxu0 %v6788_v26  ;;  %1186 = vmatmul.mubr.bf16.gmra.mrb[36].mxu1 %v6788_v26  ;;  %v1598_v26 = vld [vmem:[#allocation9 + $0x160] sm:$0xff] }
 0x10f   : > { %2343 = vmatpush1.bf16.msra.mxu0 %v6867_v39  ;;  %2386 = vmatpush1.bf16.msra.mxu1 %v6871_v40  ;;  %v6901_v57 = vcombine.high %v1594_v52, %v1598_v26  ;;  %v6909_v0 = vcombine.low %v1594_v52, %v1598_v26  ;;  %v1638_v52 = vld [vmem:[#allocation9 + $0x2a0] sm:$0xff]  ;;  %v1635_v26 = vld [vmem:[#allocation9 + $0x288] sm:$0xff] }
 0x110   : > { %2344 = vmatprep.subr.bf16.mxu0 %v6873_v41  ;;  %2387 = vmatprep.subr.bf16.mxu1 %v6876_v43  ;;  %v6971_v61 = vcombine.high %v1634_v47, %v1638_v52  ;;  %v6975_v62 = vcombine.high %v1635_v26, %v1639_v53  ;;  %v6979_v6 = vcombine.low %v1634_v47, %v1638_v52 }
 0x111   : > { %1082 = vmatprep.mubr.bf16.mxu0 %v8523_v1  ;;  %1195 = vmatprep.mubr.bf16.mxu1 %v8523_v1  ;;  %8891 = vst [vmem:[#allocation43_spill] sm:$0xff] %v6901_v57  ;;  %8893 = vst [vmem:[#allocation45_spill] sm:$0xff] %v6909_v0  ;;  %v6983_v7 = vcombine.low %v1635_v26, %v1639_v53  ;;  %v6999_v47 = vcombine.high %v1650_v21, %v1654_v22  ;;  %v1658_v26 = vld [vmem:[#allocation9 + $0x340] sm:$0xff]  ;;  %v1659_v53 = vld [vmem:[#allocation9 + $0x348] sm:$0xff] }
 0x112   : > { %8911 = vst [vmem:[#allocation63_spill] sm:$0xff] %v6971_v61  ;;  %8912 = vst [vmem:[#allocation64_spill] sm:$0xff] %v6975_v62 }
 0x113   : > { %2345 = vmatpush1.bf16.msra.mxu0 %v6881_v48  ;;  %2388 = vmatpush1.bf16.msra.mxu1 %v6885_v49  ;;  %8913 = vst [vmem:[#allocation65_spill] sm:$0xff] %v6979_v6  ;;  %8914 = vst [vmem:[#allocation66_spill] sm:$0xff] %v6983_v7 }
 0x114   : > { %2346 = vmatprep.subr.bf16.mxu0 %v6887_v50  ;;  %2389 = vmatprep.subr.bf16.mxu1 %v6891_v51  ;;  %8919 = vst [vmem:[#allocation71_spill] sm:$0xff] %v6999_v47 }
 0x116   : > { %1083 = vmatmul.mubr.bf16.gmra.mrb[40].mxu0 %v6795_v42  ;;  %1196 = vmatmul.mubr.bf16.gmra.mrb[40].mxu1 %v6795_v42  ;;  %v1614_v42 = vld [vmem:[#allocation9 + $0x1e0] sm:$0xff] }
 0x117   : > { %2347 = vmatpush1.bf16.msra.mxu0 %v6895_v55  ;;  %2390 = vmatpush1.bf16.msra.mxu1 %v6899_v56  ;;  %v6929_v11 = vcombine.high %v1610_v5, %v1614_v42  ;;  %v6937_v28 = vcombine.low %v1610_v5, %v1614_v42  ;;  %v1643_v5 = vld [vmem:[#allocation9 + $0x2c8] sm:$0xff] }
 0x118   : > { %2348 = vmatprep.subr.bf16.mxu0 %v6901_v57  ;;  %2391 = vmatprep.subr.bf16.mxu1 %v6904_v58  ;;  %v1647_v42 = vld [vmem:[#allocation9 + $0x2e8] sm:$0xff] }
 0x119   : > { %1092 = vmatprep.mubr.bf16.mxu0 %v8523_v1  ;;  %1205 = vmatprep.mubr.bf16.mxu1 %v8523_v1  ;;  %8899 = vst [vmem:[#allocation51_spill] sm:$0xff] %v6929_v11  ;;  %8901 = vst [vmem:[#allocation53_spill] sm:$0xff] %v6937_v28  ;;  %v6988_v20 = vcombine.high %v1643_v5, %v1647_v42  ;;  %v6997_v37 = vcombine.low %v1643_v5, %v1647_v42 }
 0x11b   : > { %2349 = vmatpush1.bf16.msra.mxu0 %v6909_v0  ;;  %2392 = vmatpush1.bf16.msra.mxu1 %v6913_v2  ;;  %8916 = vst [vmem:[#allocation68_spill] sm:$0xff] %v6988_v20  ;;  %8918 = vst [vmem:[#allocation70_spill] sm:$0xff] %v6997_v37 }
 0x11c   : > { %2350 = vmatprep.subr.bf16.mxu0 %v6915_v3  ;;  %2393 = vmatprep.subr.bf16.mxu1 %v6919_v4 }
 0x11e   : > { %1093 = vmatmul.mubr.bf16.gmra.mrb[44].mxu0 %v6802_v59  ;;  %1206 = vmatmul.mubr.bf16.gmra.mrb[44].mxu1 %v6802_v59  ;;  %v1630_v59 = vld [vmem:[#allocation9 + $0x260] sm:$0xff] }
 0x11f   : > { %2351 = vmatpush1.bf16.msra.mxu0 %v6923_v8  ;;  %2394 = vmatpush1.bf16.msra.mxu1 %v6927_v10  ;;  %v6957_v45 = vcombine.high %v1626_v36, %v1630_v59  ;;  %v6965_v54 = vcombine.low %v1626_v36, %v1630_v59  ;;  %v1651_v36 = vld [vmem:[#allocation9 + $0x308] sm:$0xff] }
 0x120   : > { %2352 = vmatprep.subr.bf16.mxu0 %v6929_v11  ;;  %2395 = vmatprep.subr.bf16.mxu1 %v6932_v13  ;;  %v1655_v59 = vld [vmem:[#allocation9 + $0x328] sm:$0xff] }
 0x121   : > { %1102 = vmatprep.mubr.bf16.mxu0 %v8523_v1  ;;  %1215 = vmatprep.mubr.bf16.mxu1 %v8523_v1  ;;  %8907 = vst [vmem:[#allocation59_spill] sm:$0xff] %v6957_v45  ;;  %8909 = vst [vmem:[#allocation61_spill] sm:$0xff] %v6965_v54  ;;  %v7003_v52 = vcombine.high %v1651_v36, %v1655_v59  ;;  %v7011_v5 = vcombine.low %v1651_v36, %v1655_v59  ;;  %v8928_v59 = vmov 0  }
 0x123   : > { %2353 = vmatpush1.bf16.msra.mxu0 %v6937_v28  ;;  %2396 = vmatpush1.bf16.msra.mxu1 %v6941_v29  ;;  %8920 = vst [vmem:[#allocation72_spill] sm:$0xff] %v7003_v52  ;;  %8922 = vst [vmem:[#allocation74_spill] sm:$0xff] %v7011_v5 }
 0x124   : > { %2354 = vmatprep.subr.bf16.mxu0 %v6943_v30  ;;  %2397 = vmatprep.subr.bf16.mxu1 %v6947_v31 }
 0x126   : > { %1103 = vmatmul.mubr.bf16.gmra.mrb[48].mxu0 %v6809_v12  ;;  %1216 = vmatmul.mubr.bf16.gmra.mrb[48].mxu1 %v6809_v12  ;;  %v1646_v12 = vld [vmem:[#allocation9 + $0x2e0] sm:$0xff] }
 0x127   : > { %2355 = vmatpush1.bf16.msra.mxu0 %v6951_v38  ;;  %2398 = vmatpush1.bf16.msra.mxu1 %v6955_v44  ;;  %v6985_v19 = vcombine.high %v1642_v63, %v1646_v12  ;;  %v6993_v9 = vcombine.low %v1642_v63, %v1646_v12  ;;  %v1663_v63 = vld [vmem:[#allocation9 + $0x368] sm:$0xff]  ;;  %v7007_v12 = vcombine.low %v1650_v21, %v1654_v22 }
 0x128   : > { %2356 = vmatprep.subr.bf16.mxu0 %v6957_v45  ;;  %2399 = vmatprep.subr.bf16.mxu1 %v6960_v46  ;;  %v7025_v22 = vcombine.low %v1659_v53, %v1663_v63 }
 0x129   : > { %1112 = vmatprep.mubr.bf16.mxu0 %v8523_v1  ;;  %1225 = vmatprep.mubr.bf16.mxu1 %v8523_v1  ;;  %8915 = vst [vmem:[#allocation67_spill] sm:$0xff] %v6985_v19  ;;  %8917 = vst [vmem:[#allocation69_spill] sm:$0xff] %v6993_v9 }
 0x12a   : > { %8921 = vst [vmem:[#allocation73_spill] sm:$0xff] %v7007_v12  ;;  %8926 = vst [vmem:[#allocation78_spill] sm:$0xff] %v7025_v22 }
 0x12b   : > { %2357 = vmatpush1.bf16.msra.mxu0 %v6965_v54  ;;  %2400 = vmatpush1.bf16.msra.mxu1 %v6969_v60 }
 0x12c   : > { %2358 = vmatprep.subr.bf16.mxu0 %v6971_v61  ;;  %2401 = vmatprep.subr.bf16.mxu1 %v6975_v62 }
 0x12e   : > { %1113 = vmatmul.mubr.bf16.gmra.mrb[52].mxu0 %v6822_v16  ;;  %1226 = vmatmul.mubr.bf16.gmra.mrb[52].mxu1 %v6822_v16  ;;  %v1662_v16 = vld [vmem:[#allocation9 + $0x360] sm:$0xff] }
 0x12f   : > { %2359 = vmatpush1.bf16.msra.mxu0 %v6979_v6  ;;  %2402 = vmatpush1.bf16.msra.mxu1 %v6983_v7  ;;  %v7013_v42 = vcombine.high %v1658_v26, %v1662_v16  ;;  %v1667_v7 = vld [vmem:[#allocation9 + $0x388] sm:$0xff]  ;;  %v7021_v21 = vcombine.low %v1658_v26, %v1662_v16 }
 0x130   : > { %2360 = vmatprep.subr.bf16.mxu0 %v6985_v19  ;;  %2403 = vmatprep.subr.bf16.mxu1 %v6988_v20  ;;  %v7016_v20 = vcombine.high %v1659_v53, %v1663_v63  ;;  %v1666_v19 = vld [vmem:[#allocation9 + $0x380] sm:$0xff]  ;;  %v1675_v26 = vld [vmem:[#allocation9 + $0x3c8] sm:$0xff] }
 0x131   : > { %1122 = vmatprep.mubr.bf16.mxu0 %v8523_v1  ;;  %1235 = vmatprep.mubr.bf16.mxu1 %v8523_v1  ;;  %8923 = vst [vmem:[#allocation75_spill] sm:$0xff] %v7013_v42  ;;  %v1670_v1 = vld [vmem:[#allocation9 + $0x3a0] sm:$0xff]  ;;  %8925 = vst [vmem:[#allocation77_spill] sm:$0xff] %v7021_v21  ;;  %v1679_v16 = vld [vmem:[#allocation9 + $0x3e8] sm:$0xff] }
 0x132   : > { %8924 = vst [vmem:[#allocation76_spill] sm:$0xff] %v7016_v20  ;;  %v7027_v36 = vcombine.high %v1666_v19, %v1670_v1 }
 0x133   : > { %2361 = vmatpush1.bf16.msra.mxu0 %v6993_v9  ;;  %2404 = vmatpush1.bf16.msra.mxu1 %v6997_v37  ;;  %v1671_v9 = vld [vmem:[#allocation9 + $0x3a8] sm:$0xff]  ;;  %v1557_v37 = vld [vmem:[#allocation9 + $0x18] sm:$0xff] }
 0x134   : > { %2362 = vmatprep.subr.bf16.mxu0 %v6999_v47  ;;  %2405 = vmatprep.subr.bf16.mxu1 %v7003_v52  ;;  %8927 = vst [vmem:[#allocation79_spill] sm:$0xff] %v7027_v36  ;;  %v7031_v52 = vcombine.high %v1667_v7, %v1671_v9  ;;  %v1674_v47 = vld [vmem:[#allocation9 + $0x3c0] sm:$0xff]  ;;  %v7039_v53 = vcombine.low %v1667_v7, %v1671_v9 }
 0x135   : > { %v7053_v7 = vcombine.low %v1675_v26, %v1679_v16 }
 0x136   : > { %1123 = vmatmul.mubr.bf16.gmra.mrb[56].mxu0 %v6829_v17  ;;  %1236 = vmatmul.mubr.bf16.gmra.mrb[56].mxu1 %v6829_v17  ;;  %8929 = vst [vmem:[#allocation80_spill] sm:$0xff] %v7031_v52  ;;  %v1678_v17 = vld [vmem:[#allocation9 + $0x3e0] sm:$0xff]  ;;  %8931 = vst [vmem:[#allocation82_spill] sm:$0xff] %v7039_v53 }
 0x137   : > { %2363 = vmatpush1.bf16.msra.mxu0 %v7007_v12  ;;  %2406 = vmatpush1.bf16.msra.mxu1 %v7011_v5  ;;  %v7035_v5 = vcombine.low %v1666_v19, %v1670_v1  ;;  %v7041_v63 = vcombine.high %v1674_v47, %v1678_v17  ;;  %v1560_v12 = vld [vmem:[#allocation9 + $0x30] sm:$0xff]  ;;  %v7049_v1 = vcombine.low %v1674_v47, %v1678_v17  ;;  %v1565_v47 = vld [vmem:[#allocation9 + $0x58] sm:$0xff] }
 0x138   : > { %2364 = vmatprep.subr.bf16.mxu0 %v7013_v42  ;;  %2407 = vmatprep.subr.bf16.mxu1 %v7016_v20  ;;  %v7044_v20 = vcombine.high %v1675_v26, %v1679_v16  ;;  %v1556_v42 = vld [vmem:[#allocation9 + $0x10] sm:$0xff]  ;;  %8935 = vst [vmem:[#allocation86_spill] sm:$0xff] %v7053_v7  ;;  %v1569_v17 = vld [vmem:[#allocation9 + $0x78] sm:$0xff] }
 0x139   : > { %1132 = vmatprep.mubr.bf16.mxu0 %v8928_v59  ;;  %1245 = vmatprep.mubr.bf16.mxu1 %v8928_v59  ;;  %8930 = vst [vmem:[#allocation81_spill] sm:$0xff] %v7035_v5  ;;  %8932 = vst [vmem:[#allocation83_spill] sm:$0xff] %v7041_v63  ;;  %v7055_v19 = vcombine.high %v1556_v42, %v1560_v12 }
 0x13a   : > { %8933 = vst [vmem:[#allocation84_spill] sm:$0xff] %v7044_v20  ;;  %8934 = vst [vmem:[#allocation85_spill] sm:$0xff] %v7049_v1 }
 0x13b   : > { %2365 = vmatpush1.bf16.msra.mxu0 %v7021_v21  ;;  %2408 = vmatpush1.bf16.msra.mxu1 %v7025_v22  ;;  %v1561_v21 = vld [vmem:[#allocation9 + $0x38] sm:$0xff]  ;;  %8936 = vst [vmem:[#allocation87_spill] sm:$0xff] %v7055_v19 }
 0x13c   : > { %2366 = vmatprep.subr.bf16.mxu0 %v7027_v36  ;;  %2409 = vmatprep.subr.bf16.mxu1 %v7031_v52  ;;  %v7059_v9 = vcombine.high %v1557_v37, %v1561_v21  ;;  %v1564_v52 = vld [vmem:[#allocation9 + $0x50] sm:$0xff]  ;;  %v7067_v26 = vcombine.low %v1557_v37, %v1561_v21  ;;  %v1573_v36 = vld [vmem:[#allocation9 + $0x98] sm:$0xff]  ;;  %v7081_v37 = vcombine.low %v1565_v47, %v1569_v17 }
 0x13d   : > { %v1593_v22 = vld [vmem:[#allocation9 + $0x138] sm:$0xff] }
 0x13e   : > { %1133 = vmatmul.mubr.bf16.gmra.mrb[60].mxu0 %v6836_v18  ;;  %1246 = vmatmul.mubr.bf16.gmra.mrb[60].mxu1 %v6836_v18  ;;  %8937 = vst [vmem:[#allocation88_spill] sm:$0xff] %v7059_v9  ;;  %v1568_v18 = vld [vmem:[#allocation9 + $0x70] sm:$0xff]  ;;  %8939 = vst [vmem:[#allocation90_spill] sm:$0xff] %v7067_v26 }
 0x13f   : > { %2367 = vmatpush1.bf16.msra.mxu0 %v7035_v5  ;;  %2410 = vmatpush1.bf16.msra.mxu1 %v7039_v53  ;;  %v7063_v53 = vcombine.low %v1556_v42, %v1560_v12  ;;  %v7069_v16 = vcombine.high %v1564_v52, %v1568_v18  ;;  %v1576_v5 = vld [vmem:[#allocation9 + $0xb0] sm:$0xff]  ;;  %v7077_v12 = vcombine.low %v1564_v52, %v1568_v18 }
 0x140   : > { %2368 = vmatprep.subr.bf16.mxu0 %v7041_v63  ;;  %2411 = vmatprep.subr.bf16.mxu1 %v7044_v20  ;;  %v7072_v20 = vcombine.high %v1565_v47, %v1569_v17  ;;  %v1572_v63 = vld [vmem:[#allocation9 + $0x90] sm:$0xff]  ;;  %8943 = vst [vmem:[#allocation94_spill] sm:$0xff] %v7081_v37 }
 0x141   : > { %2370 = vmatprep.mubr.bf16.mxu0 %v8928_v59  ;;  %2413 = vmatprep.mubr.bf16.mxu1 %v8928_v59  ;;  %8938 = vst [vmem:[#allocation89_spill] sm:$0xff] %v7063_v53  ;;  %8940 = vst [vmem:[#allocation91_spill] sm:$0xff] %v7069_v16  ;;  %v7083_v42 = vcombine.high %v1572_v63, %v1576_v5  ;;  %v7091_v52 = vcombine.low %v1572_v63, %v1576_v5 }
 0x142   : > { %8941 = vst [vmem:[#allocation92_spill] sm:$0xff] %v7072_v20  ;;  %8942 = vst [vmem:[#allocation93_spill] sm:$0xff] %v7077_v12 }
 0x143   : > { %2369 = vmatpush1.bf16.msra.mxu0 %v7049_v1  ;;  %2412 = vmatpush1.bf16.msra.mxu1 %v7053_v7  ;;  %v1577_v1 = vld [vmem:[#allocation9 + $0xb8] sm:$0xff]  ;;  %8944 = vst [vmem:[#allocation95_spill] sm:$0xff] %v7083_v42  ;;  %8946 = vst [vmem:[#allocation97_spill] sm:$0xff] %v7091_v52 }
 0x144   : > { %2424 = vmatprep.subr.bf16.mxu0 %v7055_v19  ;;  %2467 = vmatprep.subr.bf16.mxu1 %v7059_v9  ;;  %v7086_v21 = vcombine.high %v1573_v36, %v1577_v1  ;;  %v1580_v9 = vld [vmem:[#allocation9 + $0xd0] sm:$0xff]  ;;  %v1581_v7 = vld [vmem:[#allocation9 + $0xd8] sm:$0xff]  ;;  %v7095_v18 = vcombine.low %v1573_v36, %v1577_v1 }
 0x145   : > { %v1584_v19 = vld [vmem:[#allocation9 + $0xf0] sm:$0xff] }
 0x146   : > { %2371 = vmatmul.mubr.bf16.vlgmr.msra.gmra.mrb[0].mxu0 %v8928_v59  ;;  %2414 = vmatmul.mubr.bf16.vlgmr.msra.gmra.mrb[0].mxu1 %v8928_v59  ;;  %8945 = vst [vmem:[#allocation96_spill] sm:$0xff] %v7086_v21  ;;  %8947 = vst [vmem:[#allocation98_spill] sm:$0xff] %v7095_v18  ;;  %v7097_v47 = vcombine.high %v1580_v9, %v1584_v19  ;;  %v7103_v5 = vcombine.low %v1580_v9, %v1584_v19 }
 0x147   : > { %2425 = vmatpush1.bf16.msra.mxu0 %v7063_v53  ;;  %2468 = vmatpush1.bf16.msra.mxu1 %v7067_v26  ;;  %v1585_v53 = vld [vmem:[#allocation9 + $0xf8] sm:$0xff] }
 0x148   : > { %2426 = vmatprep.subr.bf16.mxu0 %v7069_v16  ;;  %2469 = vmatprep.subr.bf16.mxu1 %v7072_v20  ;;  %8948 = vst [vmem:[#allocation99_spill] sm:$0xff] %v7097_v47  ;;  %v7100_v17 = vcombine.high %v1581_v7, %v1585_v53  ;;  %v1588_v20 = vld [vmem:[#allocation9 + $0x110] sm:$0xff]  ;;  %v1589_v26 = vld [vmem:[#allocation9 + $0x118] sm:$0xff]  ;;  %8950 = vst [vmem:[#allocation101_spill] sm:$0xff] %v7103_v5  ;;  %v7107_v36 = vcombine.low %v1581_v7, %v1585_v53 }
 0x149   : > { %2456 = vmatprep.mubr.bf16.mxu0 %v8928_v59  ;;  %2499 = vmatprep.mubr.bf16.mxu1 %v8928_v59  ;;  %v1592_v16 = vld [vmem:[#allocation9 + $0x130] sm:$0xff]  ;;  %v7112_v1 = vcombine.high %v1589_v26, %v1593_v22  ;;  %v7119_v53 = vcombine.low %v1589_v26, %v1593_v22 }
 0x14a   : > { %8949 = vst [vmem:[#allocation100_spill] sm:$0xff] %v7100_v17  ;;  %8951 = vst [vmem:[#allocation102_spill] sm:$0xff] %v7107_v36  ;;  %v7109_v63 = vcombine.high %v1588_v20, %v1592_v16  ;;  %v7115_v19 = vcombine.low %v1588_v20, %v1592_v16 }
 0x14b   : > { %2427 = vmatpush1.bf16.msra.mxu0 %v7077_v12  ;;  %2470 = vmatpush1.bf16.msra.mxu1 %v7081_v37  ;;  %8953 = vst [vmem:[#allocation104_spill] sm:$0xff] %v7112_v1  ;;  %v1597_v37 = vld [vmem:[#allocation9 + $0x158] sm:$0xff]  ;;  %8955 = vst [vmem:[#allocation106_spill] sm:$0xff] %v7119_v53 }
 0x14c   : > { %2428 = vmatprep.subr.bf16.mxu0 %v7083_v42  ;;  %2471 = vmatprep.subr.bf16.mxu1 %v7086_v21  ;;  %8952 = vst [vmem:[#allocation103_spill] sm:$0xff] %v7109_v63  ;;  %v1596_v21 = vld [vmem:[#allocation9 + $0x150] sm:$0xff]  ;;  %v1601_v12 = vld [vmem:[#allocation9 + $0x178] sm:$0xff]  ;;  %8954 = vst [vmem:[#allocation105_spill] sm:$0xff] %v7115_v19 }
 0x14d   : > { %v1600_v42 = vld [vmem:[#allocation9 + $0x170] sm:$0xff]  ;;  %v7124_v9 = vcombine.high %v1597_v37, %v1601_v12  ;;  %v7131_v22 = vcombine.low %v1597_v37, %v1601_v12 }
 0x14e   : > { %v7121_v7 = vcombine.high %v1596_v21, %v1600_v42  ;;  %v7127_v20 = vcombine.low %v1596_v21, %v1600_v42 }
 0x14f   : > { %2429 = vmatpush1.bf16.msra.mxu0 %v7091_v52  ;;  %2472 = vmatpush1.bf16.msra.mxu1 %v7095_v18  ;;  %8957 = vst [vmem:[#allocation108_spill] sm:$0xff] %v7124_v9  ;;  %v1605_v18 = vld [vmem:[#allocation9 + $0x198] sm:$0xff]  ;;  %8959 = vst [vmem:[#allocation110_spill] sm:$0xff] %v7131_v22 }
 0x150   : > { %2430 = vmatprep.subr.bf16.mxu0 %v7097_v47  ;;  %2473 = vmatprep.subr.bf16.mxu1 %v7100_v17  ;;  %8956 = vst [vmem:[#allocation107_spill] sm:$0xff] %v7121_v7  ;;  %v1604_v17 = vld [vmem:[#allocation9 + $0x190] sm:$0xff]  ;;  %v1609_v52 = vld [vmem:[#allocation9 + $0x1b8] sm:$0xff]  ;;  %8958 = vst [vmem:[#allocation109_spill] sm:$0xff] %v7127_v20 }
 0x151   : > { %v1608_v47 = vld [vmem:[#allocation9 + $0x1b0] sm:$0xff]  ;;  %v7136_v16 = vcombine.high %v1605_v18, %v1609_v52  ;;  %v7143_v12 = vcombine.low %v1605_v18, %v1609_v52 }
 0x152   : > { %v7133_v26 = vcombine.high %v1604_v17, %v1608_v47  ;;  %v7139_v42 = vcombine.low %v1604_v17, %v1608_v47 }
 0x153   : > { %2431 = vmatpush1.bf16.msra.mxu0 %v7103_v5  ;;  %2474 = vmatpush1.bf16.msra.mxu1 %v7107_v36  ;;  %8961 = vst [vmem:[#allocation112_spill] sm:$0xff] %v7136_v16  ;;  %v1613_v36 = vld [vmem:[#allocation9 + $0x1d8] sm:$0xff]  ;;  %8963 = vst [vmem:[#allocation114_spill] sm:$0xff] %v7143_v12 }
 0x154   : > { %2432 = vmatprep.subr.bf16.mxu0 %v7109_v63  ;;  %2475 = vmatprep.subr.bf16.mxu1 %v7112_v1  ;;  %8960 = vst [vmem:[#allocation111_spill] sm:$0xff] %v7133_v26  ;;  %v1612_v1 = vld [vmem:[#allocation9 + $0x1d0] sm:$0xff]  ;;  %v1617_v5 = vld [vmem:[#allocation9 + $0x1f8] sm:$0xff]  ;;  %8962 = vst [vmem:[#allocation113_spill] sm:$0xff] %v7139_v42 }
 0x155   : > { %v1616_v63 = vld [vmem:[#allocation9 + $0x1f0] sm:$0xff]  ;;  %v7148_v21 = vcombine.high %v1613_v36, %v1617_v5  ;;  %v7155_v52 = vcombine.low %v1613_v36, %v1617_v5 }
 0x156   : > { %v7145_v37 = vcombine.high %v1612_v1, %v1616_v63  ;;  %v7151_v47 = vcombine.low %v1612_v1, %v1616_v63 }
 0x157   : > { %2433 = vmatpush1.bf16.msra.mxu0 %v7115_v19  ;;  %2476 = vmatpush1.bf16.msra.mxu1 %v7119_v53  ;;  %8965 = vst [vmem:[#allocation116_spill] sm:$0xff] %v7148_v21  ;;  %v1621_v53 = vld [vmem:[#allocation9 + $0x218] sm:$0xff]  ;;  %8967 = vst [vmem:[#allocation118_spill] sm:$0xff] %v7155_v52 }
 0x158   : > { %2434 = vmatprep.subr.bf16.mxu0 %v7121_v7  ;;  %2477 = vmatprep.subr.bf16.mxu1 %v7124_v9  ;;  %8964 = vst [vmem:[#allocation115_spill] sm:$0xff] %v7145_v37  ;;  %v1620_v9 = vld [vmem:[#allocation9 + $0x210] sm:$0xff]  ;;  %v1625_v19 = vld [vmem:[#allocation9 + $0x238] sm:$0xff]  ;;  %8966 = vst [vmem:[#allocation117_spill] sm:$0xff] %v7151_v47 }
 0x159   : > { %v1624_v7 = vld [vmem:[#allocation9 + $0x230] sm:$0xff]  ;;  %v7160_v17 = vcombine.high %v1621_v53, %v1625_v19  ;;  %v7167_v5 = vcombine.low %v1621_v53, %v1625_v19 }
 0x15a   : > { %v7157_v18 = vcombine.high %v1620_v9, %v1624_v7  ;;  %v7163_v63 = vcombine.low %v1620_v9, %v1624_v7 }
 0x15b   : > { %2435 = vmatpush1.bf16.msra.mxu0 %v7127_v20  ;;  %2478 = vmatpush1.bf16.msra.mxu1 %v7131_v22  ;;  %8969 = vst [vmem:[#allocation120_spill] sm:$0xff] %v7160_v17  ;;  %v1629_v22 = vld [vmem:[#allocation9 + $0x258] sm:$0xff]  ;;  %8971 = vst [vmem:[#allocation122_spill] sm:$0xff] %v7167_v5 }
 0x15c   : > { %2436 = vmatprep.subr.bf16.mxu0 %v7133_v26  ;;  %2479 = vmatprep.subr.bf16.mxu1 %v7136_v16  ;;  %8968 = vst [vmem:[#allocation119_spill] sm:$0xff] %v7157_v18  ;;  %v1628_v16 = vld [vmem:[#allocation9 + $0x250] sm:$0xff]  ;;  %v1633_v20 = vld [vmem:[#allocation9 + $0x278] sm:$0xff]  ;;  %8970 = vst [vmem:[#allocation121_spill] sm:$0xff] %v7163_v63 }
 0x15d   : > { %v1632_v26 = vld [vmem:[#allocation9 + $0x270] sm:$0xff]  ;;  %v7172_v1 = vcombine.high %v1629_v22, %v1633_v20  ;;  %v7179_v19 = vcombine.low %v1629_v22, %v1633_v20 }
 0x15e   : > { %v7169_v36 = vcombine.high %v1628_v16, %v1632_v26  ;;  %v7175_v7 = vcombine.low %v1628_v16, %v1632_v26 }
 0x15f   : > { %2437 = vmatpush1.bf16.msra.mxu0 %v7139_v42  ;;  %2480 = vmatpush1.bf16.msra.mxu1 %v7143_v12  ;;  %8973 = vst [vmem:[#allocation124_spill] sm:$0xff] %v7172_v1  ;;  %v1637_v12 = vld [vmem:[#allocation9 + $0x298] sm:$0xff]  ;;  %8975 = vst [vmem:[#allocation126_spill] sm:$0xff] %v7179_v19 }
 0x160   : > { %2438 = vmatprep.subr.bf16.mxu0 %v7145_v37  ;;  %2481 = vmatprep.subr.bf16.mxu1 %v7148_v21  ;;  %8972 = vst [vmem:[#allocation123_spill] sm:$0xff] %v7169_v36  ;;  %v1636_v21 = vld [vmem:[#allocation9 + $0x290] sm:$0xff]  ;;  %v1641_v42 = vld [vmem:[#allocation9 + $0x2b8] sm:$0xff]  ;;  %8974 = vst [vmem:[#allocation125_spill] sm:$0xff] %v7175_v7 }
 0x161   : > { %v1640_v37 = vld [vmem:[#allocation9 + $0x2b0] sm:$0xff]  ;;  %v7184_v9 = vcombine.high %v1637_v12, %v1641_v42  ;;  %v7191_v20 = vcombine.low %v1637_v12, %v1641_v42 }
 0x162   : > { %v7181_v53 = vcombine.high %v1636_v21, %v1640_v37  ;;  %v7187_v26 = vcombine.low %v1636_v21, %v1640_v37 }
 0x163   : > { %2439 = vmatpush1.bf16.msra.mxu0 %v7151_v47  ;;  %2482 = vmatpush1.bf16.msra.mxu1 %v7155_v52  ;;  %8977 = vst [vmem:[#allocation128_spill] sm:$0xff] %v7184_v9  ;;  %v1645_v52 = vld [vmem:[#allocation9 + $0x2d8] sm:$0xff]  ;;  %8979 = vst [vmem:[#allocation130_spill] sm:$0xff] %v7191_v20 }
 0x164   : > { %2440 = vmatprep.subr.bf16.mxu0 %v7157_v18  ;;  %2483 = vmatprep.subr.bf16.mxu1 %v7160_v17  ;;  %8976 = vst [vmem:[#allocation127_spill] sm:$0xff] %v7181_v53  ;;  %v1644_v17 = vld [vmem:[#allocation9 + $0x2d0] sm:$0xff]  ;;  %v1649_v47 = vld [vmem:[#allocation9 + $0x2f8] sm:$0xff]  ;;  %8978 = vst [vmem:[#allocation129_spill] sm:$0xff] %v7187_v26 }
 0x165   : > { %v1648_v18 = vld [vmem:[#allocation9 + $0x2f0] sm:$0xff]  ;;  %v7196_v16 = vcombine.high %v1645_v52, %v1649_v47  ;;  %v7203_v42 = vcombine.low %v1645_v52, %v1649_v47 }
 0x166   : > { %v7193_v22 = vcombine.high %v1644_v17, %v1648_v18  ;;  %v7199_v37 = vcombine.low %v1644_v17, %v1648_v18 }
 0x167   : > { %2441 = vmatpush1.bf16.msra.mxu0 %v7163_v63  ;;  %2484 = vmatpush1.bf16.msra.mxu1 %v7167_v5  ;;  %8981 = vst [vmem:[#allocation132_spill] sm:$0xff] %v7196_v16  ;;  %v1653_v5 = vld [vmem:[#allocation9 + $0x318] sm:$0xff]  ;;  %8983 = vst [vmem:[#allocation134_spill] sm:$0xff] %v7203_v42 }
 0x168   : > { %2442 = vmatprep.subr.bf16.mxu0 %v7169_v36  ;;  %2485 = vmatprep.subr.bf16.mxu1 %v7172_v1  ;;  %8980 = vst [vmem:[#allocation131_spill] sm:$0xff] %v7193_v22  ;;  %v1652_v1 = vld [vmem:[#allocation9 + $0x310] sm:$0xff]  ;;  %v1657_v63 = vld [vmem:[#allocation9 + $0x338] sm:$0xff]  ;;  %8982 = vst [vmem:[#allocation133_spill] sm:$0xff] %v7199_v37 }
 0x169   : > { %v1656_v36 = vld [vmem:[#allocation9 + $0x330] sm:$0xff]  ;;  %v7208_v21 = vcombine.high %v1653_v5, %v1657_v63  ;;  %v7215_v47 = vcombine.low %v1653_v5, %v1657_v63 }
 0x16a   : > { %v7205_v12 = vcombine.high %v1652_v1, %v1656_v36  ;;  %v7211_v18 = vcombine.low %v1652_v1, %v1656_v36 }
 0x16b   : > { %2443 = vmatpush1.bf16.msra.mxu0 %v7175_v7  ;;  %2486 = vmatpush1.bf16.msra.mxu1 %v7179_v19  ;;  %8985 = vst [vmem:[#allocation136_spill] sm:$0xff] %v7208_v21  ;;  %v1661_v19 = vld [vmem:[#allocation9 + $0x358] sm:$0xff]  ;;  %8987 = vst [vmem:[#allocation138_spill] sm:$0xff] %v7215_v47 }
 0x16c   : > { %2444 = vmatprep.subr.bf16.mxu0 %v7181_v53  ;;  %2487 = vmatprep.subr.bf16.mxu1 %v7184_v9  ;;  %8984 = vst [vmem:[#allocation135_spill] sm:$0xff] %v7205_v12  ;;  %v1660_v9 = vld [vmem:[#allocation9 + $0x350] sm:$0xff]  ;;  %v1665_v7 = vld [vmem:[#allocation9 + $0x378] sm:$0xff]  ;;  %8986 = vst [vmem:[#allocation137_spill] sm:$0xff] %v7211_v18 }
 0x16d   : > { %v1664_v53 = vld [vmem:[#allocation9 + $0x370] sm:$0xff]  ;;  %v7220_v17 = vcombine.high %v1661_v19, %v1665_v7  ;;  %v7227_v63 = vcombine.low %v1661_v19, %v1665_v7 }
 0x16e   : > { %v7217_v52 = vcombine.high %v1660_v9, %v1664_v53  ;;  %v7223_v36 = vcombine.low %v1660_v9, %v1664_v53 }
 0x16f   : > { %2445 = vmatpush1.bf16.msra.mxu0 %v7187_v26  ;;  %2488 = vmatpush1.bf16.msra.mxu1 %v7191_v20  ;;  %8989 = vst [vmem:[#allocation140_spill] sm:$0xff] %v7220_v17  ;;  %v1669_v20 = vld [vmem:[#allocation9 + $0x398] sm:$0xff]  ;;  %8991 = vst [vmem:[#allocation142_spill] sm:$0xff] %v7227_v63 }
 0x170   : > { %2446 = vmatprep.subr.bf16.mxu0 %v7193_v22  ;;  %2489 = vmatprep.subr.bf16.mxu1 %v7196_v16  ;;  %8988 = vst [vmem:[#allocation139_spill] sm:$0xff] %v7217_v52  ;;  %v1668_v16 = vld [vmem:[#allocation9 + $0x390] sm:$0xff]  ;;  %v1673_v26 = vld [vmem:[#allocation9 + $0x3b8] sm:$0xff]  ;;  %8990 = vst [vmem:[#allocation141_spill] sm:$0xff] %v7223_v36 }
 0x171   : > { %v1672_v22 = vld [vmem:[#allocation9 + $0x3b0] sm:$0xff]  ;;  %v7232_v1 = vcombine.high %v1669_v20, %v1673_v26  ;;  %v7239_v7 = vcombine.low %v1669_v20, %v1673_v26  ;;  %v9001_v26 = vld [vmem:[#allocation67_spill] sm:$0xff] }
 0x172   : > { %v7229_v5 = vcombine.high %v1668_v16, %v1672_v22  ;;  %v7235_v53 = vcombine.low %v1668_v16, %v1672_v22  ;;  %v9002_v20 = vld [vmem:[#allocation68_spill] sm:$0xff]  ;;  %v9003_v16 = vld [vmem:[#allocation69_spill] sm:$0xff] }
 0x173   : > { %2447 = vmatpush1.bf16.msra.mxu0 %v7199_v37  ;;  %2490 = vmatpush1.bf16.msra.mxu1 %v7203_v42  ;;  %8993 = vst [vmem:[#allocation144_spill] sm:$0xff] %v7232_v1  ;;  %v1677_v42 = vld [vmem:[#allocation9 + $0x3d8] sm:$0xff]  ;;  %8995 = vst [vmem:[#allocation146_spill] sm:$0xff] %v7239_v7 }
 0x174   : > { %2448 = vmatprep.subr.bf16.mxu0 %v7205_v12  ;;  %2491 = vmatprep.subr.bf16.mxu1 %v7208_v21  ;;  %8992 = vst [vmem:[#allocation143_spill] sm:$0xff] %v7229_v5  ;;  %v1676_v21 = vld [vmem:[#allocation9 + $0x3d0] sm:$0xff]  ;;  %v1681_v37 = vld [vmem:[#allocation9 + $0x3f8] sm:$0xff]  ;;  %8994 = vst [vmem:[#allocation145_spill] sm:$0xff] %v7235_v53 }
 0x175   : > { %v1680_v12 = vld [vmem:[#allocation9 + $0x3f0] sm:$0xff]  ;;  %v7244_v9 = vcombine.high %v1677_v42, %v1681_v37  ;;  %v7251_v22 = vcombine.low %v1677_v42, %v1681_v37  ;;  %v9004_v37 = vld [vmem:[#allocation70_spill] sm:$0xff]  ;;  %v9005_v42 = vld [vmem:[#allocation71_spill] sm:$0xff] }
 0x176   : > { %v7241_v19 = vcombine.high %v1676_v21, %v1680_v12 }
 0x177   : > { %2449 = vmatpush1.bf16.msra.mxu0 %v7211_v18  ;;  %2492 = vmatpush1.bf16.msra.mxu1 %v7215_v47  ;;  %8997 = vst [vmem:[#allocation148_spill] sm:$0xff] %v7244_v9  ;;  %8999 = vst [vmem:[#allocation150_spill] sm:$0xff] %v7251_v22 }
 0x178   : > { %2450 = vmatprep.subr.bf16.mxu0 %v7217_v52  ;;  %2493 = vmatprep.subr.bf16.mxu1 %v7220_v17  ;;  %8996 = vst [vmem:[#allocation147_spill] sm:$0xff] %v7241_v19  ;;  %v7247_v17 = vcombine.low %v1676_v21, %v1680_v12  ;;  %v9006_v12 = vld [vmem:[#allocation72_spill] sm:$0xff]  ;;  %v9007_v21 = vld [vmem:[#allocation73_spill] sm:$0xff] }
 0x17a   : > { %8998 = vst [vmem:[#allocation149_spill] sm:$0xff] %v7247_v17 }
 0x17b   : > { %2451 = vmatpush1.bf16.msra.mxu0 %v7223_v36  ;;  %2494 = vmatpush1.bf16.msra.mxu1 %v7227_v63 }
 0x17c   : > { %2452 = vmatprep.subr.bf16.mxu0 %v7229_v5  ;;  %2495 = vmatprep.subr.bf16.mxu1 %v7232_v1 }
 0x17f   : > { %2453 = vmatpush1.bf16.msra.mxu0 %v7235_v53  ;;  %2496 = vmatpush1.bf16.msra.mxu1 %v7239_v7 }
 0x180   : > { %2454 = vmatprep.subr.bf16.mxu0 %v7241_v19  ;;  %2497 = vmatprep.subr.bf16.mxu1 %v7244_v9 }
 0x183   : > { %2455 = vmatpush1.bf16.msra.mxu0 %v7247_v17  ;;  %2498 = vmatpush1.bf16.msra.mxu1 %v7251_v22 }
 0x184   : > { %2641 = vmatprep.subr.bf16.mxu0 %v6811_v14  ;;  %2684 = vmatprep.subr.bf16.mxu1 %v6813_v15 }
 0x186   : > { %2457 = vmatmul.mubr.bf16.vlgmr.msra.gmra.mrb[32].mxu0 %v8928_v59  ;;  %2500 = vmatmul.mubr.bf16.vlgmr.msra.gmra.mrb[32].mxu1 %v8928_v59  ;;  %v9000_v59 = vld [vmem:[#allocation66_spill] sm:$0xff] }
 0x187   : > { %2642 = vmatpush1.bf16.msra.mxu0 %v6842_v23  ;;  %2685 = vmatpush1.bf16.msra.mxu1 %v6844_v24 }
 0x188   : > { %2643 = vmatprep.subr.bf16.mxu0 %v6846_v25  ;;  %2686 = vmatprep.subr.bf16.mxu1 %v6848_v27 }
 0x18b   : > { %2644 = vmatpush1.bf16.msra.mxu0 %v6853_v32  ;;  %2687 = vmatpush1.bf16.msra.mxu1 %v6857_v33 }
 0x18c   : > { %2645 = vmatprep.subr.bf16.mxu0 %v6859_v34  ;;  %2688 = vmatprep.subr.bf16.mxu1 %v6863_v35 }
 0x18f   : > { %2646 = vmatpush1.bf16.msra.mxu0 %v6867_v39  ;;  %2689 = vmatpush1.bf16.msra.mxu1 %v6871_v40 }
 0x190   : > { %2647 = vmatprep.subr.bf16.mxu0 %v6873_v41  ;;  %2690 = vmatprep.subr.bf16.mxu1 %v6876_v43 }
 0x193   : > { %2648 = vmatpush1.bf16.msra.mxu0 %v6881_v48  ;;  %2691 = vmatpush1.bf16.msra.mxu1 %v6885_v49 }
 0x194   : > { %2649 = vmatprep.subr.bf16.mxu0 %v6887_v50  ;;  %2692 = vmatprep.subr.bf16.mxu1 %v6891_v51 }
 0x197   : > { %2650 = vmatpush1.bf16.msra.mxu0 %v6895_v55  ;;  %2693 = vmatpush1.bf16.msra.mxu1 %v6899_v56 }
 0x198   : > { %2651 = vmatprep.subr.bf16.mxu0 %v6901_v57  ;;  %2694 = vmatprep.subr.bf16.mxu1 %v6904_v58 }
 0x19b   : > { %2652 = vmatpush1.bf16.msra.mxu0 %v6909_v0  ;;  %2695 = vmatpush1.bf16.msra.mxu1 %v6913_v2 }
 0x19c   : > { %2653 = vmatprep.subr.bf16.mxu0 %v6915_v3  ;;  %2696 = vmatprep.subr.bf16.mxu1 %v6919_v4 }
 0x19f   : > { %2654 = vmatpush1.bf16.msra.mxu0 %v6923_v8  ;;  %2697 = vmatpush1.bf16.msra.mxu1 %v6927_v10 }
 0x1a0   : > { %2655 = vmatprep.subr.bf16.mxu0 %v6929_v11  ;;  %2698 = vmatprep.subr.bf16.mxu1 %v6932_v13 }
 0x1a3   : > { %2656 = vmatpush1.bf16.msra.mxu0 %v6937_v28  ;;  %2699 = vmatpush1.bf16.msra.mxu1 %v6941_v29 }
 0x1a4   : > { %2657 = vmatprep.subr.bf16.mxu0 %v6943_v30  ;;  %2700 = vmatprep.subr.bf16.mxu1 %v6947_v31 }
 0x1a7   : > { %2658 = vmatpush1.bf16.msra.mxu0 %v6951_v38  ;;  %2701 = vmatpush1.bf16.msra.mxu1 %v6955_v44 }
 0x1a8   : > { %2659 = vmatprep.subr.bf16.mxu0 %v6957_v45  ;;  %2702 = vmatprep.subr.bf16.mxu1 %v6960_v46  ;;  %v1258_v45 = vlaneseq }
 0x1ab   : > { %2660 = vmatpush1.bf16.msra.mxu0 %v6965_v54  ;;  %2703 = vmatpush1.bf16.msra.mxu1 %v6969_v60 }
 0x1ac   : > { %2661 = vmatprep.subr.bf16.mxu0 %v6971_v61  ;;  %2704 = vmatprep.subr.bf16.mxu1 %v6975_v62  ;;  %v9008_v61 = vld [vmem:[#allocation74_spill] sm:$0xff]  ;;  %v9009_v62 = vld [vmem:[#allocation75_spill] sm:$0xff] }
 0x1af   : > { %2662 = vmatpush1.bf16.msra.mxu0 %v6979_v6  ;;  %2705 = vmatpush1.bf16.msra.mxu1 %v9000_v59  ;;  %v9010_v6 = vld [vmem:[#allocation76_spill] sm:$0xff]  ;;  %v9011_v59 = vld [vmem:[#allocation77_spill] sm:$0xff] }
 0x1b0   : > { %2663 = vmatprep.subr.bf16.mxu0 %v9001_v26  ;;  %2706 = vmatprep.subr.bf16.mxu1 %v9002_v20  ;;  %v9012_v26 = vld [vmem:[#allocation78_spill] sm:$0xff]  ;;  %v9013_v20 = vld [vmem:[#allocation79_spill] sm:$0xff] }
 0x1b3   : > { %2664 = vmatpush1.bf16.msra.mxu0 %v9003_v16  ;;  %2707 = vmatpush1.bf16.msra.mxu1 %v9004_v37  ;;  %v9014_v16 = vld [vmem:[#allocation80_spill] sm:$0xff]  ;;  %v9015_v37 = vld [vmem:[#allocation81_spill] sm:$0xff] }
 0x1b4   : > { %2665 = vmatprep.subr.bf16.mxu0 %v9005_v42  ;;  %2708 = vmatprep.subr.bf16.mxu1 %v9006_v12  ;;  %v9016_v42 = vld [vmem:[#allocation82_spill] sm:$0xff]  ;;  %v9017_v12 = vld [vmem:[#allocation83_spill] sm:$0xff] }
 0x1b7   : > { %2666 = vmatpush1.bf16.msra.mxu0 %v9007_v21  ;;  %2709 = vmatpush1.bf16.msra.mxu1 %v9008_v61  ;;  %v9018_v21 = vld [vmem:[#allocation84_spill] sm:$0xff]  ;;  %v9019_v61 = vld [vmem:[#allocation85_spill] sm:$0xff] }
 0x1b8   : > { %2667 = vmatprep.subr.bf16.mxu0 %v9009_v62  ;;  %2710 = vmatprep.subr.bf16.mxu1 %v9010_v6  ;;  %v9020_v62 = vld [vmem:[#allocation86_spill] sm:$0xff]  ;;  %v9021_v6 = vld [vmem:[#allocation87_spill] sm:$0xff] }
 0x1bb   : > { %2668 = vmatpush1.bf16.msra.mxu0 %v9011_v59  ;;  %2711 = vmatpush1.bf16.msra.mxu1 %v9012_v26  ;;  %v9022_v59 = vld [vmem:[#allocation88_spill] sm:$0xff] }
 0x1bc   : > { %2669 = vmatprep.subr.bf16.mxu0 %v9013_v20  ;;  %2712 = vmatprep.subr.bf16.mxu1 %v9014_v16 }
 0x1bf   : > { %2670 = vmatpush1.bf16.msra.mxu0 %v9015_v37  ;;  %2713 = vmatpush1.bf16.msra.mxu1 %v9016_v42 }
 0x1c0   : > { %2671 = vmatprep.subr.bf16.mxu0 %v9017_v12  ;;  %2714 = vmatprep.subr.bf16.mxu1 %v9018_v21  ;;  %v1259_v12 = vshrl.u32 %v1258_v45, 7  ;;  %v1256_v21 = vld [vmem:[#allocation10] sm:$0xff] }
 0x1c2   : > { %v1260_v44 = vsub.s32 0, %v1259_v12  ;;  %v1268_v38 = vsub.s32 2, %v1259_v12  ;;  %v1272_v31 = vsub.s32 3, %v1259_v12 }
 0x1c3   : > { %2672 = vmatpush1.bf16.msra.mxu0 %v9019_v61  ;;  %2715 = vmatpush1.bf16.msra.mxu1 %v9020_v62  ;;  %v1264_v61 = vsub.s32 1, %v1259_v12 }
 0x1c4   : > { %2727 = vmatprep.subr.bf16.mxu0 %v9021_v6  ;;  %2770 = vmatprep.subr.bf16.mxu1 %v9022_v59  ;;  %v7324_v62 = vrot.slane %v1256_v21, %v1260_v44  ;;  %v7326_v6 = vrot.slane %v1256_v21, %v1268_v38  ;;  %v7330_v30 = vrot.slane %v1256_v21, %v1272_v31 }
 0x1c5   : > { %v7328_v59 = vrot.slane %v1256_v21, %v1264_v61 }
 0x1c6   : > { %9023 = vst [vmem:[#allocation151_spill] sm:$0xff] %v7324_v62  ;;  %9024 = vst [vmem:[#allocation152_spill] sm:$0xff] %v7326_v6 }
 0x1c7   : > { %9025 = vst [vmem:[#allocation153_spill] sm:$0xff] %v7328_v59  ;;  %9026 = vst [vmem:[#allocation154_spill] sm:$0xff] %v7330_v30 }
 0x219   : > { %v2372_v26 = vpop.f32.mrb[0].mxu0  ;;  %v2415_v20 = vpop.f32.mrb[0].mxu1 }
 0x21a   : > { %v2374_v60 = vpop.f32.mrb[1].mxu0  ;;  %v2417_v16 = vpop.f32.mrb[1].mxu1  ;;  %v5424_v29 = vadd.f32 %v2372_v26, %v7324_v62  ;;  %v5456_v28 = vadd.f32 %v2415_v20, %v7326_v6 }
 0x21b   : > { %v2376_v54 = vpop.f32.mrb[2].mxu0  ;;  %v2419_v37 = vpop.f32.mrb[2].mxu1  ;;  %v5425_v13 = vadd.f32 %v2374_v60, %v7328_v59  ;;  %v5457_v45 = vadd.f32 %v2417_v16, %v7330_v30 }
 0x21c   : > { %v2378_v46 = vpop.f32.mrb[3].mxu0  ;;  %v2421_v42 = vpop.f32.mrb[3].mxu1  ;;  %v5280_v11 = vmul.f32 -1.442695, %v5424_v29  ;;  %v5426_v10 = vadd.f32 %v2376_v54, %v7324_v62  ;;  %v5282_v8 = vmul.f32 -1.442695, %v5456_v28  ;;  %v5458_v44 = vadd.f32 %v2419_v37, %v7326_v6 }
 0x21d   : > { %v5281_v38 = vmul.f32 -1.442695, %v5425_v13  ;;  %v5427_v61 = vadd.f32 %v2378_v46, %v7328_v59  ;;  %v5283_v4 = vmul.f32 -1.442695, %v5457_v45  ;;  %v5459_v31 = vadd.f32 %v2421_v42, %v7330_v30 }
 0x21e   : > { %5806 = vpow2.f32 %v5280_v11  ;;  %v5286_v26 = vmul.f32 -1.442695, %v5426_v10  ;;  %v5288_v20 = vmul.f32 -1.442695, %v5458_v44  ;;  %v1276_v42 = vsub.s32 4, %v1259_v12 }
 0x21f   : > { %5808 = vpow2.f32 %v5282_v8  ;;  %v5287_v60 = vmul.f32 -1.442695, %v5427_v61  ;;  %v5289_v16 = vmul.f32 -1.442695, %v5459_v31  ;;  %v1284_v8 = vsub.s32 6, %v1259_v12 }
 0x220   : > { %5810 = vpow2.f32 %v5281_v38  ;;  %v1280_v44 = vsub.s32 5, %v1259_v12 }
 0x221   : > { %5812 = vpow2.f32 %v5283_v4  ;;  %v1288_v4 = vsub.s32 7, %v1259_v12 }
 0x222   : > { %5814 = vpow2.f32 %v5286_v26 }
 0x223   : > { %5816 = vpow2.f32 %v5288_v20  ;;  %v7346_v30 = vrot.slane %v1256_v21, %v1288_v4 }
 0x224   : > { %5818 = vpow2.f32 %v5287_v60  ;;  %v7340_v60 = vrot.slane %v1256_v21, %v1276_v42 }
 0x225   : > { %5820 = vpow2.f32 %v5289_v16  ;;  %9030 = vst [vmem:[#allocation158_spill] sm:$0xff] %v7346_v30 }
 0x226   : > { %9027 = vst [vmem:[#allocation155_spill] sm:$0xff] %v7340_v60 }
 0x228   : > { %v5807_v28 = vpop.eup %5806 }
 0x229   : > { %v5809_v29 = vpop.eup %5808  ;;  %v2562_v46 = vadd.f32 1.0, %v5807_v28  ;;  %v7342_v28 = vrot.slane %v1256_v21, %v1284_v8 }
 0x22a   : > { %v5811_v13 = vpop.eup %5810  ;;  %v2564_v45 = vadd.f32 1.0, %v5809_v29  ;;  %v7344_v29 = vrot.slane %v1256_v21, %v1280_v44 }
 0x22b   : > { %v5813_v54 = vpop.eup %5812  ;;  %v2563_v10 = vadd.f32 1.0, %v5811_v13  ;;  %5822 = vrcp.f32 %v2562_v46  ;;  %9028 = vst [vmem:[#allocation156_spill] sm:$0xff] %v7342_v28 }
 0x22c   : > { %v5815_v37 = vpop.eup %5814  ;;  %v2565_v61 = vadd.f32 1.0, %v5813_v54  ;;  %5824 = vrcp.f32 %v2564_v45  ;;  %9029 = vst [vmem:[#allocation157_spill] sm:$0xff] %v7344_v29 }
 0x22d   : > { %v5817_v11 = vpop.eup %5816  ;;  %v2568_v26 = vadd.f32 1.0, %v5815_v37  ;;  %5826 = vrcp.f32 %v2563_v10 }
 0x22e   : > { %v5819_v38 = vpop.eup %5818  ;;  %v2570_v20 = vadd.f32 1.0, %v5817_v11  ;;  %5828 = vrcp.f32 %v2565_v61 }
 0x22f   : > { %v5821_v31 = vpop.eup %5820  ;;  %v2569_v16 = vadd.f32 1.0, %v5819_v38  ;;  %5830 = vrcp.f32 %v2568_v26 }
 0x230   : > { %v2571_v13 = vadd.f32 1.0, %v5821_v31  ;;  %5832 = vrcp.f32 %v2570_v20 }
 0x231   : > { %5834 = vrcp.f32 %v2569_v16 }
 0x232   : > { %5836 = vrcp.f32 %v2571_v13 }
 0x259   : > { %v2458_v54 = vpop.f32.mrb[32].mxu0  ;;  %v2501_v46 = vpop.f32.mrb[32].mxu1 }
 0x25a   : > { %v5488_v12 = vadd.f32 %v2458_v54, %v7340_v60  ;;  %v2460_v37 = vpop.f32.mrb[33].mxu0  ;;  %v5520_v45 = vadd.f32 %v2501_v46, %v7342_v28  ;;  %v2503_v11 = vpop.f32.mrb[33].mxu1 }
 0x25b   : > { %v5489_v42 = vadd.f32 %v2460_v37, %v7344_v29  ;;  %v2462_v10 = vpop.f32.mrb[34].mxu0  ;;  %v5521_v44 = vadd.f32 %v2503_v11, %v7346_v30  ;;  %v2505_v38 = vpop.f32.mrb[34].mxu1 }
 0x25c   : > { %v5284_v8 = vmul.f32 -1.442695, %v5488_v12  ;;  %v5490_v21 = vadd.f32 %v2462_v10, %v7340_v60  ;;  %v2464_v61 = vpop.f32.mrb[35].mxu0  ;;  %5838 = vtanh.f32 %v5520_v45  ;;  %v2507_v26 = vpop.f32.mrb[35].mxu1  ;;  %v5522_v16 = vadd.f32 %v2505_v38, %v7342_v28 }
 0x25d   : > { %v5285_v4 = vmul.f32 -1.442695, %v5489_v42  ;;  %v5491_v31 = vadd.f32 %v2464_v61, %v7344_v29  ;;  %v5823_v54 = vpop.eup %5822  ;;  %v5523_v12 = vadd.f32 %v2507_v26, %v7346_v30 }
 0x25e   : > { %5840 = vpow2.f32 %v5284_v8  ;;  %v5290_v20 = vmul.f32 -1.442695, %v5490_v21  ;;  %v5825_v13 = vpop.eup %5824 }
 0x25f   : > { %5842 = vpow2.f32 %v5285_v4  ;;  %v5291_v46 = vmul.f32 -1.442695, %v5491_v31  ;;  %v5827_v37 = vpop.eup %5826  ;;  %v2602_v38 = vmul.f32 0.0, %v5825_v13 }
 0x260   : > { %5844 = vtanh.f32 %v5521_v44  ;;  %v5829_v11 = vpop.eup %5828 }
 0x261   : > { %5846 = vpow2.f32 %v5290_v20  ;;  %v5831_v45 = vpop.eup %5830  ;;  %v2603_v20 = vmul.f32 0.0, %v5829_v11 }
 0x262   : > { %5848 = vtanh.f32 %v5522_v16  ;;  %v5833_v42 = vpop.eup %5832 }
 0x263   : > { %5850 = vpow2.f32 %v5291_v46  ;;  %v5835_v10 = vpop.eup %5834  ;;  %v2604_v59 = vmul.f32 0.0, %v5833_v42 }
 0x264   : > { %5852 = vtanh.f32 %v5523_v12  ;;  %v5837_v8 = vpop.eup %5836 }
 0x266   : > { %v5839_v21 = vpop.eup %5838 }
 0x267   : > { %v2606_v29 = vmul.f32 %v5839_v21, %v5823_v54 }
 0x268   : > { %v5841_v61 = vpop.eup %5840 }
 0x269   : > { %v5843_v4 = vpop.eup %5842  ;;  %v2566_v31 = vadd.f32 1.0, %v5841_v61  ;;  %v7356_v44 = vadd.f32 %v2606_v29, %v2602_v38  ;;  %v2605_v29 = vmul.f32 0.0, %v5837_v8 }
 0x26a   : > { %v5845_v28 = vpop.eup %5844  ;;  %v2567_v26 = vadd.f32 1.0, %v5843_v4 }
 0x26b   : > { %v5847_v30 = vpop.eup %5846  ;;  %5854 = vrcp.f32 %v2566_v31  ;;  %v2607_v16 = vmul.f32 %v5845_v28, %v5827_v37 }
 0x26c   : > { %v5849_v60 = vpop.eup %5848  ;;  %5856 = vtanh.f32 %v7356_v44  ;;  %v2572_v46 = vadd.f32 1.0, %v5847_v30 }
 0x26d   : > { %v5851_v12 = vpop.eup %5850  ;;  %5858 = vrcp.f32 %v2567_v26  ;;  %v7359_v6 = vadd.f32 %v2607_v16, %v2603_v20  ;;  %v2608_v54 = vmul.f32 %v5849_v60, %v5831_v45 }
 0x26e   : > { %v5853_v13 = vpop.eup %5852  ;;  %5860 = vrcp.f32 %v2572_v46  ;;  %v2573_v21 = vadd.f32 1.0, %v5851_v12  ;;  %v9031_v46 = vld [vmem:[#allocation89_spill] sm:$0xff]  ;;  %v9032_v12 = vld [vmem:[#allocation90_spill] sm:$0xff] }
 0x26f   : > { %5862 = vtanh.f32 %v7359_v6  ;;  %v7362_v61 = vadd.f32 %v2608_v54, %v2604_v59  ;;  %v2609_v11 = vmul.f32 %v5853_v13, %v5835_v10  ;;  %v9033_v54 = vld [vmem:[#allocation91_spill] sm:$0xff]  ;;  %v9034_v13 = vld [vmem:[#allocation92_spill] sm:$0xff] }
 0x270   : > { %5864 = vrcp.f32 %v2573_v21  ;;  %v9035_v21 = vld [vmem:[#allocation93_spill] sm:$0xff] }
 0x271   : > { %5866 = vtanh.f32 %v7362_v61  ;;  %v7365_v28 = vadd.f32 %v2609_v11, %v2605_v29  ;;  %v9036_v29 = vld [vmem:[#allocation94_spill] sm:$0xff]  ;;  %v9037_v11 = vld [vmem:[#allocation95_spill] sm:$0xff] }
 0x273   : > { %5868 = vtanh.f32 %v7365_v28 }
 0x275   : > { %v5855_v30 = vpop.eup %5854 }
 0x276   : > { %v5857_v37 = vpop.eup %5856 }
 0x277   : > { %v5859_v42 = vpop.eup %5858  ;;  %v2618_v8 = vmul.f32 %v5857_v37, %v5855_v30  ;;  %v9038_v30 = vld [vmem:[#allocation96_spill] sm:$0xff]  ;;  %v9039_v37 = vld [vmem:[#allocation97_spill] sm:$0xff] }
 0x278   : > { %v5861_v60 = vpop.eup %5860 }
 0x279   : > { %v5863_v45 = vpop.eup %5862 }
 0x27a   : > { %v5865_v38 = vpop.eup %5864  ;;  %v2619_v59 = vmul.f32 %v5863_v45, %v5859_v42  ;;  %v9040_v42 = vld [vmem:[#allocation98_spill] sm:$0xff]  ;;  %v9042_v45 = vld [vmem:[#allocation100_spill] sm:$0xff] }
 0x27b   : > { %v5867_v4 = vpop.eup %5866 }
 0x27c   : > { %v2620_v31 = vmul.f32 %v5867_v4, %v5861_v60  ;;  %v9041_v60 = vld [vmem:[#allocation99_spill] sm:$0xff]  ;;  %v9044_v4 = vld [vmem:[#allocation102_spill] sm:$0xff] }
 0x27d   : > { %v5869_v26 = vpop.eup %5868 }
 0x27e   : > { %v2621_v20 = vmul.f32 %v5869_v26, %v5865_v38  ;;  %v7368_v10 = vpack.c.bf16 %v2620_v31, %v2618_v8  ;;  %v9043_v38 = vld [vmem:[#allocation101_spill] sm:$0xff]  ;;  %v9045_v8 = vld [vmem:[#allocation103_spill] sm:$0xff]  ;;  %v9046_v31 = vld [vmem:[#allocation104_spill] sm:$0xff] }
 0x27f   : > { %v9047_v26 = vld [vmem:[#allocation105_spill] sm:$0xff] }
 0x280   : > { %v2640_v16 = vpack.c.bf16 %v2621_v20, %v2619_v59  ;;  %v9048_v59 = vld [vmem:[#allocation106_spill] sm:$0xff]  ;;  %v9049_v20 = vld [vmem:[#allocation107_spill] sm:$0xff] }
 0x282   : > { %2673 = vmatprep.mubr.bf16.mxu0 %v2640_v16  ;;  %2716 = vmatprep.mubr.bf16.mxu1 %v2640_v16 }
 0x283   : > { %2674 = vmatmul.mubr.bf16.vlgmr.msra.gmra.mrb[4].mxu0 %v7368_v10  ;;  %2717 = vmatmul.mubr.bf16.vlgmr.msra.gmra.mrb[4].mxu1 %v7368_v10 }
 0x284   : > { %2728 = vmatpush1.bf16.msra.mxu0 %v9031_v46  ;;  %2771 = vmatpush1.bf16.msra.mxu1 %v9032_v12 }
 0x285   : > { %2759 = vmatprep.mubr.bf16.mxu0 %v2640_v16  ;;  %2802 = vmatprep.mubr.bf16.mxu1 %v2640_v16  ;;  %v9050_v16 = vld [vmem:[#allocation108_spill] sm:$0xff] }
 0x286   : > { %2729 = vmatprep.subr.bf16.mxu0 %v9033_v54  ;;  %2772 = vmatprep.subr.bf16.mxu1 %v9034_v13 }
 0x288   : > { %2730 = vmatpush1.bf16.msra.mxu0 %v9035_v21  ;;  %2773 = vmatpush1.bf16.msra.mxu1 %v9036_v29 }
 0x289   : > { %2731 = vmatprep.subr.bf16.mxu0 %v9037_v11  ;;  %2774 = vmatprep.subr.bf16.mxu1 %v9038_v30 }
 0x28c   : > { %2732 = vmatpush1.bf16.msra.mxu0 %v9039_v37  ;;  %2775 = vmatpush1.bf16.msra.mxu1 %v9040_v42  ;;  %v9051_v42 = vld [vmem:[#allocation109_spill] sm:$0xff] }
 0x28d   : > { %2733 = vmatprep.subr.bf16.mxu0 %v9041_v60  ;;  %2776 = vmatprep.subr.bf16.mxu1 %v9042_v45  ;;  %v9052_v60 = vld [vmem:[#allocation110_spill] sm:$0xff]  ;;  %v9053_v45 = vld [vmem:[#allocation111_spill] sm:$0xff] }
 0x290   : > { %2734 = vmatpush1.bf16.msra.mxu0 %v9043_v38  ;;  %2777 = vmatpush1.bf16.msra.mxu1 %v9044_v4  ;;  %v9054_v38 = vld [vmem:[#allocation112_spill] sm:$0xff]  ;;  %v9055_v4 = vld [vmem:[#allocation113_spill] sm:$0xff] }
 0x291   : > { %2735 = vmatprep.subr.bf16.mxu0 %v9045_v8  ;;  %2778 = vmatprep.subr.bf16.mxu1 %v9046_v31  ;;  %v9056_v8 = vld [vmem:[#allocation114_spill] sm:$0xff]  ;;  %v9057_v31 = vld [vmem:[#allocation115_spill] sm:$0xff] }
 0x294   : > { %2736 = vmatpush1.bf16.msra.mxu0 %v9047_v26  ;;  %2779 = vmatpush1.bf16.msra.mxu1 %v9048_v59  ;;  %v9058_v26 = vld [vmem:[#allocation116_spill] sm:$0xff]  ;;  %v9059_v59 = vld [vmem:[#allocation117_spill] sm:$0xff] }
 0x295   : > { %2737 = vmatprep.subr.bf16.mxu0 %v9049_v20  ;;  %2780 = vmatprep.subr.bf16.mxu1 %v9050_v16  ;;  %v9060_v20 = vld [vmem:[#allocation118_spill] sm:$0xff]  ;;  %v9061_v16 = vld [vmem:[#allocation119_spill] sm:$0xff] }
 0x298   : > { %2738 = vmatpush1.bf16.msra.mxu0 %v9051_v42  ;;  %2781 = vmatpush1.bf16.msra.mxu1 %v9052_v60  ;;  %v9062_v42 = vld [vmem:[#allocation120_spill] sm:$0xff]  ;;  %v9063_v60 = vld [vmem:[#allocation121_spill] sm:$0xff] }
 0x299   : > { %2739 = vmatprep.subr.bf16.mxu0 %v9053_v45  ;;  %2782 = vmatprep.subr.bf16.mxu1 %v9054_v38  ;;  %v9064_v45 = vld [vmem:[#allocation122_spill] sm:$0xff]  ;;  %v9065_v38 = vld [vmem:[#allocation123_spill] sm:$0xff] }
 0x29c   : > { %2740 = vmatpush1.bf16.msra.mxu0 %v9055_v4  ;;  %2783 = vmatpush1.bf16.msra.mxu1 %v9056_v8  ;;  %v9066_v4 = vld [vmem:[#allocation124_spill] sm:$0xff]  ;;  %v9067_v8 = vld [vmem:[#allocation125_spill] sm:$0xff] }
 0x29d   : > { %2741 = vmatprep.subr.bf16.mxu0 %v9057_v31  ;;  %2784 = vmatprep.subr.bf16.mxu1 %v9058_v26  ;;  %v9068_v31 = vld [vmem:[#allocation126_spill] sm:$0xff]  ;;  %v9069_v26 = vld [vmem:[#allocation127_spill] sm:$0xff] }
 0x2a0   : > { %2742 = vmatpush1.bf16.msra.mxu0 %v9059_v59  ;;  %2785 = vmatpush1.bf16.msra.mxu1 %v9060_v20  ;;  %v9070_v59 = vld [vmem:[#allocation128_spill] sm:$0xff]  ;;  %v9071_v20 = vld [vmem:[#allocation129_spill] sm:$0xff] }
 0x2a1   : > { %2743 = vmatprep.subr.bf16.mxu0 %v9061_v16  ;;  %2786 = vmatprep.subr.bf16.mxu1 %v9062_v42  ;;  %v9072_v16 = vld [vmem:[#allocation130_spill] sm:$0xff]  ;;  %v9073_v42 = vld [vmem:[#allocation131_spill] sm:$0xff] }
 0x2a4   : > { %2744 = vmatpush1.bf16.msra.mxu0 %v9063_v60  ;;  %2787 = vmatpush1.bf16.msra.mxu1 %v9064_v45  ;;  %v9074_v60 = vld [vmem:[#allocation132_spill] sm:$0xff]  ;;  %v9075_v45 = vld [vmem:[#allocation133_spill] sm:$0xff] }
 0x2a5   : > { %2745 = vmatprep.subr.bf16.mxu0 %v9065_v38  ;;  %2788 = vmatprep.subr.bf16.mxu1 %v9066_v4  ;;  %v9076_v38 = vld [vmem:[#allocation134_spill] sm:$0xff]  ;;  %v9077_v4 = vld [vmem:[#allocation135_spill] sm:$0xff] }
 0x2a8   : > { %2746 = vmatpush1.bf16.msra.mxu0 %v9067_v8  ;;  %2789 = vmatpush1.bf16.msra.mxu1 %v9068_v31  ;;  %v9078_v8 = vld [vmem:[#allocation136_spill] sm:$0xff] }
 0x2a9   : > { %2747 = vmatprep.subr.bf16.mxu0 %v9069_v26  ;;  %2790 = vmatprep.subr.bf16.mxu1 %v9070_v59 }
 0x2ac   : > { %2748 = vmatpush1.bf16.msra.mxu0 %v9071_v20  ;;  %2791 = vmatpush1.bf16.msra.mxu1 %v9072_v16  ;;  %v9079_v20 = vld [vmem:[#allocation140_spill] sm:$0xff] }
 0x2ad   : > { %2749 = vmatprep.subr.bf16.mxu0 %v9073_v42  ;;  %2792 = vmatprep.subr.bf16.mxu1 %v9074_v60 }
 0x2b0   : > { %2750 = vmatpush1.bf16.msra.mxu0 %v9075_v45  ;;  %2793 = vmatpush1.bf16.msra.mxu1 %v9076_v38 }
 0x2b1   : > { %2751 = vmatprep.subr.bf16.mxu0 %v9077_v4  ;;  %2794 = vmatprep.subr.bf16.mxu1 %v9078_v8 }
 0x2b4   : > { %2752 = vmatpush1.bf16.msra.mxu0 %v7211_v18  ;;  %2795 = vmatpush1.bf16.msra.mxu1 %v7215_v47 }
 0x2b5   : > { %2753 = vmatprep.subr.bf16.mxu0 %v7217_v52  ;;  %2796 = vmatprep.subr.bf16.mxu1 %v9079_v20 }
 0x2b8   : > { %2754 = vmatpush1.bf16.msra.mxu0 %v7223_v36  ;;  %2797 = vmatpush1.bf16.msra.mxu1 %v7227_v63 }
 0x2b9   : > { %2755 = vmatprep.subr.bf16.mxu0 %v7229_v5  ;;  %2798 = vmatprep.subr.bf16.mxu1 %v7232_v1 }
 0x2bc   : > { %2756 = vmatpush1.bf16.msra.mxu0 %v7235_v53  ;;  %2799 = vmatpush1.bf16.msra.mxu1 %v7239_v7 }
 0x2bd   : > { %2757 = vmatprep.subr.bf16.mxu0 %v7241_v19  ;;  %2800 = vmatprep.subr.bf16.mxu1 %v7244_v9 }
 0x2c0   : > { %2758 = vmatpush1.bf16.msra.mxu0 %v7247_v17  ;;  %2801 = vmatpush1.bf16.msra.mxu1 %v7251_v22 }
 0x2c1   : > { %2944 = vmatprep.subr.bf16.mxu0 %v6811_v14  ;;  %2987 = vmatprep.subr.bf16.mxu1 %v6813_v15 }
 0x2c3   : > { %2760 = vmatmul.mubr.bf16.vlgmr.msra.gmra.mrb[36].mxu0 %v7368_v10  ;;  %2803 = vmatmul.mubr.bf16.vlgmr.msra.gmra.mrb[36].mxu1 %v7368_v10  ;;  %v9080_v10 = vld [vmem:[#allocation48_spill] sm:$0xff] }
 0x2c4   : > { %2945 = vmatpush1.bf16.msra.mxu0 %v6842_v23  ;;  %2988 = vmatpush1.bf16.msra.mxu1 %v6844_v24 }
 0x2c5   : > { %2946 = vmatprep.subr.bf16.mxu0 %v6846_v25  ;;  %2989 = vmatprep.subr.bf16.mxu1 %v6848_v27 }
 0x2c8   : > { %2947 = vmatpush1.bf16.msra.mxu0 %v6853_v32  ;;  %2990 = vmatpush1.bf16.msra.mxu1 %v6857_v33 }
 0x2c9   : > { %2948 = vmatprep.subr.bf16.mxu0 %v6859_v34  ;;  %2991 = vmatprep.subr.bf16.mxu1 %v6863_v35  ;;  %v9123_v35 = vld [vmem:[#allocation154_spill] sm:$0xff] }
 0x2cc   : > { %2949 = vmatpush1.bf16.msra.mxu0 %v6867_v39  ;;  %2992 = vmatpush1.bf16.msra.mxu1 %v6871_v40  ;;  %v9121_v40 = vld [vmem:[#allocation152_spill] sm:$0xff]  ;;  %v9122_v39 = vld [vmem:[#allocation153_spill] sm:$0xff] }
 0x2cd   : > { %2950 = vmatprep.subr.bf16.mxu0 %v6873_v41  ;;  %2993 = vmatprep.subr.bf16.mxu1 %v6876_v43 }
 0x2d0   : > { %2951 = vmatpush1.bf16.msra.mxu0 %v6881_v48  ;;  %2994 = vmatpush1.bf16.msra.mxu1 %v6885_v49  ;;  %v9081_v49 = vld [vmem:[#allocation49_spill] sm:$0xff] }
 0x2d1   : > { %2952 = vmatprep.subr.bf16.mxu0 %v6887_v50  ;;  %2995 = vmatprep.subr.bf16.mxu1 %v6891_v51  ;;  %v9082_v50 = vld [vmem:[#allocation50_spill] sm:$0xff]  ;;  %v9083_v51 = vld [vmem:[#allocation51_spill] sm:$0xff] }
 0x2d4   : > { %2953 = vmatpush1.bf16.msra.mxu0 %v6895_v55  ;;  %2996 = vmatpush1.bf16.msra.mxu1 %v6899_v56  ;;  %v9084_v55 = vld [vmem:[#allocation52_spill] sm:$0xff]  ;;  %v9085_v56 = vld [vmem:[#allocation53_spill] sm:$0xff] }
 0x2d5   : > { %2954 = vmatprep.subr.bf16.mxu0 %v6901_v57  ;;  %2997 = vmatprep.subr.bf16.mxu1 %v6904_v58  ;;  %v9086_v57 = vld [vmem:[#allocation54_spill] sm:$0xff]  ;;  %v9087_v58 = vld [vmem:[#allocation55_spill] sm:$0xff] }
 0x2d8   : > { %2955 = vmatpush1.bf16.msra.mxu0 %v6909_v0  ;;  %2998 = vmatpush1.bf16.msra.mxu1 %v6913_v2  ;;  %v9088_v0 = vld [vmem:[#allocation56_spill] sm:$0xff]  ;;  %v9089_v2 = vld [vmem:[#allocation57_spill] sm:$0xff] }
 0x2d9   : > { %2956 = vmatprep.subr.bf16.mxu0 %v6915_v3  ;;  %2999 = vmatprep.subr.bf16.mxu1 %v9080_v10  ;;  %v9090_v3 = vld [vmem:[#allocation58_spill] sm:$0xff]  ;;  %v9091_v10 = vld [vmem:[#allocation59_spill] sm:$0xff] }
 0x2dc   : > { %2957 = vmatpush1.bf16.msra.mxu0 %v9081_v49  ;;  %3000 = vmatpush1.bf16.msra.mxu1 %v9082_v50  ;;  %v9092_v49 = vld [vmem:[#allocation60_spill] sm:$0xff]  ;;  %v9093_v50 = vld [vmem:[#allocation61_spill] sm:$0xff] }
 0x2dd   : > { %2958 = vmatprep.subr.bf16.mxu0 %v9083_v51  ;;  %3001 = vmatprep.subr.bf16.mxu1 %v9084_v55  ;;  %v9094_v51 = vld [vmem:[#allocation62_spill] sm:$0xff]  ;;  %v9095_v55 = vld [vmem:[#allocation63_spill] sm:$0xff] }
 0x2e0   : > { %2959 = vmatpush1.bf16.msra.mxu0 %v9085_v56  ;;  %3002 = vmatpush1.bf16.msra.mxu1 %v9086_v57  ;;  %v9096_v56 = vld [vmem:[#allocation64_spill] sm:$0xff]  ;;  %v9097_v57 = vld [vmem:[#allocation65_spill] sm:$0xff] }
 0x2e1   : > { %2960 = vmatprep.subr.bf16.mxu0 %v9087_v58  ;;  %3003 = vmatprep.subr.bf16.mxu1 %v9088_v0  ;;  %v9098_v58 = vld [vmem:[#allocation66_spill] sm:$0xff]  ;;  %v9099_v0 = vld [vmem:[#allocation67_spill] sm:$0xff] }
 0x2e4   : > { %2961 = vmatpush1.bf16.msra.mxu0 %v9089_v2  ;;  %3004 = vmatpush1.bf16.msra.mxu1 %v9090_v3  ;;  %v9100_v2 = vld [vmem:[#allocation68_spill] sm:$0xff]  ;;  %v9101_v3 = vld [vmem:[#allocation69_spill] sm:$0xff] }
 0x2e5   : > { %2962 = vmatprep.subr.bf16.mxu0 %v9091_v10  ;;  %3005 = vmatprep.subr.bf16.mxu1 %v9092_v49  ;;  %v9102_v10 = vld [vmem:[#allocation70_spill] sm:$0xff]  ;;  %v9103_v49 = vld [vmem:[#allocation71_spill] sm:$0xff] }
 0x2e8   : > { %2963 = vmatpush1.bf16.msra.mxu0 %v9093_v50  ;;  %3006 = vmatpush1.bf16.msra.mxu1 %v9094_v51  ;;  %v9104_v50 = vld [vmem:[#allocation72_spill] sm:$0xff]  ;;  %v9105_v51 = vld [vmem:[#allocation73_spill] sm:$0xff] }
 0x2e9   : > { %2964 = vmatprep.subr.bf16.mxu0 %v9095_v55  ;;  %3007 = vmatprep.subr.bf16.mxu1 %v9096_v56  ;;  %v9106_v55 = vld [vmem:[#allocation74_spill] sm:$0xff]  ;;  %v9107_v56 = vld [vmem:[#allocation75_spill] sm:$0xff] }
 0x2ec   : > { %2965 = vmatpush1.bf16.msra.mxu0 %v9097_v57  ;;  %3008 = vmatpush1.bf16.msra.mxu1 %v9098_v58  ;;  %v9108_v57 = vld [vmem:[#allocation76_spill] sm:$0xff]  ;;  %v9109_v58 = vld [vmem:[#allocation77_spill] sm:$0xff] }
 0x2ed   : > { %2966 = vmatprep.subr.bf16.mxu0 %v9099_v0  ;;  %3009 = vmatprep.subr.bf16.mxu1 %v9100_v2  ;;  %v9110_v0 = vld [vmem:[#allocation78_spill] sm:$0xff]  ;;  %v9111_v2 = vld [vmem:[#allocation79_spill] sm:$0xff] }
 0x2f0   : > { %2967 = vmatpush1.bf16.msra.mxu0 %v9101_v3  ;;  %3010 = vmatpush1.bf16.msra.mxu1 %v9102_v10  ;;  %v9112_v3 = vld [vmem:[#allocation80_spill] sm:$0xff]  ;;  %v9113_v10 = vld [vmem:[#allocation81_spill] sm:$0xff] }
 0x2f1   : > { %2968 = vmatprep.subr.bf16.mxu0 %v9103_v49  ;;  %3011 = vmatprep.subr.bf16.mxu1 %v9104_v50  ;;  %v9114_v49 = vld [vmem:[#allocation82_spill] sm:$0xff]  ;;  %v9115_v50 = vld [vmem:[#allocation83_spill] sm:$0xff] }
 0x2f4   : > { %2969 = vmatpush1.bf16.msra.mxu0 %v9105_v51  ;;  %3012 = vmatpush1.bf16.msra.mxu1 %v9106_v55  ;;  %v9116_v51 = vld [vmem:[#allocation84_spill] sm:$0xff]  ;;  %v9117_v55 = vld [vmem:[#allocation85_spill] sm:$0xff] }
 0x2f5   : > { %2970 = vmatprep.subr.bf16.mxu0 %v9107_v56  ;;  %3013 = vmatprep.subr.bf16.mxu1 %v9108_v57  ;;  %v9118_v56 = vld [vmem:[#allocation86_spill] sm:$0xff]  ;;  %v9119_v57 = vld [vmem:[#allocation87_spill] sm:$0xff] }
 0x2f8   : > { %2971 = vmatpush1.bf16.msra.mxu0 %v9109_v58  ;;  %3014 = vmatpush1.bf16.msra.mxu1 %v9110_v0  ;;  %v9120_v58 = vld [vmem:[#allocation88_spill] sm:$0xff] }
 0x2f9   : > { %2972 = vmatprep.subr.bf16.mxu0 %v9111_v2  ;;  %3015 = vmatprep.subr.bf16.mxu1 %v9112_v3 }
 0x2fc   : > { %2973 = vmatpush1.bf16.msra.mxu0 %v9113_v10  ;;  %3016 = vmatpush1.bf16.msra.mxu1 %v9114_v49 }
 0x2fd   : > { %2974 = vmatprep.subr.bf16.mxu0 %v9115_v50  ;;  %3017 = vmatprep.subr.bf16.mxu1 %v9116_v51 }
 0x300   : > { %2975 = vmatpush1.bf16.msra.mxu0 %v9117_v55  ;;  %3018 = vmatpush1.bf16.msra.mxu1 %v9118_v56 }
 0x301   : > { %3030 = vmatprep.subr.bf16.mxu0 %v9119_v57  ;;  %3073 = vmatprep.subr.bf16.mxu1 %v9120_v58 }
 0x356   : > { %v2675_v0 = vpop.f32.mrb[4].mxu0  ;;  %v2718_v2 = vpop.f32.mrb[4].mxu1 }
 0x357   : > { %v2677_v48 = vpop.f32.mrb[5].mxu0  ;;  %v2720_v3 = vpop.f32.mrb[5].mxu1  ;;  %v5428_v50 = vadd.f32 %v2675_v0, %v7324_v62  ;;  %v5460_v51 = vadd.f32 %v2718_v2, %v9121_v40 }
 0x358   : > { %v2679_v43 = vpop.f32.mrb[6].mxu0  ;;  %v2722_v10 = vpop.f32.mrb[6].mxu1  ;;  %v5429_v55 = vadd.f32 %v2677_v48, %v9122_v39  ;;  %v5461_v56 = vadd.f32 %v2720_v3, %v9123_v35 }
 0x359   : > { %v2681_v41 = vpop.f32.mrb[7].mxu0  ;;  %v2724_v49 = vpop.f32.mrb[7].mxu1  ;;  %v5292_v34 = vmul.f32 -1.442695, %v5428_v50  ;;  %v5430_v57 = vadd.f32 %v2679_v43, %v7324_v62  ;;  %v5294_v58 = vmul.f32 -1.442695, %v5460_v51  ;;  %v5462_v33 = vadd.f32 %v2722_v10, %v9121_v40 }
 0x35a   : > { %v5293_v32 = vmul.f32 -1.442695, %v5429_v55  ;;  %v5431_v27 = vadd.f32 %v2681_v41, %v9122_v39  ;;  %v5295_v25 = vmul.f32 -1.442695, %v5461_v56  ;;  %v5463_v24 = vadd.f32 %v2724_v49, %v9123_v35 }
 0x35b   : > { %5870 = vpow2.f32 %v5292_v34  ;;  %v5298_v0 = vmul.f32 -1.442695, %v5430_v57  ;;  %v5300_v2 = vmul.f32 -1.442695, %v5462_v33 }
 0x35c   : > { %5872 = vpow2.f32 %v5294_v58  ;;  %v5299_v48 = vmul.f32 -1.442695, %v5431_v27  ;;  %v5301_v3 = vmul.f32 -1.442695, %v5463_v24 }
 0x35d   : > { %5874 = vpow2.f32 %v5293_v32 }
 0x35e   : > { %5876 = vpow2.f32 %v5295_v25 }
 0x35f   : > { %5878 = vpow2.f32 %v5298_v0 }
 0x360   : > { %5880 = vpow2.f32 %v5300_v2 }
 0x361   : > { %5882 = vpow2.f32 %v5299_v48  ;;  %v9124_v48 = vld [vmem:[#allocation155_spill] sm:$0xff] }
 0x362   : > { %5884 = vpow2.f32 %v5301_v3 }
 0x365   : > { %v5871_v43 = vpop.eup %5870 }
 0x366   : > { %v5873_v50 = vpop.eup %5872  ;;  %v2865_v41 = vadd.f32 1.0, %v5871_v43  ;;  %v9125_v43 = vld [vmem:[#allocation156_spill] sm:$0xff] }
 0x367   : > { %v5875_v51 = vpop.eup %5874  ;;  %v2867_v10 = vadd.f32 1.0, %v5873_v50 }
 0x368   : > { %v5877_v55 = vpop.eup %5876  ;;  %v2866_v34 = vadd.f32 1.0, %v5875_v51  ;;  %5886 = vrcp.f32 %v2865_v41  ;;  %v9126_v41 = vld [vmem:[#allocation157_spill] sm:$0xff] }
 0x369   : > { %v5879_v56 = vpop.eup %5878  ;;  %v2868_v58 = vadd.f32 1.0, %v5877_v55  ;;  %5888 = vrcp.f32 %v2867_v10  ;;  %v9127_v10 = vld [vmem:[#allocation158_spill] sm:$0xff] }
 0x36a   : > { %v5881_v49 = vpop.eup %5880  ;;  %v2871_v27 = vadd.f32 1.0, %v5879_v56  ;;  %5890 = vrcp.f32 %v2866_v34 }
 0x36b   : > { %v5883_v57 = vpop.eup %5882  ;;  %v2873_v24 = vadd.f32 1.0, %v5881_v49  ;;  %5892 = vrcp.f32 %v2868_v58 }
 0x36c   : > { %v5885_v33 = vpop.eup %5884  ;;  %v2872_v25 = vadd.f32 1.0, %v5883_v57  ;;  %5894 = vrcp.f32 %v2871_v27 }
 0x36d   : > { %v2874_v32 = vadd.f32 1.0, %v5885_v33  ;;  %5896 = vrcp.f32 %v2873_v24 }
 0x36e   : > { %5898 = vrcp.f32 %v2872_v25 }
 0x36f   : > { %5900 = vrcp.f32 %v2874_v32 }
 0x372   : > { %v5887_v35 = vpop.eup %5886 }
 0x396   : > { %v2761_v0 = vpop.f32.mrb[36].mxu0  ;;  %v2804_v2 = vpop.f32.mrb[36].mxu1 }
 0x397   : > { %v5492_v3 = vadd.f32 %v2761_v0, %v9124_v48  ;;  %v5524_v50 = vadd.f32 %v2804_v2, %v9125_v43  ;;  %v2763_v51 = vpop.f32.mrb[37].mxu0  ;;  %v2806_v55 = vpop.f32.mrb[37].mxu1 }
 0x398   : > { %v5493_v56 = vadd.f32 %v2763_v51, %v9126_v41  ;;  %v5525_v49 = vadd.f32 %v2806_v55, %v9127_v10  ;;  %v2765_v34 = vpop.f32.mrb[38].mxu0  ;;  %v2808_v57 = vpop.f32.mrb[38].mxu1 }
 0x399   : > { %v5296_v58 = vmul.f32 -1.442695, %v5492_v3  ;;  %5902 = vtanh.f32 %v5524_v50  ;;  %v5494_v33 = vadd.f32 %v2765_v34, %v9124_v48  ;;  %v2767_v27 = vpop.f32.mrb[39].mxu0  ;;  %v2810_v24 = vpop.f32.mrb[39].mxu1  ;;  %v5526_v0 = vadd.f32 %v2808_v57, %v9125_v43 }
 0x39a   : > { %v5297_v25 = vmul.f32 -1.442695, %v5493_v56  ;;  %5904 = vtanh.f32 %v5525_v49  ;;  %v5495_v2 = vadd.f32 %v2767_v27, %v9126_v41  ;;  %v5889_v51 = vpop.eup %5888  ;;  %v5527_v39 = vadd.f32 %v2810_v24, %v9127_v10 }
 0x39b   : > { %5906 = vpow2.f32 %v5296_v58  ;;  %v5302_v32 = vmul.f32 -1.442695, %v5494_v33  ;;  %v5891_v3 = vpop.eup %5890  ;;  %v2905_v58 = vmul.f32 %v5889_v51, %v7356_v44 }
 0x39c   : > { %5908 = vpow2.f32 %v5297_v25  ;;  %v5303_v55 = vmul.f32 -1.442695, %v5495_v2  ;;  %v5893_v50 = vpop.eup %5892 }
 0x39d   : > { %5910 = vpow2.f32 %v5302_v32  ;;  %v5895_v34 = vpop.eup %5894  ;;  %v2906_v25 = vmul.f32 %v5893_v50, %v7359_v6 }
 0x39e   : > { %5912 = vtanh.f32 %v5526_v0  ;;  %v5897_v56 = vpop.eup %5896 }
 0x39f   : > { %5914 = vpow2.f32 %v5303_v55  ;;  %v5899_v49 = vpop.eup %5898  ;;  %v2907_v23 = vmul.f32 %v5897_v56, %v7362_v61 }
 0x3a0   : > { %5916 = vtanh.f32 %v5527_v39  ;;  %v5901_v57 = vpop.eup %5900 }
 0x3a3   : > { %v5903_v43 = vpop.eup %5902 }
 0x3a4   : > { %v5905_v27 = vpop.eup %5904  ;;  %v2909_v33 = vmul.f32 %v5903_v43, %v5887_v35  ;;  %v2908_v43 = vmul.f32 %v5901_v57, %v7365_v28 }
 0x3a5   : > { %v5907_v41 = vpop.eup %5906  ;;  %v2910_v2 = vmul.f32 %v5905_v27, %v5891_v3 }
 0x3a6   : > { %v5909_v24 = vpop.eup %5908  ;;  %v2869_v10 = vadd.f32 1.0, %v5907_v41  ;;  %v7520_v32 = vadd.f32 %v2909_v33, %v2905_v58  ;;  %v9128_v33 = vld [vmem:[#allocation98_spill] sm:$0xff] }
 0x3a7   : > { %v5911_v0 = vpop.eup %5910  ;;  %v2870_v48 = vadd.f32 1.0, %v5909_v24  ;;  %v7522_v55 = vadd.f32 %v2910_v2, %v2906_v25  ;;  %v9129_v25 = vld [vmem:[#allocation99_spill] sm:$0xff]  ;;  %v9130_v2 = vld [vmem:[#allocation100_spill] sm:$0xff]  ;;  %v9131_v24 = vld [vmem:[#allocation101_spill] sm:$0xff] }
 0x3a8   : > { %v5913_v39 = vpop.eup %5912  ;;  %5918 = vrcp.f32 %v2869_v10  ;;  %v2875_v40 = vadd.f32 1.0, %v5911_v0  ;;  %v9132_v0 = vld [vmem:[#allocation102_spill] sm:$0xff] }
 0x3a9   : > { %v5915_v62 = vpop.eup %5914  ;;  %5920 = vtanh.f32 %v7520_v32  ;;  %v2911_v35 = vmul.f32 %v5913_v39, %v5895_v34  ;;  %v9133_v39 = vld [vmem:[#allocation103_spill] sm:$0xff] }
 0x3aa   : > { %v5917_v44 = vpop.eup %5916  ;;  %5922 = vrcp.f32 %v2870_v48  ;;  %v2876_v6 = vadd.f32 1.0, %v5915_v62 }
 0x3ab   : > { %5924 = vtanh.f32 %v7522_v55  ;;  %v7528_v41 = vadd.f32 %v2911_v35, %v2907_v23  ;;  %v2912_v51 = vmul.f32 %v5917_v44, %v5899_v49  ;;  %v9134_v35 = vld [vmem:[#allocation104_spill] sm:$0xff]  ;;  %v9135_v44 = vld [vmem:[#allocation105_spill] sm:$0xff] }
 0x3ac   : > { %5926 = vrcp.f32 %v2875_v40 }
 0x3ad   : > { %5928 = vtanh.f32 %v7528_v41  ;;  %v7531_v10 = vadd.f32 %v2912_v51, %v2908_v43  ;;  %v9137_v43 = vld [vmem:[#allocation107_spill] sm:$0xff]  ;;  %v9138_v51 = vld [vmem:[#allocation108_spill] sm:$0xff] }
 0x3ae   : > { %5930 = vrcp.f32 %v2876_v6  ;;  %v9136_v6 = vld [vmem:[#allocation106_spill] sm:$0xff] }
 0x3af   : > { %5932 = vtanh.f32 %v7531_v10 }
 0x3b2   : > { %v5919_v61 = vpop.eup %5918 }
 0x3b3   : > { %v5921_v3 = vpop.eup %5920 }
 0x3b4   : > { %v5923_v50 = vpop.eup %5922  ;;  %v2921_v56 = vmul.f32 %v5921_v3, %v5919_v61  ;;  %v9139_v61 = vld [vmem:[#allocation109_spill] sm:$0xff]  ;;  %v9140_v3 = vld [vmem:[#allocation110_spill] sm:$0xff] }
 0x3b5   : > { %v5925_v48 = vpop.eup %5924 }
 0x3b6   : > { %v5927_v62 = vpop.eup %5926  ;;  %v2922_v27 = vmul.f32 %v5925_v48, %v5923_v50  ;;  %v9141_v50 = vld [vmem:[#allocation111_spill] sm:$0xff]  ;;  %v9142_v48 = vld [vmem:[#allocation112_spill] sm:$0xff] }
 0x3b7   : > { %v5929_v34 = vpop.eup %5928 }
 0x3b8   : > { %v5931_v28 = vpop.eup %5930  ;;  %v2923_v57 = vmul.f32 %v5929_v34, %v5927_v62  ;;  %v9143_v62 = vld [vmem:[#allocation113_spill] sm:$0xff]  ;;  %v9144_v34 = vld [vmem:[#allocation114_spill] sm:$0xff] }
 0x3b9   : > { %v5933_v23 = vpop.eup %5932 }
 0x3ba   : > { %v2924_v49 = vmul.f32 %v5933_v23, %v5931_v28  ;;  %v7534_v40 = vpack.c.bf16 %v2923_v57, %v2921_v56  ;;  %v9145_v28 = vld [vmem:[#allocation115_spill] sm:$0xff]  ;;  %v9146_v56 = vld [vmem:[#allocation116_spill] sm:$0xff]  ;;  %v9147_v57 = vld [vmem:[#allocation117_spill] sm:$0xff] }
 0x3bb   : > { %v9148_v23 = vld [vmem:[#allocation118_spill] sm:$0xff] }
 0x3bc   : > { %v2943_v58 = vpack.c.bf16 %v2924_v49, %v2922_v27  ;;  %v9149_v27 = vld [vmem:[#allocation119_spill] sm:$0xff]  ;;  %v9150_v49 = vld [vmem:[#allocation120_spill] sm:$0xff] }
 0x3be   : > { %2976 = vmatprep.mubr.bf16.mxu0 %v2943_v58  ;;  %3019 = vmatprep.mubr.bf16.mxu1 %v2943_v58 }
 0x3bf   : > { %2977 = vmatmul.mubr.bf16.vlgmr.msra.gmra.mrb[8].mxu0 %v7534_v40  ;;  %3020 = vmatmul.mubr.bf16.vlgmr.msra.gmra.mrb[8].mxu1 %v7534_v40 }
 0x3c0   : > { %3031 = vmatpush1.bf16.msra.mxu0 %v9031_v46  ;;  %3074 = vmatpush1.bf16.msra.mxu1 %v9032_v12 }
 0x3c1   : > { %3062 = vmatprep.mubr.bf16.mxu0 %v2943_v58  ;;  %3105 = vmatprep.mubr.bf16.mxu1 %v2943_v58  ;;  %v9151_v58 = vld [vmem:[#allocation121_spill] sm:$0xff] }
 0x3c2   : > { %3032 = vmatprep.subr.bf16.mxu0 %v9033_v54  ;;  %3075 = vmatprep.subr.bf16.mxu1 %v9034_v13 }
 0x3c4   : > { %3033 = vmatpush1.bf16.msra.mxu0 %v9035_v21  ;;  %3076 = vmatpush1.bf16.msra.mxu1 %v9036_v29 }
 0x3c5   : > { %3034 = vmatprep.subr.bf16.mxu0 %v9037_v11  ;;  %3077 = vmatprep.subr.bf16.mxu1 %v9038_v30 }
 0x3c8   : > { %3035 = vmatpush1.bf16.msra.mxu0 %v9039_v37  ;;  %3078 = vmatpush1.bf16.msra.mxu1 %v9128_v33 }
 0x3c9   : > { %3036 = vmatprep.subr.bf16.mxu0 %v9129_v25  ;;  %3079 = vmatprep.subr.bf16.mxu1 %v9130_v2 }
 0x3cc   : > { %3037 = vmatpush1.bf16.msra.mxu0 %v9131_v24  ;;  %3080 = vmatpush1.bf16.msra.mxu1 %v9132_v0 }
 0x3cd   : > { %3038 = vmatprep.subr.bf16.mxu0 %v9133_v39  ;;  %3081 = vmatprep.subr.bf16.mxu1 %v9134_v35 }
 0x3d0   : > { %3039 = vmatpush1.bf16.msra.mxu0 %v9135_v44  ;;  %3082 = vmatpush1.bf16.msra.mxu1 %v9136_v6 }
 0x3d1   : > { %3040 = vmatprep.subr.bf16.mxu0 %v9137_v43  ;;  %3083 = vmatprep.subr.bf16.mxu1 %v9138_v51 }
 0x3d4   : > { %3041 = vmatpush1.bf16.msra.mxu0 %v9139_v61  ;;  %3084 = vmatpush1.bf16.msra.mxu1 %v9140_v3 }
 0x3d5   : > { %3042 = vmatprep.subr.bf16.mxu0 %v9141_v50  ;;  %3085 = vmatprep.subr.bf16.mxu1 %v9142_v48  ;;  %v9152_v50 = vld [vmem:[#allocation122_spill] sm:$0xff]  ;;  %v9153_v48 = vld [vmem:[#allocation123_spill] sm:$0xff] }
 0x3d8   : > { %3043 = vmatpush1.bf16.msra.mxu0 %v9143_v62  ;;  %3086 = vmatpush1.bf16.msra.mxu1 %v9144_v34  ;;  %v9154_v62 = vld [vmem:[#allocation124_spill] sm:$0xff]  ;;  %v9155_v34 = vld [vmem:[#allocation125_spill] sm:$0xff] }
 0x3d9   : > { %3044 = vmatprep.subr.bf16.mxu0 %v9145_v28  ;;  %3087 = vmatprep.subr.bf16.mxu1 %v9146_v56 }
 0x3dc   : > { %3045 = vmatpush1.bf16.msra.mxu0 %v9147_v57  ;;  %3088 = vmatpush1.bf16.msra.mxu1 %v9148_v23  ;;  %v9156_v23 = vld [vmem:[#allocation129_spill] sm:$0xff] }
 0x3dd   : > { %3046 = vmatprep.subr.bf16.mxu0 %v9149_v27  ;;  %3089 = vmatprep.subr.bf16.mxu1 %v9150_v49 }
 0x3e0   : > { %3047 = vmatpush1.bf16.msra.mxu0 %v9151_v58  ;;  %3090 = vmatpush1.bf16.msra.mxu1 %v9152_v50 }
 0x3e1   : > { %3048 = vmatprep.subr.bf16.mxu0 %v9153_v48  ;;  %3091 = vmatprep.subr.bf16.mxu1 %v9154_v62 }
 0x3e4   : > { %3049 = vmatpush1.bf16.msra.mxu0 %v9155_v34  ;;  %3092 = vmatpush1.bf16.msra.mxu1 %v9068_v31 }
 0x3e5   : > { %3050 = vmatprep.subr.bf16.mxu0 %v9069_v26  ;;  %3093 = vmatprep.subr.bf16.mxu1 %v9070_v59 }
 0x3e8   : > { %3051 = vmatpush1.bf16.msra.mxu0 %v9156_v23  ;;  %3094 = vmatpush1.bf16.msra.mxu1 %v9072_v16 }
 0x3e9   : > { %3052 = vmatprep.subr.bf16.mxu0 %v9073_v42  ;;  %3095 = vmatprep.subr.bf16.mxu1 %v9074_v60 }
 0x3ec   : > { %3053 = vmatpush1.bf16.msra.mxu0 %v9075_v45  ;;  %3096 = vmatpush1.bf16.msra.mxu1 %v9076_v38 }
 0x3ed   : > { %3054 = vmatprep.subr.bf16.mxu0 %v9077_v4  ;;  %3097 = vmatprep.subr.bf16.mxu1 %v9078_v8  ;;  %v9224_v8 = vld [vmem:[#allocation154_spill] sm:$0xff] }
 0x3f0   : > { %3055 = vmatpush1.bf16.msra.mxu0 %v7211_v18  ;;  %3098 = vmatpush1.bf16.msra.mxu1 %v7215_v47  ;;  %v9222_v47 = vld [vmem:[#allocation152_spill] sm:$0xff]  ;;  %v9223_v18 = vld [vmem:[#allocation153_spill] sm:$0xff] }
 0x3f1   : > { %3056 = vmatprep.subr.bf16.mxu0 %v7217_v52  ;;  %3099 = vmatprep.subr.bf16.mxu1 %v9079_v20  ;;  %v9221_v52 = vld [vmem:[#allocation151_spill] sm:$0xff] }
 0x3f4   : > { %3057 = vmatpush1.bf16.msra.mxu0 %v7223_v36  ;;  %3100 = vmatpush1.bf16.msra.mxu1 %v7227_v63 }
 0x3f5   : > { %3058 = vmatprep.subr.bf16.mxu0 %v7229_v5  ;;  %3101 = vmatprep.subr.bf16.mxu1 %v7232_v1  ;;  %v9157_v1 = vld [vmem:[#allocation25_spill] sm:$0xff]  ;;  %v9166_v5 = vld [vmem:[#allocation34_spill] sm:$0xff] }
 0x3f8   : > { %3059 = vmatpush1.bf16.msra.mxu0 %v7235_v53  ;;  %3102 = vmatpush1.bf16.msra.mxu1 %v7239_v7  ;;  %v9158_v53 = vld [vmem:[#allocation26_spill] sm:$0xff]  ;;  %v9159_v7 = vld [vmem:[#allocation27_spill] sm:$0xff] }
 0x3f9   : > { %3060 = vmatprep.subr.bf16.mxu0 %v7241_v19  ;;  %3103 = vmatprep.subr.bf16.mxu1 %v7244_v9  ;;  %v9160_v19 = vld [vmem:[#allocation28_spill] sm:$0xff]  ;;  %v9161_v9 = vld [vmem:[#allocation29_spill] sm:$0xff] }
 0x3fc   : > { %3061 = vmatpush1.bf16.msra.mxu0 %v7247_v17  ;;  %3104 = vmatpush1.bf16.msra.mxu1 %v7251_v22  ;;  %v9162_v17 = vld [vmem:[#allocation30_spill] sm:$0xff]  ;;  %v9163_v22 = vld [vmem:[#allocation31_spill] sm:$0xff] }
 0x3fd   : > { %3247 = vmatprep.subr.bf16.mxu0 %v6811_v14  ;;  %3290 = vmatprep.subr.bf16.mxu1 %v6813_v15  ;;  %v9164_v14 = vld [vmem:[#allocation32_spill] sm:$0xff]  ;;  %v9165_v15 = vld [vmem:[#allocation33_spill] sm:$0xff] }
 0x3ff   : > { %3063 = vmatmul.mubr.bf16.vlgmr.msra.gmra.mrb[40].mxu0 %v7534_v40  ;;  %3106 = vmatmul.mubr.bf16.vlgmr.msra.gmra.mrb[40].mxu1 %v7534_v40  ;;  %v9167_v40 = vld [vmem:[#allocation35_spill] sm:$0xff] }
 0x400   : > { %3248 = vmatpush1.bf16.msra.mxu0 %v9157_v1  ;;  %3291 = vmatpush1.bf16.msra.mxu1 %v9158_v53  ;;  %v9168_v1 = vld [vmem:[#allocation36_spill] sm:$0xff]  ;;  %v9169_v53 = vld [vmem:[#allocation37_spill] sm:$0xff] }
 0x401   : > { %3249 = vmatprep.subr.bf16.mxu0 %v9159_v7  ;;  %3292 = vmatprep.subr.bf16.mxu1 %v9160_v19  ;;  %v9170_v7 = vld [vmem:[#allocation38_spill] sm:$0xff]  ;;  %v9171_v19 = vld [vmem:[#allocation39_spill] sm:$0xff] }
 0x404   : > { %3250 = vmatpush1.bf16.msra.mxu0 %v9161_v9  ;;  %3293 = vmatpush1.bf16.msra.mxu1 %v9162_v17  ;;  %v9172_v9 = vld [vmem:[#allocation40_spill] sm:$0xff]  ;;  %v9173_v17 = vld [vmem:[#allocation41_spill] sm:$0xff] }
 0x405   : > { %3251 = vmatprep.subr.bf16.mxu0 %v9163_v22  ;;  %3294 = vmatprep.subr.bf16.mxu1 %v9164_v14  ;;  %v9174_v22 = vld [vmem:[#allocation42_spill] sm:$0xff]  ;;  %v9175_v14 = vld [vmem:[#allocation43_spill] sm:$0xff] }
 0x408   : > { %3252 = vmatpush1.bf16.msra.mxu0 %v9165_v15  ;;  %3295 = vmatpush1.bf16.msra.mxu1 %v9166_v5  ;;  %v9176_v15 = vld [vmem:[#allocation44_spill] sm:$0xff]  ;;  %v9177_v5 = vld [vmem:[#allocation45_spill] sm:$0xff] }
 0x409   : > { %3253 = vmatprep.subr.bf16.mxu0 %v9167_v40  ;;  %3296 = vmatprep.subr.bf16.mxu1 %v9168_v1  ;;  %v9178_v40 = vld [vmem:[#allocation46_spill] sm:$0xff]  ;;  %v9179_v1 = vld [vmem:[#allocation47_spill] sm:$0xff] }
 0x40c   : > { %3254 = vmatpush1.bf16.msra.mxu0 %v9169_v53  ;;  %3297 = vmatpush1.bf16.msra.mxu1 %v9170_v7  ;;  %v9180_v53 = vld [vmem:[#allocation48_spill] sm:$0xff]  ;;  %v9181_v7 = vld [vmem:[#allocation49_spill] sm:$0xff] }
 0x40d   : > { %3255 = vmatprep.subr.bf16.mxu0 %v9171_v19  ;;  %3298 = vmatprep.subr.bf16.mxu1 %v9172_v9  ;;  %v9182_v19 = vld [vmem:[#allocation50_spill] sm:$0xff]  ;;  %v9183_v9 = vld [vmem:[#allocation51_spill] sm:$0xff] }
 0x410   : > { %3256 = vmatpush1.bf16.msra.mxu0 %v9173_v17  ;;  %3299 = vmatpush1.bf16.msra.mxu1 %v9174_v22  ;;  %v9184_v17 = vld [vmem:[#allocation52_spill] sm:$0xff]  ;;  %v9185_v22 = vld [vmem:[#allocation53_spill] sm:$0xff] }
 0x411   : > { %3257 = vmatprep.subr.bf16.mxu0 %v9175_v14  ;;  %3300 = vmatprep.subr.bf16.mxu1 %v9176_v15  ;;  %v9186_v14 = vld [vmem:[#allocation54_spill] sm:$0xff]  ;;  %v9187_v15 = vld [vmem:[#allocation55_spill] sm:$0xff] }
 0x414   : > { %3258 = vmatpush1.bf16.msra.mxu0 %v9177_v5  ;;  %3301 = vmatpush1.bf16.msra.mxu1 %v9178_v40  ;;  %v9188_v5 = vld [vmem:[#allocation56_spill] sm:$0xff]  ;;  %v9189_v40 = vld [vmem:[#allocation57_spill] sm:$0xff] }
 0x415   : > { %3259 = vmatprep.subr.bf16.mxu0 %v9179_v1  ;;  %3302 = vmatprep.subr.bf16.mxu1 %v9180_v53  ;;  %v9190_v1 = vld [vmem:[#allocation58_spill] sm:$0xff]  ;;  %v9191_v53 = vld [vmem:[#allocation59_spill] sm:$0xff] }
 0x418   : > { %3260 = vmatpush1.bf16.msra.mxu0 %v9181_v7  ;;  %3303 = vmatpush1.bf16.msra.mxu1 %v9182_v19  ;;  %v9192_v7 = vld [vmem:[#allocation60_spill] sm:$0xff]  ;;  %v9193_v19 = vld [vmem:[#allocation61_spill] sm:$0xff] }
 0x419   : > { %3261 = vmatprep.subr.bf16.mxu0 %v9183_v9  ;;  %3304 = vmatprep.subr.bf16.mxu1 %v9184_v17  ;;  %v9194_v9 = vld [vmem:[#allocation62_spill] sm:$0xff]  ;;  %v9195_v17 = vld [vmem:[#allocation63_spill] sm:$0xff] }
 0x41c   : > { %3262 = vmatpush1.bf16.msra.mxu0 %v9185_v22  ;;  %3305 = vmatpush1.bf16.msra.mxu1 %v9186_v14  ;;  %v9196_v22 = vld [vmem:[#allocation64_spill] sm:$0xff]  ;;  %v9197_v14 = vld [vmem:[#allocation65_spill] sm:$0xff] }
 0x41d   : > { %3263 = vmatprep.subr.bf16.mxu0 %v9187_v15  ;;  %3306 = vmatprep.subr.bf16.mxu1 %v9188_v5  ;;  %v9198_v15 = vld [vmem:[#allocation66_spill] sm:$0xff]  ;;  %v9199_v5 = vld [vmem:[#allocation67_spill] sm:$0xff] }
 0x420   : > { %3264 = vmatpush1.bf16.msra.mxu0 %v9189_v40  ;;  %3307 = vmatpush1.bf16.msra.mxu1 %v9190_v1  ;;  %v9200_v40 = vld [vmem:[#allocation68_spill] sm:$0xff]  ;;  %v9201_v1 = vld [vmem:[#allocation69_spill] sm:$0xff] }
 0x421   : > { %3265 = vmatprep.subr.bf16.mxu0 %v9191_v53  ;;  %3308 = vmatprep.subr.bf16.mxu1 %v9192_v7  ;;  %v9202_v53 = vld [vmem:[#allocation70_spill] sm:$0xff]  ;;  %v9203_v7 = vld [vmem:[#allocation71_spill] sm:$0xff] }
 0x424   : > { %3266 = vmatpush1.bf16.msra.mxu0 %v9193_v19  ;;  %3309 = vmatpush1.bf16.msra.mxu1 %v9194_v9  ;;  %v9204_v19 = vld [vmem:[#allocation72_spill] sm:$0xff]  ;;  %v9205_v9 = vld [vmem:[#allocation73_spill] sm:$0xff] }
 0x425   : > { %3267 = vmatprep.subr.bf16.mxu0 %v9195_v17  ;;  %3310 = vmatprep.subr.bf16.mxu1 %v9196_v22  ;;  %v9206_v17 = vld [vmem:[#allocation74_spill] sm:$0xff]  ;;  %v9207_v22 = vld [vmem:[#allocation75_spill] sm:$0xff] }
 0x428   : > { %3268 = vmatpush1.bf16.msra.mxu0 %v9197_v14  ;;  %3311 = vmatpush1.bf16.msra.mxu1 %v9198_v15  ;;  %v9208_v14 = vld [vmem:[#allocation76_spill] sm:$0xff]  ;;  %v9209_v15 = vld [vmem:[#allocation77_spill] sm:$0xff] }
 0x429   : > { %3269 = vmatprep.subr.bf16.mxu0 %v9199_v5  ;;  %3312 = vmatprep.subr.bf16.mxu1 %v9200_v40  ;;  %v9210_v5 = vld [vmem:[#allocation78_spill] sm:$0xff]  ;;  %v9211_v40 = vld [vmem:[#allocation79_spill] sm:$0xff] }
 0x42c   : > { %3270 = vmatpush1.bf16.msra.mxu0 %v9201_v1  ;;  %3313 = vmatpush1.bf16.msra.mxu1 %v9202_v53  ;;  %v9212_v1 = vld [vmem:[#allocation80_spill] sm:$0xff]  ;;  %v9213_v53 = vld [vmem:[#allocation81_spill] sm:$0xff] }
 0x42d   : > { %3271 = vmatprep.subr.bf16.mxu0 %v9203_v7  ;;  %3314 = vmatprep.subr.bf16.mxu1 %v9204_v19  ;;  %v9214_v7 = vld [vmem:[#allocation82_spill] sm:$0xff]  ;;  %v9215_v19 = vld [vmem:[#allocation83_spill] sm:$0xff] }
 0x430   : > { %3272 = vmatpush1.bf16.msra.mxu0 %v9205_v9  ;;  %3315 = vmatpush1.bf16.msra.mxu1 %v9206_v17  ;;  %v9216_v9 = vld [vmem:[#allocation84_spill] sm:$0xff]  ;;  %v9217_v17 = vld [vmem:[#allocation85_spill] sm:$0xff] }
 0x431   : > { %3273 = vmatprep.subr.bf16.mxu0 %v9207_v22  ;;  %3316 = vmatprep.subr.bf16.mxu1 %v9208_v14  ;;  %v9218_v22 = vld [vmem:[#allocation86_spill] sm:$0xff]  ;;  %v9219_v14 = vld [vmem:[#allocation87_spill] sm:$0xff] }
 0x434   : > { %3274 = vmatpush1.bf16.msra.mxu0 %v9209_v15  ;;  %3317 = vmatpush1.bf16.msra.mxu1 %v9210_v5  ;;  %v9220_v15 = vld [vmem:[#allocation88_spill] sm:$0xff] }
 0x435   : > { %3275 = vmatprep.subr.bf16.mxu0 %v9211_v40  ;;  %3318 = vmatprep.subr.bf16.mxu1 %v9212_v1 }
 0x438   : > { %3276 = vmatpush1.bf16.msra.mxu0 %v9213_v53  ;;  %3319 = vmatpush1.bf16.msra.mxu1 %v9214_v7 }
 0x439   : > { %3277 = vmatprep.subr.bf16.mxu0 %v9215_v19  ;;  %3320 = vmatprep.subr.bf16.mxu1 %v9216_v9 }
 0x43c   : > { %3278 = vmatpush1.bf16.msra.mxu0 %v9217_v17  ;;  %3321 = vmatpush1.bf16.msra.mxu1 %v9218_v22 }
 0x43d   : > { %3333 = vmatprep.subr.bf16.mxu0 %v9219_v14  ;;  %3376 = vmatprep.subr.bf16.mxu1 %v9220_v15 }
 0x492   : > { %v2978_v5 = vpop.f32.mrb[8].mxu0  ;;  %v3021_v40 = vpop.f32.mrb[8].mxu1 }
 0x493   : > { %v2980_v63 = vpop.f32.mrb[9].mxu0  ;;  %v3023_v1 = vpop.f32.mrb[9].mxu1  ;;  %v5432_v19 = vadd.f32 %v2978_v5, %v9221_v52  ;;  %v5464_v9 = vadd.f32 %v3021_v40, %v9222_v47 }
 0x494   : > { %v2982_v36 = vpop.f32.mrb[10].mxu0  ;;  %v3025_v53 = vpop.f32.mrb[10].mxu1  ;;  %v5433_v17 = vadd.f32 %v2980_v63, %v9223_v18  ;;  %v5465_v22 = vadd.f32 %v3023_v1, %v9224_v8 }
 0x495   : > { %v2984_v20 = vpop.f32.mrb[11].mxu0  ;;  %v3027_v7 = vpop.f32.mrb[11].mxu1  ;;  %v5304_v4 = vmul.f32 -1.442695, %v5432_v19  ;;  %v5434_v14 = vadd.f32 %v2982_v36, %v9221_v52  ;;  %v5306_v15 = vmul.f32 -1.442695, %v5464_v9  ;;  %v5466_v38 = vadd.f32 %v3025_v53, %v9222_v47 }
 0x496   : > { %v5305_v45 = vmul.f32 -1.442695, %v5433_v17  ;;  %v5435_v60 = vadd.f32 %v2984_v20, %v9223_v18  ;;  %v5307_v42 = vmul.f32 -1.442695, %v5465_v22  ;;  %v5467_v16 = vadd.f32 %v3027_v7, %v9224_v8 }
 0x497   : > { %5934 = vpow2.f32 %v5304_v4  ;;  %v5310_v5 = vmul.f32 -1.442695, %v5434_v14  ;;  %v5312_v40 = vmul.f32 -1.442695, %v5466_v38 }
 0x498   : > { %5936 = vpow2.f32 %v5306_v15  ;;  %v5311_v63 = vmul.f32 -1.442695, %v5435_v60  ;;  %v5313_v1 = vmul.f32 -1.442695, %v5467_v16 }
 0x499   : > { %5938 = vpow2.f32 %v5305_v45 }
 0x49a   : > { %5940 = vpow2.f32 %v5307_v42 }
 0x49b   : > { %5942 = vpow2.f32 %v5310_v5 }
 0x49c   : > { %5944 = vpow2.f32 %v5312_v40 }
 0x49d   : > { %5946 = vpow2.f32 %v5311_v63  ;;  %v9225_v63 = vld [vmem:[#allocation155_spill] sm:$0xff] }
 0x49e   : > { %5948 = vpow2.f32 %v5313_v1 }
 0x4a1   : > { %v5935_v36 = vpop.eup %5934 }
 0x4a2   : > { %v5937_v53 = vpop.eup %5936  ;;  %v3168_v9 = vadd.f32 1.0, %v5935_v36  ;;  %v9226_v36 = vld [vmem:[#allocation156_spill] sm:$0xff] }
 0x4a3   : > { %v5939_v17 = vpop.eup %5938  ;;  %v3170_v20 = vadd.f32 1.0, %v5937_v53 }
 0x4a4   : > { %v5941_v19 = vpop.eup %5940  ;;  %v3169_v4 = vadd.f32 1.0, %v5939_v17  ;;  %5950 = vrcp.f32 %v3168_v9  ;;  %v9227_v9 = vld [vmem:[#allocation157_spill] sm:$0xff] }
 0x4a5   : > { %v5943_v22 = vpop.eup %5942  ;;  %v3171_v15 = vadd.f32 1.0, %v5941_v19  ;;  %5952 = vrcp.f32 %v3170_v20  ;;  %v9228_v20 = vld [vmem:[#allocation158_spill] sm:$0xff] }
 0x4a6   : > { %v5945_v7 = vpop.eup %5944  ;;  %v3174_v60 = vadd.f32 1.0, %v5943_v22  ;;  %5954 = vrcp.f32 %v3169_v4 }
 0x4a7   : > { %v5947_v14 = vpop.eup %5946  ;;  %v3176_v42 = vadd.f32 1.0, %v5945_v7  ;;  %5956 = vrcp.f32 %v3171_v15 }
 0x4a8   : > { %v5949_v38 = vpop.eup %5948  ;;  %v3175_v45 = vadd.f32 1.0, %v5947_v14  ;;  %5958 = vrcp.f32 %v3174_v60 }
 0x4a9   : > { %v3177_v16 = vadd.f32 1.0, %v5949_v38  ;;  %5960 = vrcp.f32 %v3176_v42 }
 0x4aa   : > { %5962 = vrcp.f32 %v3175_v45 }
 0x4ab   : > { %5964 = vrcp.f32 %v3177_v16 }
 0x4ae   : > { %v5951_v8 = vpop.eup %5950 }
 0x4d2   : > { %v3064_v5 = vpop.f32.mrb[40].mxu0  ;;  %v3107_v40 = vpop.f32.mrb[40].mxu1 }
 0x4d3   : > { %v5496_v1 = vadd.f32 %v3064_v5, %v9225_v63  ;;  %v5528_v53 = vadd.f32 %v3107_v40, %v9226_v36  ;;  %v3066_v17 = vpop.f32.mrb[41].mxu0  ;;  %v3109_v19 = vpop.f32.mrb[41].mxu1 }
 0x4d4   : > { %v5497_v22 = vadd.f32 %v3066_v17, %v9227_v9  ;;  %v5529_v7 = vadd.f32 %v3109_v19, %v9228_v20  ;;  %v3068_v4 = vpop.f32.mrb[42].mxu0  ;;  %v3111_v14 = vpop.f32.mrb[42].mxu1 }
 0x4d5   : > { %v5308_v15 = vmul.f32 -1.442695, %v5496_v1  ;;  %5966 = vtanh.f32 %v5528_v53  ;;  %v5498_v38 = vadd.f32 %v3068_v4, %v9225_v63  ;;  %v3070_v60 = vpop.f32.mrb[43].mxu0  ;;  %v3113_v42 = vpop.f32.mrb[43].mxu1  ;;  %v5530_v5 = vadd.f32 %v3111_v14, %v9226_v36 }
 0x4d6   : > { %v5309_v45 = vmul.f32 -1.442695, %v5497_v22  ;;  %5968 = vtanh.f32 %v5529_v7  ;;  %v5499_v40 = vadd.f32 %v3070_v60, %v9227_v9  ;;  %v5953_v17 = vpop.eup %5952  ;;  %v5531_v18 = vadd.f32 %v3113_v42, %v9228_v20 }
 0x4d7   : > { %5970 = vpow2.f32 %v5308_v15  ;;  %v5314_v16 = vmul.f32 -1.442695, %v5498_v38  ;;  %v5955_v1 = vpop.eup %5954  ;;  %v3208_v15 = vmul.f32 %v5953_v17, %v7520_v32 }
 0x4d8   : > { %5972 = vpow2.f32 %v5309_v45  ;;  %v5315_v19 = vmul.f32 -1.442695, %v5499_v40  ;;  %v5957_v53 = vpop.eup %5956 }
 0x4d9   : > { %5974 = vpow2.f32 %v5314_v16  ;;  %v5959_v4 = vpop.eup %5958  ;;  %v3209_v45 = vmul.f32 %v5957_v53, %v7522_v55 }
 0x4da   : > { %5976 = vtanh.f32 %v5530_v5  ;;  %v5961_v22 = vpop.eup %5960 }
 0x4db   : > { %5978 = vpow2.f32 %v5315_v19  ;;  %v5963_v7 = vpop.eup %5962  ;;  %v3210_v23 = vmul.f32 %v5961_v22, %v7528_v41 }
 0x4dc   : > { %5980 = vtanh.f32 %v5531_v18  ;;  %v5965_v14 = vpop.eup %5964 }
 0x4df   : > { %v5967_v36 = vpop.eup %5966 }
 0x4e0   : > { %v5969_v60 = vpop.eup %5968  ;;  %v3212_v38 = vmul.f32 %v5967_v36, %v5951_v8  ;;  %v3211_v36 = vmul.f32 %v5965_v14, %v7531_v10 }
 0x4e1   : > { %v5971_v9 = vpop.eup %5970  ;;  %v3213_v40 = vmul.f32 %v5969_v60, %v5955_v1 }
 0x4e2   : > { %v5973_v42 = vpop.eup %5972  ;;  %v3172_v20 = vadd.f32 1.0, %v5971_v9  ;;  %v7686_v16 = vadd.f32 %v3212_v38, %v3208_v15  ;;  %v9229_v38 = vld [vmem:[#allocation111_spill] sm:$0xff] }
 0x4e3   : > { %v5975_v5 = vpop.eup %5974  ;;  %v3173_v63 = vadd.f32 1.0, %v5973_v42  ;;  %v7688_v19 = vadd.f32 %v3213_v40, %v3209_v45  ;;  %v9230_v45 = vld [vmem:[#allocation112_spill] sm:$0xff]  ;;  %v9231_v40 = vld [vmem:[#allocation113_spill] sm:$0xff]  ;;  %v9232_v42 = vld [vmem:[#allocation114_spill] sm:$0xff] }
 0x4e4   : > { %v5977_v18 = vpop.eup %5976  ;;  %5982 = vrcp.f32 %v3172_v20  ;;  %v3178_v47 = vadd.f32 1.0, %v5975_v5  ;;  %v9233_v5 = vld [vmem:[#allocation118_spill] sm:$0xff] }
 0x4e5   : > { %v5979_v52 = vpop.eup %5978  ;;  %5984 = vtanh.f32 %v7686_v16  ;;  %v3214_v8 = vmul.f32 %v5977_v18, %v5959_v4  ;;  %v9234_v18 = vld [vmem:[#allocation129_spill] sm:$0xff] }
 0x4e6   : > { %v5981_v32 = vpop.eup %5980  ;;  %5986 = vrcp.f32 %v3173_v63  ;;  %v3179_v55 = vadd.f32 1.0, %v5979_v52 }
 0x4e7   : > { %5988 = vtanh.f32 %v7688_v19  ;;  %v7694_v9 = vadd.f32 %v3214_v8, %v3210_v23  ;;  %v3215_v17 = vmul.f32 %v5981_v32, %v5963_v7  ;;  %v9235_v8 = vld [vmem:[#allocation130_spill] sm:$0xff]  ;;  %v9236_v32 = vld [vmem:[#allocation131_spill] sm:$0xff] }
 0x4e8   : > { %5990 = vrcp.f32 %v3178_v47 }
 0x4e9   : > { %5992 = vtanh.f32 %v7694_v9  ;;  %v7697_v20 = vadd.f32 %v3215_v17, %v3211_v36  ;;  %v9238_v36 = vld [vmem:[#allocation133_spill] sm:$0xff]  ;;  %v9239_v17 = vld [vmem:[#allocation134_spill] sm:$0xff] }
 0x4ea   : > { %5994 = vrcp.f32 %v3179_v55  ;;  %v9237_v55 = vld [vmem:[#allocation132_spill] sm:$0xff] }
 0x4eb   : > { %5996 = vtanh.f32 %v7697_v20 }
 0x4ee   : > { %v5983_v41 = vpop.eup %5982 }
 0x4ef   : > { %v5985_v1 = vpop.eup %5984 }
 0x4f0   : > { %v5987_v53 = vpop.eup %5986  ;;  %v3224_v22 = vmul.f32 %v5985_v1, %v5983_v41  ;;  %v9240_v41 = vld [vmem:[#allocation135_spill] sm:$0xff]  ;;  %v9241_v1 = vld [vmem:[#allocation136_spill] sm:$0xff] }
 0x4f1   : > { %v5989_v63 = vpop.eup %5988 }
 0x4f2   : > { %v5991_v52 = vpop.eup %5990  ;;  %v3225_v60 = vmul.f32 %v5989_v63, %v5987_v53  ;;  %v9242_v53 = vld [vmem:[#allocation137_spill] sm:$0xff]  ;;  %v9243_v63 = vld [vmem:[#allocation138_spill] sm:$0xff] }
 0x4f3   : > { %v5993_v4 = vpop.eup %5992 }
 0x4f4   : > { %v5995_v10 = vpop.eup %5994  ;;  %v3226_v14 = vmul.f32 %v5993_v4, %v5991_v52  ;;  %v9244_v52 = vld [vmem:[#allocation139_spill] sm:$0xff]  ;;  %v9245_v4 = vld [vmem:[#allocation140_spill] sm:$0xff] }
 0x4f5   : > { %v5997_v23 = vpop.eup %5996 }
 0x4f6   : > { %v3227_v7 = vmul.f32 %v5997_v23, %v5995_v10  ;;  %v7700_v47 = vpack.c.bf16 %v3226_v14, %v3224_v22  ;;  %v9246_v10 = vld [vmem:[#allocation141_spill] sm:$0xff]  ;;  %v9247_v22 = vld [vmem:[#allocation142_spill] sm:$0xff]  ;;  %v9248_v14 = vld [vmem:[#allocation143_spill] sm:$0xff] }
 0x4f7   : > { %v9249_v23 = vld [vmem:[#allocation144_spill] sm:$0xff] }
 0x4f8   : > { %v3246_v15 = vpack.c.bf16 %v3227_v7, %v3225_v60  ;;  %v9250_v60 = vld [vmem:[#allocation145_spill] sm:$0xff]  ;;  %v9251_v7 = vld [vmem:[#allocation146_spill] sm:$0xff] }
 0x4fa   : > { %3279 = vmatprep.mubr.bf16.mxu0 %v3246_v15  ;;  %3322 = vmatprep.mubr.bf16.mxu1 %v3246_v15 }
 0x4fb   : > { %3280 = vmatmul.mubr.bf16.vlgmr.msra.gmra.mrb[12].mxu0 %v7700_v47  ;;  %3323 = vmatmul.mubr.bf16.vlgmr.msra.gmra.mrb[12].mxu1 %v7700_v47 }
 0x4fc   : > { %3334 = vmatpush1.bf16.msra.mxu0 %v9031_v46  ;;  %3377 = vmatpush1.bf16.msra.mxu1 %v9032_v12 }
 0x4fd   : > { %3365 = vmatprep.mubr.bf16.mxu0 %v3246_v15  ;;  %3408 = vmatprep.mubr.bf16.mxu1 %v3246_v15  ;;  %v9252_v15 = vld [vmem:[#allocation147_spill] sm:$0xff] }
 0x4fe   : > { %3335 = vmatprep.subr.bf16.mxu0 %v9033_v54  ;;  %3378 = vmatprep.subr.bf16.mxu1 %v9034_v13 }
 0x500   : > { %3336 = vmatpush1.bf16.msra.mxu0 %v9035_v21  ;;  %3379 = vmatpush1.bf16.msra.mxu1 %v9036_v29 }
 0x501   : > { %3337 = vmatprep.subr.bf16.mxu0 %v9037_v11  ;;  %3380 = vmatprep.subr.bf16.mxu1 %v9038_v30 }
 0x504   : > { %3338 = vmatpush1.bf16.msra.mxu0 %v9039_v37  ;;  %3381 = vmatpush1.bf16.msra.mxu1 %v9128_v33 }
 0x505   : > { %3339 = vmatprep.subr.bf16.mxu0 %v9129_v25  ;;  %3382 = vmatprep.subr.bf16.mxu1 %v9130_v2 }
 0x508   : > { %3340 = vmatpush1.bf16.msra.mxu0 %v9131_v24  ;;  %3383 = vmatpush1.bf16.msra.mxu1 %v9132_v0 }
 0x509   : > { %3341 = vmatprep.subr.bf16.mxu0 %v9133_v39  ;;  %3384 = vmatprep.subr.bf16.mxu1 %v9134_v35 }
 0x50c   : > { %3342 = vmatpush1.bf16.msra.mxu0 %v9135_v44  ;;  %3385 = vmatpush1.bf16.msra.mxu1 %v9136_v6 }
 0x50d   : > { %3343 = vmatprep.subr.bf16.mxu0 %v9137_v43  ;;  %3386 = vmatprep.subr.bf16.mxu1 %v9138_v51 }
 0x510   : > { %3344 = vmatpush1.bf16.msra.mxu0 %v9139_v61  ;;  %3387 = vmatpush1.bf16.msra.mxu1 %v9140_v3 }
 0x511   : > { %3345 = vmatprep.subr.bf16.mxu0 %v9229_v38  ;;  %3388 = vmatprep.subr.bf16.mxu1 %v9230_v45 }
 0x514   : > { %3346 = vmatpush1.bf16.msra.mxu0 %v9231_v40  ;;  %3389 = vmatpush1.bf16.msra.mxu1 %v9232_v42 }
 0x515   : > { %3347 = vmatprep.subr.bf16.mxu0 %v9145_v28  ;;  %3390 = vmatprep.subr.bf16.mxu1 %v9146_v56 }
 0x518   : > { %3348 = vmatpush1.bf16.msra.mxu0 %v9147_v57  ;;  %3391 = vmatpush1.bf16.msra.mxu1 %v9233_v5 }
 0x519   : > { %3349 = vmatprep.subr.bf16.mxu0 %v9149_v27  ;;  %3392 = vmatprep.subr.bf16.mxu1 %v9150_v49 }
 0x51c   : > { %3350 = vmatpush1.bf16.msra.mxu0 %v9151_v58  ;;  %3393 = vmatpush1.bf16.msra.mxu1 %v9152_v50 }
 0x51d   : > { %3351 = vmatprep.subr.bf16.mxu0 %v9153_v48  ;;  %3394 = vmatprep.subr.bf16.mxu1 %v9154_v62 }
 0x520   : > { %3352 = vmatpush1.bf16.msra.mxu0 %v9155_v34  ;;  %3395 = vmatpush1.bf16.msra.mxu1 %v9068_v31 }
 0x521   : > { %3353 = vmatprep.subr.bf16.mxu0 %v9069_v26  ;;  %3396 = vmatprep.subr.bf16.mxu1 %v9070_v59 }
 0x524   : > { %3354 = vmatpush1.bf16.msra.mxu0 %v9234_v18  ;;  %3397 = vmatpush1.bf16.msra.mxu1 %v9235_v8 }
 0x525   : > { %3355 = vmatprep.subr.bf16.mxu0 %v9236_v32  ;;  %3398 = vmatprep.subr.bf16.mxu1 %v9237_v55  ;;  %v9324_v55 = vld [vmem:[#allocation153_spill] sm:$0xff]  ;;  %v9325_v32 = vld [vmem:[#allocation154_spill] sm:$0xff] }
 0x528   : > { %3356 = vmatpush1.bf16.msra.mxu0 %v9238_v36  ;;  %3399 = vmatpush1.bf16.msra.mxu1 %v9239_v17  ;;  %v9322_v17 = vld [vmem:[#allocation151_spill] sm:$0xff]  ;;  %v9323_v36 = vld [vmem:[#allocation152_spill] sm:$0xff] }
 0x529   : > { %3357 = vmatprep.subr.bf16.mxu0 %v9240_v41  ;;  %3400 = vmatprep.subr.bf16.mxu1 %v9241_v1 }
 0x52c   : > { %3358 = vmatpush1.bf16.msra.mxu0 %v9242_v53  ;;  %3401 = vmatpush1.bf16.msra.mxu1 %v9243_v63  ;;  %v9253_v53 = vld [vmem:[#allocation148_spill] sm:$0xff]  ;;  %v9254_v63 = vld [vmem:[#allocation149_spill] sm:$0xff] }
 0x52d   : > { %3359 = vmatprep.subr.bf16.mxu0 %v9244_v52  ;;  %3402 = vmatprep.subr.bf16.mxu1 %v9245_v4  ;;  %v9255_v52 = vld [vmem:[#allocation150_spill] sm:$0xff]  ;;  %v9256_v4 = vld [vmem:[#allocation23_spill] sm:$0xff] }
 0x530   : > { %3360 = vmatpush1.bf16.msra.mxu0 %v9246_v10  ;;  %3403 = vmatpush1.bf16.msra.mxu1 %v9247_v22  ;;  %v9257_v10 = vld [vmem:[#allocation24_spill] sm:$0xff] }
 0x531   : > { %3361 = vmatprep.subr.bf16.mxu0 %v9248_v14  ;;  %3404 = vmatprep.subr.bf16.mxu1 %v9249_v23  ;;  %v9258_v23 = vld [vmem:[#allocation25_spill] sm:$0xff]  ;;  %v9267_v14 = vld [vmem:[#allocation34_spill] sm:$0xff] }
 0x534   : > { %3362 = vmatpush1.bf16.msra.mxu0 %v9250_v60  ;;  %3405 = vmatpush1.bf16.msra.mxu1 %v9251_v7  ;;  %v9259_v60 = vld [vmem:[#allocation26_spill] sm:$0xff]  ;;  %v9260_v7 = vld [vmem:[#allocation27_spill] sm:$0xff] }
 0x535   : > { %3363 = vmatprep.subr.bf16.mxu0 %v9252_v15  ;;  %3406 = vmatprep.subr.bf16.mxu1 %v9253_v53  ;;  %v9261_v15 = vld [vmem:[#allocation28_spill] sm:$0xff]  ;;  %v9262_v53 = vld [vmem:[#allocation29_spill] sm:$0xff] }
 0x538   : > { %3364 = vmatpush1.bf16.msra.mxu0 %v9254_v63  ;;  %3407 = vmatpush1.bf16.msra.mxu1 %v9255_v52  ;;  %v9263_v63 = vld [vmem:[#allocation30_spill] sm:$0xff]  ;;  %v9264_v52 = vld [vmem:[#allocation31_spill] sm:$0xff] }
 0x539   : > { %3550 = vmatprep.subr.bf16.mxu0 %v9256_v4  ;;  %3593 = vmatprep.subr.bf16.mxu1 %v9257_v10  ;;  %v9265_v4 = vld [vmem:[#allocation32_spill] sm:$0xff]  ;;  %v9266_v10 = vld [vmem:[#allocation33_spill] sm:$0xff] }
 0x53b   : > { %3366 = vmatmul.mubr.bf16.vlgmr.msra.gmra.mrb[44].mxu0 %v7700_v47  ;;  %3409 = vmatmul.mubr.bf16.vlgmr.msra.gmra.mrb[44].mxu1 %v7700_v47  ;;  %v9268_v47 = vld [vmem:[#allocation35_spill] sm:$0xff] }
 0x53c   : > { %3551 = vmatpush1.bf16.msra.mxu0 %v9258_v23  ;;  %3594 = vmatpush1.bf16.msra.mxu1 %v9259_v60  ;;  %v9269_v23 = vld [vmem:[#allocation36_spill] sm:$0xff]  ;;  %v9270_v60 = vld [vmem:[#allocation37_spill] sm:$0xff] }
 0x53d   : > { %3552 = vmatprep.subr.bf16.mxu0 %v9260_v7  ;;  %3595 = vmatprep.subr.bf16.mxu1 %v9261_v15  ;;  %v9271_v7 = vld [vmem:[#allocation38_spill] sm:$0xff]  ;;  %v9272_v15 = vld [vmem:[#allocation39_spill] sm:$0xff] }
 0x540   : > { %3553 = vmatpush1.bf16.msra.mxu0 %v9262_v53  ;;  %3596 = vmatpush1.bf16.msra.mxu1 %v9263_v63  ;;  %v9273_v53 = vld [vmem:[#allocation40_spill] sm:$0xff]  ;;  %v9274_v63 = vld [vmem:[#allocation41_spill] sm:$0xff] }
 0x541   : > { %3554 = vmatprep.subr.bf16.mxu0 %v9264_v52  ;;  %3597 = vmatprep.subr.bf16.mxu1 %v9265_v4  ;;  %v9275_v52 = vld [vmem:[#allocation42_spill] sm:$0xff]  ;;  %v9276_v4 = vld [vmem:[#allocation43_spill] sm:$0xff] }
 0x544   : > { %3555 = vmatpush1.bf16.msra.mxu0 %v9266_v10  ;;  %3598 = vmatpush1.bf16.msra.mxu1 %v9267_v14  ;;  %v9277_v10 = vld [vmem:[#allocation44_spill] sm:$0xff]  ;;  %v9278_v14 = vld [vmem:[#allocation45_spill] sm:$0xff] }
 0x545   : > { %3556 = vmatprep.subr.bf16.mxu0 %v9268_v47  ;;  %3599 = vmatprep.subr.bf16.mxu1 %v9269_v23  ;;  %v9279_v47 = vld [vmem:[#allocation46_spill] sm:$0xff]  ;;  %v9280_v23 = vld [vmem:[#allocation47_spill] sm:$0xff] }
 0x548   : > { %3557 = vmatpush1.bf16.msra.mxu0 %v9270_v60  ;;  %3600 = vmatpush1.bf16.msra.mxu1 %v9271_v7  ;;  %v9281_v60 = vld [vmem:[#allocation48_spill] sm:$0xff]  ;;  %v9282_v7 = vld [vmem:[#allocation49_spill] sm:$0xff] }
 0x549   : > { %3558 = vmatprep.subr.bf16.mxu0 %v9272_v15  ;;  %3601 = vmatprep.subr.bf16.mxu1 %v9273_v53  ;;  %v9283_v15 = vld [vmem:[#allocation50_spill] sm:$0xff]  ;;  %v9284_v53 = vld [vmem:[#allocation51_spill] sm:$0xff] }
 0x54c   : > { %3559 = vmatpush1.bf16.msra.mxu0 %v9274_v63  ;;  %3602 = vmatpush1.bf16.msra.mxu1 %v9275_v52  ;;  %v9285_v63 = vld [vmem:[#allocation52_spill] sm:$0xff]  ;;  %v9286_v52 = vld [vmem:[#allocation53_spill] sm:$0xff] }
 0x54d   : > { %3560 = vmatprep.subr.bf16.mxu0 %v9276_v4  ;;  %3603 = vmatprep.subr.bf16.mxu1 %v9277_v10  ;;  %v9287_v4 = vld [vmem:[#allocation54_spill] sm:$0xff]  ;;  %v9288_v10 = vld [vmem:[#allocation55_spill] sm:$0xff] }
 0x550   : > { %3561 = vmatpush1.bf16.msra.mxu0 %v9278_v14  ;;  %3604 = vmatpush1.bf16.msra.mxu1 %v9279_v47  ;;  %v9289_v14 = vld [vmem:[#allocation56_spill] sm:$0xff]  ;;  %v9290_v47 = vld [vmem:[#allocation57_spill] sm:$0xff] }
 0x551   : > { %3562 = vmatprep.subr.bf16.mxu0 %v9280_v23  ;;  %3605 = vmatprep.subr.bf16.mxu1 %v9281_v60  ;;  %v9291_v23 = vld [vmem:[#allocation58_spill] sm:$0xff]  ;;  %v9292_v60 = vld [vmem:[#allocation59_spill] sm:$0xff] }
 0x554   : > { %3563 = vmatpush1.bf16.msra.mxu0 %v9282_v7  ;;  %3606 = vmatpush1.bf16.msra.mxu1 %v9283_v15  ;;  %v9293_v7 = vld [vmem:[#allocation60_spill] sm:$0xff]  ;;  %v9294_v15 = vld [vmem:[#allocation61_spill] sm:$0xff] }
 0x555   : > { %3564 = vmatprep.subr.bf16.mxu0 %v9284_v53  ;;  %3607 = vmatprep.subr.bf16.mxu1 %v9285_v63  ;;  %v9295_v53 = vld [vmem:[#allocation62_spill] sm:$0xff]  ;;  %v9296_v63 = vld [vmem:[#allocation63_spill] sm:$0xff] }
 0x558   : > { %3565 = vmatpush1.bf16.msra.mxu0 %v9286_v52  ;;  %3608 = vmatpush1.bf16.msra.mxu1 %v9287_v4  ;;  %v9297_v52 = vld [vmem:[#allocation64_spill] sm:$0xff]  ;;  %v9298_v4 = vld [vmem:[#allocation65_spill] sm:$0xff] }
 0x559   : > { %3566 = vmatprep.subr.bf16.mxu0 %v9288_v10  ;;  %3609 = vmatprep.subr.bf16.mxu1 %v9289_v14  ;;  %v9299_v10 = vld [vmem:[#allocation66_spill] sm:$0xff]  ;;  %v9300_v14 = vld [vmem:[#allocation67_spill] sm:$0xff] }
 0x55c   : > { %3567 = vmatpush1.bf16.msra.mxu0 %v9290_v47  ;;  %3610 = vmatpush1.bf16.msra.mxu1 %v9291_v23  ;;  %v9301_v47 = vld [vmem:[#allocation68_spill] sm:$0xff]  ;;  %v9302_v23 = vld [vmem:[#allocation69_spill] sm:$0xff] }
 0x55d   : > { %3568 = vmatprep.subr.bf16.mxu0 %v9292_v60  ;;  %3611 = vmatprep.subr.bf16.mxu1 %v9293_v7  ;;  %v9303_v60 = vld [vmem:[#allocation70_spill] sm:$0xff]  ;;  %v9304_v7 = vld [vmem:[#allocation71_spill] sm:$0xff] }
 0x560   : > { %3569 = vmatpush1.bf16.msra.mxu0 %v9294_v15  ;;  %3612 = vmatpush1.bf16.msra.mxu1 %v9295_v53  ;;  %v9305_v15 = vld [vmem:[#allocation72_spill] sm:$0xff]  ;;  %v9306_v53 = vld [vmem:[#allocation73_spill] sm:$0xff] }
 0x561   : > { %3570 = vmatprep.subr.bf16.mxu0 %v9296_v63  ;;  %3613 = vmatprep.subr.bf16.mxu1 %v9297_v52  ;;  %v9307_v63 = vld [vmem:[#allocation74_spill] sm:$0xff]  ;;  %v9308_v52 = vld [vmem:[#allocation75_spill] sm:$0xff] }
 0x564   : > { %3571 = vmatpush1.bf16.msra.mxu0 %v9298_v4  ;;  %3614 = vmatpush1.bf16.msra.mxu1 %v9299_v10  ;;  %v9309_v4 = vld [vmem:[#allocation76_spill] sm:$0xff]  ;;  %v9310_v10 = vld [vmem:[#allocation77_spill] sm:$0xff] }
 0x565   : > { %3572 = vmatprep.subr.bf16.mxu0 %v9300_v14  ;;  %3615 = vmatprep.subr.bf16.mxu1 %v9301_v47  ;;  %v9311_v14 = vld [vmem:[#allocation78_spill] sm:$0xff]  ;;  %v9312_v47 = vld [vmem:[#allocation79_spill] sm:$0xff] }
 0x568   : > { %3573 = vmatpush1.bf16.msra.mxu0 %v9302_v23  ;;  %3616 = vmatpush1.bf16.msra.mxu1 %v9303_v60  ;;  %v9313_v23 = vld [vmem:[#allocation80_spill] sm:$0xff]  ;;  %v9314_v60 = vld [vmem:[#allocation81_spill] sm:$0xff] }
 0x569   : > { %3574 = vmatprep.subr.bf16.mxu0 %v9304_v7  ;;  %3617 = vmatprep.subr.bf16.mxu1 %v9305_v15  ;;  %v9315_v7 = vld [vmem:[#allocation82_spill] sm:$0xff]  ;;  %v9316_v15 = vld [vmem:[#allocation83_spill] sm:$0xff] }
 0x56c   : > { %3575 = vmatpush1.bf16.msra.mxu0 %v9306_v53  ;;  %3618 = vmatpush1.bf16.msra.mxu1 %v9307_v63  ;;  %v9317_v53 = vld [vmem:[#allocation84_spill] sm:$0xff]  ;;  %v9318_v63 = vld [vmem:[#allocation85_spill] sm:$0xff] }
 0x56d   : > { %3576 = vmatprep.subr.bf16.mxu0 %v9308_v52  ;;  %3619 = vmatprep.subr.bf16.mxu1 %v9309_v4  ;;  %v9319_v52 = vld [vmem:[#allocation86_spill] sm:$0xff]  ;;  %v9320_v4 = vld [vmem:[#allocation87_spill] sm:$0xff] }
 0x570   : > { %3577 = vmatpush1.bf16.msra.mxu0 %v9310_v10  ;;  %3620 = vmatpush1.bf16.msra.mxu1 %v9311_v14  ;;  %v9321_v10 = vld [vmem:[#allocation88_spill] sm:$0xff] }
 0x571   : > { %3578 = vmatprep.subr.bf16.mxu0 %v9312_v47  ;;  %3621 = vmatprep.subr.bf16.mxu1 %v9313_v23 }
 0x574   : > { %3579 = vmatpush1.bf16.msra.mxu0 %v9314_v60  ;;  %3622 = vmatpush1.bf16.msra.mxu1 %v9315_v7 }
 0x575   : > { %3580 = vmatprep.subr.bf16.mxu0 %v9316_v15  ;;  %3623 = vmatprep.subr.bf16.mxu1 %v9317_v53 }
 0x578   : > { %3581 = vmatpush1.bf16.msra.mxu0 %v9318_v63  ;;  %3624 = vmatpush1.bf16.msra.mxu1 %v9319_v52 }
 0x579   : > { %3636 = vmatprep.subr.bf16.mxu0 %v9320_v4  ;;  %3679 = vmatprep.subr.bf16.mxu1 %v9321_v10 }
 0x5ce   : > { %v3281_v14 = vpop.f32.mrb[12].mxu0  ;;  %v3324_v47 = vpop.f32.mrb[12].mxu1 }
 0x5cf   : > { %v3283_v22 = vpop.f32.mrb[13].mxu0  ;;  %v3326_v23 = vpop.f32.mrb[13].mxu1  ;;  %v5436_v15 = vadd.f32 %v3281_v14, %v9322_v17  ;;  %v5468_v53 = vadd.f32 %v3324_v47, %v9323_v36 }
 0x5d0   : > { %v3285_v1 = vpop.f32.mrb[14].mxu0  ;;  %v3328_v60 = vpop.f32.mrb[14].mxu1  ;;  %v5437_v63 = vadd.f32 %v3283_v22, %v9324_v55  ;;  %v5469_v52 = vadd.f32 %v3326_v23, %v9325_v32 }
 0x5d1   : > { %v3287_v41 = vpop.f32.mrb[15].mxu0  ;;  %v3330_v7 = vpop.f32.mrb[15].mxu1  ;;  %v5316_v8 = vmul.f32 -1.442695, %v5436_v15  ;;  %v5438_v4 = vadd.f32 %v3285_v1, %v9322_v17  ;;  %v5318_v10 = vmul.f32 -1.442695, %v5468_v53  ;;  %v5470_v18 = vadd.f32 %v3328_v60, %v9323_v36 }
 0x5d2   : > { %v5317_v59 = vmul.f32 -1.442695, %v5437_v63  ;;  %v5439_v26 = vadd.f32 %v3287_v41, %v9324_v55  ;;  %v5319_v31 = vmul.f32 -1.442695, %v5469_v52  ;;  %v5471_v34 = vadd.f32 %v3330_v7, %v9325_v32 }
 0x5d3   : > { %5998 = vpow2.f32 %v5316_v8  ;;  %v5322_v14 = vmul.f32 -1.442695, %v5438_v4  ;;  %v5324_v47 = vmul.f32 -1.442695, %v5470_v18 }
 0x5d4   : > { %6000 = vpow2.f32 %v5318_v10  ;;  %v5323_v22 = vmul.f32 -1.442695, %v5439_v26  ;;  %v5325_v23 = vmul.f32 -1.442695, %v5471_v34 }
 0x5d5   : > { %6002 = vpow2.f32 %v5317_v59 }
 0x5d6   : > { %6004 = vpow2.f32 %v5319_v31 }
 0x5d7   : > { %6006 = vpow2.f32 %v5322_v14 }
 0x5d8   : > { %6008 = vpow2.f32 %v5324_v47 }
 0x5d9   : > { %6010 = vpow2.f32 %v5323_v22  ;;  %v9326_v22 = vld [vmem:[#allocation155_spill] sm:$0xff] }
 0x5da   : > { %6012 = vpow2.f32 %v5325_v23 }
 0x5dd   : > { %v5999_v1 = vpop.eup %5998 }
 0x5de   : > { %v6001_v53 = vpop.eup %6000  ;;  %v3471_v41 = vadd.f32 1.0, %v5999_v1  ;;  %v9327_v1 = vld [vmem:[#allocation156_spill] sm:$0xff] }
 0x5df   : > { %v6003_v63 = vpop.eup %6002  ;;  %v3473_v15 = vadd.f32 1.0, %v6001_v53 }
 0x5e0   : > { %v6005_v60 = vpop.eup %6004  ;;  %v3472_v8 = vadd.f32 1.0, %v6003_v63  ;;  %6014 = vrcp.f32 %v3471_v41  ;;  %v9328_v41 = vld [vmem:[#allocation157_spill] sm:$0xff] }
 0x5e1   : > { %v6007_v52 = vpop.eup %6006  ;;  %v3474_v10 = vadd.f32 1.0, %v6005_v60  ;;  %6016 = vrcp.f32 %v3473_v15  ;;  %v9329_v15 = vld [vmem:[#allocation158_spill] sm:$0xff] }
 0x5e2   : > { %v6009_v7 = vpop.eup %6008  ;;  %v3477_v26 = vadd.f32 1.0, %v6007_v52  ;;  %6018 = vrcp.f32 %v3472_v8 }
 0x5e3   : > { %v6011_v4 = vpop.eup %6010  ;;  %v3479_v31 = vadd.f32 1.0, %v6009_v7  ;;  %6020 = vrcp.f32 %v3474_v10 }
 0x5e4   : > { %v6013_v18 = vpop.eup %6012  ;;  %v3478_v59 = vadd.f32 1.0, %v6011_v4  ;;  %6022 = vrcp.f32 %v3477_v26 }
 0x5e5   : > { %v3480_v34 = vadd.f32 1.0, %v6013_v18  ;;  %6024 = vrcp.f32 %v3479_v31 }
 0x5e6   : > { %6026 = vrcp.f32 %v3478_v59 }
 0x5e7   : > { %6028 = vrcp.f32 %v3480_v34 }
 0x5ea   : > { %v6015_v32 = vpop.eup %6014 }
 0x60e   : > { %v3367_v14 = vpop.f32.mrb[44].mxu0  ;;  %v3410_v47 = vpop.f32.mrb[44].mxu1 }
 0x60f   : > { %v5500_v23 = vadd.f32 %v3367_v14, %v9326_v22  ;;  %v5532_v53 = vadd.f32 %v3410_v47, %v9327_v1  ;;  %v3369_v63 = vpop.f32.mrb[45].mxu0  ;;  %v3412_v60 = vpop.f32.mrb[45].mxu1 }
 0x610   : > { %v5501_v52 = vadd.f32 %v3369_v63, %v9328_v41  ;;  %v5533_v7 = vadd.f32 %v3412_v60, %v9329_v15  ;;  %v3371_v8 = vpop.f32.mrb[46].mxu0  ;;  %v3414_v4 = vpop.f32.mrb[46].mxu1 }
 0x611   : > { %v5320_v10 = vmul.f32 -1.442695, %v5500_v23  ;;  %6030 = vtanh.f32 %v5532_v53  ;;  %v5502_v18 = vadd.f32 %v3371_v8, %v9326_v22  ;;  %v3373_v26 = vpop.f32.mrb[47].mxu0  ;;  %v3416_v31 = vpop.f32.mrb[47].mxu1  ;;  %v5534_v14 = vadd.f32 %v3414_v4, %v9327_v1 }
 0x612   : > { %v5321_v59 = vmul.f32 -1.442695, %v5501_v52  ;;  %6032 = vtanh.f32 %v5533_v7  ;;  %v5503_v47 = vadd.f32 %v3373_v26, %v9328_v41  ;;  %v6017_v63 = vpop.eup %6016  ;;  %v5535_v55 = vadd.f32 %v3416_v31, %v9329_v15 }
 0x613   : > { %6034 = vpow2.f32 %v5320_v10  ;;  %v5326_v34 = vmul.f32 -1.442695, %v5502_v18  ;;  %v6019_v23 = vpop.eup %6018  ;;  %v3511_v10 = vmul.f32 %v6017_v63, %v7686_v16 }
 0x614   : > { %6036 = vpow2.f32 %v5321_v59  ;;  %v5327_v60 = vmul.f32 -1.442695, %v5503_v47  ;;  %v6021_v53 = vpop.eup %6020 }
 0x615   : > { %6038 = vpow2.f32 %v5326_v34  ;;  %v6023_v8 = vpop.eup %6022  ;;  %v3512_v59 = vmul.f32 %v6021_v53, %v7688_v19 }
 0x616   : > { %6040 = vtanh.f32 %v5534_v14  ;;  %v6025_v52 = vpop.eup %6024 }
 0x617   : > { %6042 = vpow2.f32 %v5327_v60  ;;  %v6027_v7 = vpop.eup %6026  ;;  %v3513_v62 = vmul.f32 %v6025_v52, %v7694_v9 }
 0x618   : > { %6044 = vtanh.f32 %v5535_v55  ;;  %v6029_v4 = vpop.eup %6028 }
 0x61b   : > { %v6031_v1 = vpop.eup %6030 }
 0x61c   : > { %v6033_v26 = vpop.eup %6032  ;;  %v3515_v18 = vmul.f32 %v6031_v1, %v6015_v32  ;;  %v3514_v1 = vmul.f32 %v6029_v4, %v7697_v20 }
 0x61d   : > { %v6035_v41 = vpop.eup %6034  ;;  %v3516_v47 = vmul.f32 %v6033_v26, %v6019_v23 }
 0x61e   : > { %v6037_v31 = vpop.eup %6036  ;;  %v3475_v15 = vadd.f32 1.0, %v6035_v41  ;;  %v7852_v34 = vadd.f32 %v3515_v18, %v3511_v10  ;;  %v9330_v18 = vld [vmem:[#allocation124_spill] sm:$0xff] }
 0x61f   : > { %v6039_v14 = vpop.eup %6038  ;;  %v3476_v22 = vadd.f32 1.0, %v6037_v31  ;;  %v7854_v60 = vadd.f32 %v3516_v47, %v3512_v59  ;;  %v9331_v59 = vld [vmem:[#allocation125_spill] sm:$0xff]  ;;  %v9332_v47 = vld [vmem:[#allocation126_spill] sm:$0xff]  ;;  %v9333_v31 = vld [vmem:[#allocation127_spill] sm:$0xff] }
 0x620   : > { %v6041_v55 = vpop.eup %6040  ;;  %6046 = vrcp.f32 %v3475_v15  ;;  %v3481_v36 = vadd.f32 1.0, %v6039_v14  ;;  %v9334_v14 = vld [vmem:[#allocation128_spill] sm:$0xff] }
 0x621   : > { %v6043_v17 = vpop.eup %6042  ;;  %6048 = vtanh.f32 %v7852_v34  ;;  %v3517_v16 = vmul.f32 %v6041_v55, %v6023_v8  ;;  %v9335_v55 = vld [vmem:[#allocation129_spill] sm:$0xff] }
 0x622   : > { %v6045_v32 = vpop.eup %6044  ;;  %6050 = vrcp.f32 %v3476_v22  ;;  %v3482_v19 = vadd.f32 1.0, %v6043_v17 }
 0x623   : > { %6052 = vtanh.f32 %v7854_v60  ;;  %v7860_v41 = vadd.f32 %v3517_v16, %v3513_v62  ;;  %v3518_v63 = vmul.f32 %v6045_v32, %v6027_v7  ;;  %v9336_v16 = vld [vmem:[#allocation130_spill] sm:$0xff]  ;;  %v9337_v32 = vld [vmem:[#allocation131_spill] sm:$0xff] }
 0x624   : > { %6054 = vrcp.f32 %v3481_v36 }
 0x625   : > { %6056 = vtanh.f32 %v7860_v41  ;;  %v7863_v15 = vadd.f32 %v3518_v63, %v3514_v1  ;;  %v9339_v1 = vld [vmem:[#allocation133_spill] sm:$0xff]  ;;  %v9340_v63 = vld [vmem:[#allocation134_spill] sm:$0xff] }
 0x626   : > { %6058 = vrcp.f32 %v3482_v19  ;;  %v9338_v19 = vld [vmem:[#allocation132_spill] sm:$0xff] }
 0x627   : > { %6060 = vtanh.f32 %v7863_v15 }
 0x62a   : > { %v6047_v9 = vpop.eup %6046 }
 0x62b   : > { %v6049_v23 = vpop.eup %6048 }
 0x62c   : > { %v6051_v53 = vpop.eup %6050  ;;  %v3527_v52 = vmul.f32 %v6049_v23, %v6047_v9  ;;  %v9341_v9 = vld [vmem:[#allocation135_spill] sm:$0xff]  ;;  %v9342_v23 = vld [vmem:[#allocation136_spill] sm:$0xff] }
 0x62d   : > { %v6053_v22 = vpop.eup %6052 }
 0x62e   : > { %v6055_v17 = vpop.eup %6054  ;;  %v3528_v26 = vmul.f32 %v6053_v22, %v6051_v53  ;;  %v9343_v53 = vld [vmem:[#allocation137_spill] sm:$0xff]  ;;  %v9344_v22 = vld [vmem:[#allocation138_spill] sm:$0xff] }
 0x62f   : > { %v6057_v8 = vpop.eup %6056 }
 0x630   : > { %v6059_v20 = vpop.eup %6058  ;;  %v3529_v4 = vmul.f32 %v6057_v8, %v6055_v17  ;;  %v9345_v17 = vld [vmem:[#allocation139_spill] sm:$0xff]  ;;  %v9346_v8 = vld [vmem:[#allocation140_spill] sm:$0xff] }
 0x631   : > { %v6061_v62 = vpop.eup %6060 }
 0x632   : > { %v3530_v7 = vmul.f32 %v6061_v62, %v6059_v20  ;;  %v7866_v36 = vpack.c.bf16 %v3529_v4, %v3527_v52  ;;  %v9347_v20 = vld [vmem:[#allocation141_spill] sm:$0xff]  ;;  %v9348_v52 = vld [vmem:[#allocation142_spill] sm:$0xff]  ;;  %v9349_v4 = vld [vmem:[#allocation143_spill] sm:$0xff] }
 0x633   : > { %v9350_v62 = vld [vmem:[#allocation144_spill] sm:$0xff] }
 0x634   : > { %v3549_v10 = vpack.c.bf16 %v3530_v7, %v3528_v26  ;;  %v9351_v26 = vld [vmem:[#allocation145_spill] sm:$0xff]  ;;  %v9352_v7 = vld [vmem:[#allocation146_spill] sm:$0xff] }
 0x636   : > { %3582 = vmatprep.mubr.bf16.mxu0 %v3549_v10  ;;  %3625 = vmatprep.mubr.bf16.mxu1 %v3549_v10 }
 0x637   : > { %3583 = vmatmul.mubr.bf16.vlgmr.msra.gmra.mrb[16].mxu0 %v7866_v36  ;;  %3626 = vmatmul.mubr.bf16.vlgmr.msra.gmra.mrb[16].mxu1 %v7866_v36 }
 0x638   : > { %3637 = vmatpush1.bf16.msra.mxu0 %v9031_v46  ;;  %3680 = vmatpush1.bf16.msra.mxu1 %v9032_v12 }
 0x639   : > { %3668 = vmatprep.mubr.bf16.mxu0 %v3549_v10  ;;  %3711 = vmatprep.mubr.bf16.mxu1 %v3549_v10  ;;  %v9353_v10 = vld [vmem:[#allocation147_spill] sm:$0xff] }
 0x63a   : > { %3638 = vmatprep.subr.bf16.mxu0 %v9033_v54  ;;  %3681 = vmatprep.subr.bf16.mxu1 %v9034_v13 }
 0x63c   : > { %3639 = vmatpush1.bf16.msra.mxu0 %v9035_v21  ;;  %3682 = vmatpush1.bf16.msra.mxu1 %v9036_v29 }
 0x63d   : > { %3640 = vmatprep.subr.bf16.mxu0 %v9037_v11  ;;  %3683 = vmatprep.subr.bf16.mxu1 %v9038_v30 }
 0x640   : > { %3641 = vmatpush1.bf16.msra.mxu0 %v9039_v37  ;;  %3684 = vmatpush1.bf16.msra.mxu1 %v9128_v33 }
 0x641   : > { %3642 = vmatprep.subr.bf16.mxu0 %v9129_v25  ;;  %3685 = vmatprep.subr.bf16.mxu1 %v9130_v2 }
 0x644   : > { %3643 = vmatpush1.bf16.msra.mxu0 %v9131_v24  ;;  %3686 = vmatpush1.bf16.msra.mxu1 %v9132_v0 }
 0x645   : > { %3644 = vmatprep.subr.bf16.mxu0 %v9133_v39  ;;  %3687 = vmatprep.subr.bf16.mxu1 %v9134_v35 }
 0x648   : > { %3645 = vmatpush1.bf16.msra.mxu0 %v9135_v44  ;;  %3688 = vmatpush1.bf16.msra.mxu1 %v9136_v6 }
 0x649   : > { %3646 = vmatprep.subr.bf16.mxu0 %v9137_v43  ;;  %3689 = vmatprep.subr.bf16.mxu1 %v9138_v51 }
 0x64c   : > { %3647 = vmatpush1.bf16.msra.mxu0 %v9139_v61  ;;  %3690 = vmatpush1.bf16.msra.mxu1 %v9140_v3 }
 0x64d   : > { %3648 = vmatprep.subr.bf16.mxu0 %v9229_v38  ;;  %3691 = vmatprep.subr.bf16.mxu1 %v9230_v45 }
 0x650   : > { %3649 = vmatpush1.bf16.msra.mxu0 %v9231_v40  ;;  %3692 = vmatpush1.bf16.msra.mxu1 %v9232_v42 }
 0x651   : > { %3650 = vmatprep.subr.bf16.mxu0 %v9145_v28  ;;  %3693 = vmatprep.subr.bf16.mxu1 %v9146_v56 }
 0x654   : > { %3651 = vmatpush1.bf16.msra.mxu0 %v9147_v57  ;;  %3694 = vmatpush1.bf16.msra.mxu1 %v9233_v5 }
 0x655   : > { %3652 = vmatprep.subr.bf16.mxu0 %v9149_v27  ;;  %3695 = vmatprep.subr.bf16.mxu1 %v9150_v49 }
 0x658   : > { %3653 = vmatpush1.bf16.msra.mxu0 %v9151_v58  ;;  %3696 = vmatpush1.bf16.msra.mxu1 %v9152_v50 }
 0x659   : > { %3654 = vmatprep.subr.bf16.mxu0 %v9153_v48  ;;  %3697 = vmatprep.subr.bf16.mxu1 %v9330_v18 }
 0x65c   : > { %3655 = vmatpush1.bf16.msra.mxu0 %v9331_v59  ;;  %3698 = vmatpush1.bf16.msra.mxu1 %v9332_v47 }
 0x65d   : > { %3656 = vmatprep.subr.bf16.mxu0 %v9333_v31  ;;  %3699 = vmatprep.subr.bf16.mxu1 %v9334_v14 }
 0x660   : > { %3657 = vmatpush1.bf16.msra.mxu0 %v9335_v55  ;;  %3700 = vmatpush1.bf16.msra.mxu1 %v9336_v16 }
 0x661   : > { %3658 = vmatprep.subr.bf16.mxu0 %v9337_v32  ;;  %3701 = vmatprep.subr.bf16.mxu1 %v9338_v19  ;;  %v9425_v19 = vld [vmem:[#allocation153_spill] sm:$0xff]  ;;  %v9426_v32 = vld [vmem:[#allocation154_spill] sm:$0xff] }
 0x664   : > { %3659 = vmatpush1.bf16.msra.mxu0 %v9339_v1  ;;  %3702 = vmatpush1.bf16.msra.mxu1 %v9340_v63  ;;  %v9423_v63 = vld [vmem:[#allocation151_spill] sm:$0xff]  ;;  %v9424_v1 = vld [vmem:[#allocation152_spill] sm:$0xff] }
 0x665   : > { %3660 = vmatprep.subr.bf16.mxu0 %v9341_v9  ;;  %3703 = vmatprep.subr.bf16.mxu1 %v9342_v23 }
 0x668   : > { %3661 = vmatpush1.bf16.msra.mxu0 %v9343_v53  ;;  %3704 = vmatpush1.bf16.msra.mxu1 %v9344_v22  ;;  %v9354_v53 = vld [vmem:[#allocation148_spill] sm:$0xff]  ;;  %v9355_v22 = vld [vmem:[#allocation149_spill] sm:$0xff] }
 0x669   : > { %3662 = vmatprep.subr.bf16.mxu0 %v9345_v17  ;;  %3705 = vmatprep.subr.bf16.mxu1 %v9346_v8  ;;  %v9356_v17 = vld [vmem:[#allocation150_spill] sm:$0xff]  ;;  %v9357_v8 = vld [vmem:[#allocation23_spill] sm:$0xff] }
 0x66c   : > { %3663 = vmatpush1.bf16.msra.mxu0 %v9347_v20  ;;  %3706 = vmatpush1.bf16.msra.mxu1 %v9348_v52  ;;  %v9358_v20 = vld [vmem:[#allocation24_spill] sm:$0xff] }
 0x66d   : > { %3664 = vmatprep.subr.bf16.mxu0 %v9349_v4  ;;  %3707 = vmatprep.subr.bf16.mxu1 %v9350_v62  ;;  %v9359_v62 = vld [vmem:[#allocation25_spill] sm:$0xff]  ;;  %v9368_v4 = vld [vmem:[#allocation34_spill] sm:$0xff] }
 0x670   : > { %3665 = vmatpush1.bf16.msra.mxu0 %v9351_v26  ;;  %3708 = vmatpush1.bf16.msra.mxu1 %v9352_v7  ;;  %v9360_v26 = vld [vmem:[#allocation26_spill] sm:$0xff]  ;;  %v9361_v7 = vld [vmem:[#allocation27_spill] sm:$0xff] }
 0x671   : > { %3666 = vmatprep.subr.bf16.mxu0 %v9353_v10  ;;  %3709 = vmatprep.subr.bf16.mxu1 %v9354_v53  ;;  %v9362_v10 = vld [vmem:[#allocation28_spill] sm:$0xff]  ;;  %v9363_v53 = vld [vmem:[#allocation29_spill] sm:$0xff] }
 0x674   : > { %3667 = vmatpush1.bf16.msra.mxu0 %v9355_v22  ;;  %3710 = vmatpush1.bf16.msra.mxu1 %v9356_v17  ;;  %v9364_v22 = vld [vmem:[#allocation30_spill] sm:$0xff]  ;;  %v9365_v17 = vld [vmem:[#allocation31_spill] sm:$0xff] }
 0x675   : > { %3853 = vmatprep.subr.bf16.mxu0 %v9357_v8  ;;  %3896 = vmatprep.subr.bf16.mxu1 %v9358_v20  ;;  %v9366_v8 = vld [vmem:[#allocation32_spill] sm:$0xff]  ;;  %v9367_v20 = vld [vmem:[#allocation33_spill] sm:$0xff] }
 0x677   : > { %3669 = vmatmul.mubr.bf16.vlgmr.msra.gmra.mrb[48].mxu0 %v7866_v36  ;;  %3712 = vmatmul.mubr.bf16.vlgmr.msra.gmra.mrb[48].mxu1 %v7866_v36  ;;  %v9369_v36 = vld [vmem:[#allocation35_spill] sm:$0xff] }
 0x678   : > { %3854 = vmatpush1.bf16.msra.mxu0 %v9359_v62  ;;  %3897 = vmatpush1.bf16.msra.mxu1 %v9360_v26  ;;  %v9370_v62 = vld [vmem:[#allocation36_spill] sm:$0xff]  ;;  %v9371_v26 = vld [vmem:[#allocation37_spill] sm:$0xff] }
 0x679   : > { %3855 = vmatprep.subr.bf16.mxu0 %v9361_v7  ;;  %3898 = vmatprep.subr.bf16.mxu1 %v9362_v10  ;;  %v9372_v7 = vld [vmem:[#allocation38_spill] sm:$0xff]  ;;  %v9373_v10 = vld [vmem:[#allocation39_spill] sm:$0xff] }
 0x67c   : > { %3856 = vmatpush1.bf16.msra.mxu0 %v9363_v53  ;;  %3899 = vmatpush1.bf16.msra.mxu1 %v9364_v22  ;;  %v9374_v53 = vld [vmem:[#allocation40_spill] sm:$0xff]  ;;  %v9375_v22 = vld [vmem:[#allocation41_spill] sm:$0xff] }
 0x67d   : > { %3857 = vmatprep.subr.bf16.mxu0 %v9365_v17  ;;  %3900 = vmatprep.subr.bf16.mxu1 %v9366_v8  ;;  %v9376_v17 = vld [vmem:[#allocation42_spill] sm:$0xff]  ;;  %v9377_v8 = vld [vmem:[#allocation43_spill] sm:$0xff] }
 0x680   : > { %3858 = vmatpush1.bf16.msra.mxu0 %v9367_v20  ;;  %3901 = vmatpush1.bf16.msra.mxu1 %v9368_v4  ;;  %v9378_v20 = vld [vmem:[#allocation44_spill] sm:$0xff]  ;;  %v9379_v4 = vld [vmem:[#allocation45_spill] sm:$0xff] }
 0x681   : > { %3859 = vmatprep.subr.bf16.mxu0 %v9369_v36  ;;  %3902 = vmatprep.subr.bf16.mxu1 %v9370_v62  ;;  %v9380_v36 = vld [vmem:[#allocation46_spill] sm:$0xff]  ;;  %v9381_v62 = vld [vmem:[#allocation47_spill] sm:$0xff] }
 0x684   : > { %3860 = vmatpush1.bf16.msra.mxu0 %v9371_v26  ;;  %3903 = vmatpush1.bf16.msra.mxu1 %v9372_v7  ;;  %v9382_v26 = vld [vmem:[#allocation48_spill] sm:$0xff]  ;;  %v9383_v7 = vld [vmem:[#allocation49_spill] sm:$0xff] }
 0x685   : > { %3861 = vmatprep.subr.bf16.mxu0 %v9373_v10  ;;  %3904 = vmatprep.subr.bf16.mxu1 %v9374_v53  ;;  %v9384_v10 = vld [vmem:[#allocation50_spill] sm:$0xff]  ;;  %v9385_v53 = vld [vmem:[#allocation51_spill] sm:$0xff] }
 0x688   : > { %3862 = vmatpush1.bf16.msra.mxu0 %v9375_v22  ;;  %3905 = vmatpush1.bf16.msra.mxu1 %v9376_v17  ;;  %v9386_v22 = vld [vmem:[#allocation52_spill] sm:$0xff]  ;;  %v9387_v17 = vld [vmem:[#allocation53_spill] sm:$0xff] }
 0x689   : > { %3863 = vmatprep.subr.bf16.mxu0 %v9377_v8  ;;  %3906 = vmatprep.subr.bf16.mxu1 %v9378_v20  ;;  %v9388_v8 = vld [vmem:[#allocation54_spill] sm:$0xff]  ;;  %v9389_v20 = vld [vmem:[#allocation55_spill] sm:$0xff] }
 0x68c   : > { %3864 = vmatpush1.bf16.msra.mxu0 %v9379_v4  ;;  %3907 = vmatpush1.bf16.msra.mxu1 %v9380_v36  ;;  %v9390_v4 = vld [vmem:[#allocation56_spill] sm:$0xff]  ;;  %v9391_v36 = vld [vmem:[#allocation57_spill] sm:$0xff] }
 0x68d   : > { %3865 = vmatprep.subr.bf16.mxu0 %v9381_v62  ;;  %3908 = vmatprep.subr.bf16.mxu1 %v9382_v26  ;;  %v9392_v62 = vld [vmem:[#allocation58_spill] sm:$0xff]  ;;  %v9393_v26 = vld [vmem:[#allocation59_spill] sm:$0xff] }
 0x690   : > { %3866 = vmatpush1.bf16.msra.mxu0 %v9383_v7  ;;  %3909 = vmatpush1.bf16.msra.mxu1 %v9384_v10  ;;  %v9394_v7 = vld [vmem:[#allocation60_spill] sm:$0xff]  ;;  %v9395_v10 = vld [vmem:[#allocation61_spill] sm:$0xff] }
 0x691   : > { %3867 = vmatprep.subr.bf16.mxu0 %v9385_v53  ;;  %3910 = vmatprep.subr.bf16.mxu1 %v9386_v22  ;;  %v9396_v53 = vld [vmem:[#allocation62_spill] sm:$0xff]  ;;  %v9397_v22 = vld [vmem:[#allocation63_spill] sm:$0xff] }
 0x694   : > { %3868 = vmatpush1.bf16.msra.mxu0 %v9387_v17  ;;  %3911 = vmatpush1.bf16.msra.mxu1 %v9388_v8  ;;  %v9398_v17 = vld [vmem:[#allocation64_spill] sm:$0xff]  ;;  %v9399_v8 = vld [vmem:[#allocation65_spill] sm:$0xff] }
 0x695   : > { %3869 = vmatprep.subr.bf16.mxu0 %v9389_v20  ;;  %3912 = vmatprep.subr.bf16.mxu1 %v9390_v4  ;;  %v9400_v20 = vld [vmem:[#allocation66_spill] sm:$0xff]  ;;  %v9401_v4 = vld [vmem:[#allocation67_spill] sm:$0xff] }
 0x698   : > { %3870 = vmatpush1.bf16.msra.mxu0 %v9391_v36  ;;  %3913 = vmatpush1.bf16.msra.mxu1 %v9392_v62  ;;  %v9402_v36 = vld [vmem:[#allocation68_spill] sm:$0xff]  ;;  %v9403_v62 = vld [vmem:[#allocation69_spill] sm:$0xff] }
 0x699   : > { %3871 = vmatprep.subr.bf16.mxu0 %v9393_v26  ;;  %3914 = vmatprep.subr.bf16.mxu1 %v9394_v7  ;;  %v9404_v26 = vld [vmem:[#allocation70_spill] sm:$0xff]  ;;  %v9405_v7 = vld [vmem:[#allocation71_spill] sm:$0xff] }
 0x69c   : > { %3872 = vmatpush1.bf16.msra.mxu0 %v9395_v10  ;;  %3915 = vmatpush1.bf16.msra.mxu1 %v9396_v53  ;;  %v9406_v10 = vld [vmem:[#allocation72_spill] sm:$0xff]  ;;  %v9407_v53 = vld [vmem:[#allocation73_spill] sm:$0xff] }
 0x69d   : > { %3873 = vmatprep.subr.bf16.mxu0 %v9397_v22  ;;  %3916 = vmatprep.subr.bf16.mxu1 %v9398_v17  ;;  %v9408_v22 = vld [vmem:[#allocation74_spill] sm:$0xff]  ;;  %v9409_v17 = vld [vmem:[#allocation75_spill] sm:$0xff] }
 0x6a0   : > { %3874 = vmatpush1.bf16.msra.mxu0 %v9399_v8  ;;  %3917 = vmatpush1.bf16.msra.mxu1 %v9400_v20  ;;  %v9410_v8 = vld [vmem:[#allocation76_spill] sm:$0xff]  ;;  %v9411_v20 = vld [vmem:[#allocation77_spill] sm:$0xff] }
 0x6a1   : > { %3875 = vmatprep.subr.bf16.mxu0 %v9401_v4  ;;  %3918 = vmatprep.subr.bf16.mxu1 %v9402_v36  ;;  %v9412_v4 = vld [vmem:[#allocation78_spill] sm:$0xff]  ;;  %v9413_v36 = vld [vmem:[#allocation79_spill] sm:$0xff] }
 0x6a4   : > { %3876 = vmatpush1.bf16.msra.mxu0 %v9403_v62  ;;  %3919 = vmatpush1.bf16.msra.mxu1 %v9404_v26  ;;  %v9414_v62 = vld [vmem:[#allocation80_spill] sm:$0xff]  ;;  %v9415_v26 = vld [vmem:[#allocation81_spill] sm:$0xff] }
 0x6a5   : > { %3877 = vmatprep.subr.bf16.mxu0 %v9405_v7  ;;  %3920 = vmatprep.subr.bf16.mxu1 %v9406_v10  ;;  %v9416_v7 = vld [vmem:[#allocation82_spill] sm:$0xff]  ;;  %v9417_v10 = vld [vmem:[#allocation83_spill] sm:$0xff] }
 0x6a8   : > { %3878 = vmatpush1.bf16.msra.mxu0 %v9407_v53  ;;  %3921 = vmatpush1.bf16.msra.mxu1 %v9408_v22  ;;  %v9418_v53 = vld [vmem:[#allocation84_spill] sm:$0xff]  ;;  %v9419_v22 = vld [vmem:[#allocation85_spill] sm:$0xff] }
 0x6a9   : > { %3879 = vmatprep.subr.bf16.mxu0 %v9409_v17  ;;  %3922 = vmatprep.subr.bf16.mxu1 %v9410_v8  ;;  %v9420_v17 = vld [vmem:[#allocation86_spill] sm:$0xff]  ;;  %v9421_v8 = vld [vmem:[#allocation87_spill] sm:$0xff] }
 0x6ac   : > { %3880 = vmatpush1.bf16.msra.mxu0 %v9411_v20  ;;  %3923 = vmatpush1.bf16.msra.mxu1 %v9412_v4  ;;  %v9422_v20 = vld [vmem:[#allocation88_spill] sm:$0xff] }
 0x6ad   : > { %3881 = vmatprep.subr.bf16.mxu0 %v9413_v36  ;;  %3924 = vmatprep.subr.bf16.mxu1 %v9414_v62 }
 0x6b0   : > { %3882 = vmatpush1.bf16.msra.mxu0 %v9415_v26  ;;  %3925 = vmatpush1.bf16.msra.mxu1 %v9416_v7 }
 0x6b1   : > { %3883 = vmatprep.subr.bf16.mxu0 %v9417_v10  ;;  %3926 = vmatprep.subr.bf16.mxu1 %v9418_v53 }
 0x6b4   : > { %3884 = vmatpush1.bf16.msra.mxu0 %v9419_v22  ;;  %3927 = vmatpush1.bf16.msra.mxu1 %v9420_v17 }
 0x6b5   : > { %3939 = vmatprep.subr.bf16.mxu0 %v9421_v8  ;;  %3982 = vmatprep.subr.bf16.mxu1 %v9422_v20 }
 0x70a   : > { %v3584_v4 = vpop.f32.mrb[16].mxu0  ;;  %v3627_v36 = vpop.f32.mrb[16].mxu1 }
 0x70b   : > { %v3586_v52 = vpop.f32.mrb[17].mxu0  ;;  %v3629_v62 = vpop.f32.mrb[17].mxu1  ;;  %v5440_v10 = vadd.f32 %v3584_v4, %v9423_v63  ;;  %v5472_v53 = vadd.f32 %v3627_v36, %v9424_v1 }
 0x70c   : > { %v3588_v23 = vpop.f32.mrb[18].mxu0  ;;  %v3631_v26 = vpop.f32.mrb[18].mxu1  ;;  %v5441_v22 = vadd.f32 %v3586_v52, %v9425_v19  ;;  %v5473_v17 = vadd.f32 %v3629_v62, %v9426_v32 }
 0x70d   : > { %v3590_v9 = vpop.f32.mrb[19].mxu0  ;;  %v3633_v7 = vpop.f32.mrb[19].mxu1  ;;  %v5328_v16 = vmul.f32 -1.442695, %v5440_v10  ;;  %v5442_v8 = vadd.f32 %v3588_v23, %v9423_v63  ;;  %v5330_v20 = vmul.f32 -1.442695, %v5472_v53  ;;  %v5474_v55 = vadd.f32 %v3631_v26, %v9424_v1 }
 0x70e   : > { %v5329_v14 = vmul.f32 -1.442695, %v5441_v22  ;;  %v5443_v31 = vadd.f32 %v3590_v9, %v9425_v19  ;;  %v5331_v47 = vmul.f32 -1.442695, %v5473_v17  ;;  %v5475_v59 = vadd.f32 %v3633_v7, %v9426_v32 }
 0x70f   : > { %6062 = vpow2.f32 %v5328_v16  ;;  %v5334_v4 = vmul.f32 -1.442695, %v5442_v8  ;;  %v5336_v36 = vmul.f32 -1.442695, %v5474_v55 }
 0x710   : > { %6064 = vpow2.f32 %v5330_v20  ;;  %v5335_v52 = vmul.f32 -1.442695, %v5443_v31  ;;  %v5337_v62 = vmul.f32 -1.442695, %v5475_v59 }
 0x711   : > { %6066 = vpow2.f32 %v5329_v14 }
 0x712   : > { %6068 = vpow2.f32 %v5331_v47 }
 0x713   : > { %6070 = vpow2.f32 %v5334_v4 }
 0x714   : > { %6072 = vpow2.f32 %v5336_v36 }
 0x715   : > { %6074 = vpow2.f32 %v5335_v52  ;;  %v9427_v52 = vld [vmem:[#allocation155_spill] sm:$0xff] }
 0x716   : > { %6076 = vpow2.f32 %v5337_v62 }
 0x719   : > { %v6063_v23 = vpop.eup %6062 }
 0x71a   : > { %v6065_v53 = vpop.eup %6064  ;;  %v3774_v9 = vadd.f32 1.0, %v6063_v23  ;;  %v9428_v23 = vld [vmem:[#allocation156_spill] sm:$0xff] }
 0x71b   : > { %v6067_v22 = vpop.eup %6066  ;;  %v3776_v10 = vadd.f32 1.0, %v6065_v53 }
 0x71c   : > { %v6069_v26 = vpop.eup %6068  ;;  %v3775_v16 = vadd.f32 1.0, %v6067_v22  ;;  %6078 = vrcp.f32 %v3774_v9  ;;  %v9429_v9 = vld [vmem:[#allocation157_spill] sm:$0xff] }
 0x71d   : > { %v6071_v17 = vpop.eup %6070  ;;  %v3777_v20 = vadd.f32 1.0, %v6069_v26  ;;  %6080 = vrcp.f32 %v3776_v10  ;;  %v9430_v10 = vld [vmem:[#allocation158_spill] sm:$0xff] }
 0x71e   : > { %v6073_v7 = vpop.eup %6072  ;;  %v3780_v31 = vadd.f32 1.0, %v6071_v17  ;;  %6082 = vrcp.f32 %v3775_v16 }
 0x71f   : > { %v6075_v8 = vpop.eup %6074  ;;  %v3782_v59 = vadd.f32 1.0, %v6073_v7  ;;  %6084 = vrcp.f32 %v3777_v20 }
 0x720   : > { %v6077_v55 = vpop.eup %6076  ;;  %v3781_v47 = vadd.f32 1.0, %v6075_v8  ;;  %6086 = vrcp.f32 %v3780_v31 }
 0x721   : > { %v3783_v14 = vadd.f32 1.0, %v6077_v55  ;;  %6088 = vrcp.f32 %v3782_v59 }
 0x722   : > { %6090 = vrcp.f32 %v3781_v47 }
 0x723   : > { %6092 = vrcp.f32 %v3783_v14 }
 0x726   : > { %v6079_v32 = vpop.eup %6078 }
 0x74a   : > { %v3670_v4 = vpop.f32.mrb[48].mxu0  ;;  %v3713_v36 = vpop.f32.mrb[48].mxu1 }
 0x74b   : > { %v5504_v62 = vadd.f32 %v3670_v4, %v9427_v52  ;;  %v5536_v53 = vadd.f32 %v3713_v36, %v9428_v23  ;;  %v3672_v22 = vpop.f32.mrb[49].mxu0  ;;  %v3715_v26 = vpop.f32.mrb[49].mxu1 }
 0x74c   : > { %v5505_v17 = vadd.f32 %v3672_v22, %v9429_v9  ;;  %v5537_v7 = vadd.f32 %v3715_v26, %v9430_v10  ;;  %v3674_v16 = vpop.f32.mrb[50].mxu0  ;;  %v3717_v8 = vpop.f32.mrb[50].mxu1 }
 0x74d   : > { %v5332_v20 = vmul.f32 -1.442695, %v5504_v62  ;;  %6094 = vtanh.f32 %v5536_v53  ;;  %v5506_v55 = vadd.f32 %v3674_v16, %v9427_v52  ;;  %v3676_v31 = vpop.f32.mrb[51].mxu0  ;;  %v3719_v59 = vpop.f32.mrb[51].mxu1  ;;  %v5538_v4 = vadd.f32 %v3717_v8, %v9428_v23 }
 0x74e   : > { %v5333_v47 = vmul.f32 -1.442695, %v5505_v17  ;;  %6096 = vtanh.f32 %v5537_v7  ;;  %v5507_v36 = vadd.f32 %v3676_v31, %v9429_v9  ;;  %v6081_v22 = vpop.eup %6080  ;;  %v5539_v19 = vadd.f32 %v3719_v59, %v9430_v10 }
 0x74f   : > { %6098 = vpow2.f32 %v5332_v20  ;;  %v5338_v14 = vmul.f32 -1.442695, %v5506_v55  ;;  %v6083_v62 = vpop.eup %6082  ;;  %v3814_v20 = vmul.f32 %v6081_v22, %v7852_v34 }
 0x750   : > { %6100 = vpow2.f32 %v5333_v47  ;;  %v5339_v26 = vmul.f32 -1.442695, %v5507_v36  ;;  %v6085_v53 = vpop.eup %6084 }
 0x751   : > { %6102 = vpow2.f32 %v5338_v14  ;;  %v6087_v16 = vpop.eup %6086  ;;  %v3815_v47 = vmul.f32 %v6085_v53, %v7854_v60 }
 0x752   : > { %6104 = vtanh.f32 %v5538_v4  ;;  %v6089_v17 = vpop.eup %6088 }
 0x753   : > { %6106 = vpow2.f32 %v5339_v26  ;;  %v6091_v7 = vpop.eup %6090  ;;  %v3816_v18 = vmul.f32 %v6089_v17, %v7860_v41 }
 0x754   : > { %6108 = vtanh.f32 %v5539_v19  ;;  %v6093_v8 = vpop.eup %6092 }
 0x757   : > { %v6095_v23 = vpop.eup %6094 }
 0x758   : > { %v6097_v31 = vpop.eup %6096  ;;  %v3818_v55 = vmul.f32 %v6095_v23, %v6079_v32  ;;  %v3817_v23 = vmul.f32 %v6093_v8, %v7863_v15 }
 0x759   : > { %v6099_v9 = vpop.eup %6098  ;;  %v3819_v36 = vmul.f32 %v6097_v31, %v6083_v62 }
 0x75a   : > { %v6101_v59 = vpop.eup %6100  ;;  %v3778_v10 = vadd.f32 1.0, %v6099_v9  ;;  %v8018_v14 = vadd.f32 %v3818_v55, %v3814_v20  ;;  %v9431_v55 = vld [vmem:[#allocation124_spill] sm:$0xff] }
 0x75b   : > { %v6103_v4 = vpop.eup %6102  ;;  %v3779_v52 = vadd.f32 1.0, %v6101_v59  ;;  %v8020_v26 = vadd.f32 %v3819_v36, %v3815_v47  ;;  %v9432_v47 = vld [vmem:[#allocation125_spill] sm:$0xff]  ;;  %v9433_v36 = vld [vmem:[#allocation126_spill] sm:$0xff]  ;;  %v9434_v59 = vld [vmem:[#allocation127_spill] sm:$0xff] }
 0x75c   : > { %v6105_v19 = vpop.eup %6104  ;;  %6110 = vrcp.f32 %v3778_v10  ;;  %v3784_v1 = vadd.f32 1.0, %v6103_v4  ;;  %v9435_v4 = vld [vmem:[#allocation128_spill] sm:$0xff] }
 0x75d   : > { %v6107_v63 = vpop.eup %6106  ;;  %6112 = vtanh.f32 %v8018_v14  ;;  %v3820_v34 = vmul.f32 %v6105_v19, %v6087_v16  ;;  %v9436_v19 = vld [vmem:[#allocation129_spill] sm:$0xff] }
 0x75e   : > { %v6109_v32 = vpop.eup %6108  ;;  %6114 = vrcp.f32 %v3779_v52  ;;  %v3785_v60 = vadd.f32 1.0, %v6107_v63 }
 0x75f   : > { %6116 = vtanh.f32 %v8020_v26  ;;  %v8026_v9 = vadd.f32 %v3820_v34, %v3816_v18  ;;  %v3821_v22 = vmul.f32 %v6109_v32, %v6091_v7  ;;  %v9437_v34 = vld [vmem:[#allocation130_spill] sm:$0xff]  ;;  %v9438_v32 = vld [vmem:[#allocation131_spill] sm:$0xff] }
 0x760   : > { %6118 = vrcp.f32 %v3784_v1 }
 0x761   : > { %6120 = vtanh.f32 %v8026_v9  ;;  %v8029_v10 = vadd.f32 %v3821_v22, %v3817_v23  ;;  %v9440_v23 = vld [vmem:[#allocation133_spill] sm:$0xff]  ;;  %v9441_v22 = vld [vmem:[#allocation134_spill] sm:$0xff] }
 0x762   : > { %6122 = vrcp.f32 %v3785_v60  ;;  %v9439_v60 = vld [vmem:[#allocation132_spill] sm:$0xff] }
 0x763   : > { %6124 = vtanh.f32 %v8029_v10 }
 0x766   : > { %v6111_v41 = vpop.eup %6110 }
 0x767   : > { %v6113_v62 = vpop.eup %6112 }
 0x768   : > { %v6115_v53 = vpop.eup %6114  ;;  %v3830_v17 = vmul.f32 %v6113_v62, %v6111_v41  ;;  %v9442_v41 = vld [vmem:[#allocation135_spill] sm:$0xff]  ;;  %v9443_v62 = vld [vmem:[#allocation136_spill] sm:$0xff] }
 0x769   : > { %v6117_v52 = vpop.eup %6116 }
 0x76a   : > { %v6119_v63 = vpop.eup %6118  ;;  %v3831_v31 = vmul.f32 %v6117_v52, %v6115_v53  ;;  %v9444_v53 = vld [vmem:[#allocation137_spill] sm:$0xff]  ;;  %v9445_v52 = vld [vmem:[#allocation138_spill] sm:$0xff] }
 0x76b   : > { %v6121_v16 = vpop.eup %6120 }
 0x76c   : > { %v6123_v15 = vpop.eup %6122  ;;  %v3832_v8 = vmul.f32 %v6121_v16, %v6119_v63  ;;  %v9446_v63 = vld [vmem:[#allocation139_spill] sm:$0xff]  ;;  %v9447_v16 = vld [vmem:[#allocation140_spill] sm:$0xff] }
 0x76d   : > { %v6125_v18 = vpop.eup %6124 }
 0x76e   : > { %v3833_v7 = vmul.f32 %v6125_v18, %v6123_v15  ;;  %v8032_v1 = vpack.c.bf16 %v3832_v8, %v3830_v17  ;;  %v9448_v15 = vld [vmem:[#allocation141_spill] sm:$0xff]  ;;  %v9449_v17 = vld [vmem:[#allocation142_spill] sm:$0xff]  ;;  %v9450_v8 = vld [vmem:[#allocation143_spill] sm:$0xff] }
 0x76f   : > { %v9451_v18 = vld [vmem:[#allocation144_spill] sm:$0xff] }
 0x770   : > { %v3852_v20 = vpack.c.bf16 %v3833_v7, %v3831_v31  ;;  %v9452_v31 = vld [vmem:[#allocation145_spill] sm:$0xff]  ;;  %v9453_v7 = vld [vmem:[#allocation146_spill] sm:$0xff] }
 0x772   : > { %3885 = vmatprep.mubr.bf16.mxu0 %v3852_v20  ;;  %3928 = vmatprep.mubr.bf16.mxu1 %v3852_v20 }
 0x773   : > { %3886 = vmatmul.mubr.bf16.vlgmr.msra.gmra.mrb[20].mxu0 %v8032_v1  ;;  %3929 = vmatmul.mubr.bf16.vlgmr.msra.gmra.mrb[20].mxu1 %v8032_v1 }
 0x774   : > { %3940 = vmatpush1.bf16.msra.mxu0 %v9031_v46  ;;  %3983 = vmatpush1.bf16.msra.mxu1 %v9032_v12 }
 0x775   : > { %3971 = vmatprep.mubr.bf16.mxu0 %v3852_v20  ;;  %4014 = vmatprep.mubr.bf16.mxu1 %v3852_v20  ;;  %v9454_v20 = vld [vmem:[#allocation147_spill] sm:$0xff] }
 0x776   : > { %3941 = vmatprep.subr.bf16.mxu0 %v9033_v54  ;;  %3984 = vmatprep.subr.bf16.mxu1 %v9034_v13 }
 0x778   : > { %3942 = vmatpush1.bf16.msra.mxu0 %v9035_v21  ;;  %3985 = vmatpush1.bf16.msra.mxu1 %v9036_v29 }
 0x779   : > { %3943 = vmatprep.subr.bf16.mxu0 %v9037_v11  ;;  %3986 = vmatprep.subr.bf16.mxu1 %v9038_v30 }
 0x77c   : > { %3944 = vmatpush1.bf16.msra.mxu0 %v9039_v37  ;;  %3987 = vmatpush1.bf16.msra.mxu1 %v9128_v33 }
 0x77d   : > { %3945 = vmatprep.subr.bf16.mxu0 %v9129_v25  ;;  %3988 = vmatprep.subr.bf16.mxu1 %v9130_v2 }
 0x780   : > { %3946 = vmatpush1.bf16.msra.mxu0 %v9131_v24  ;;  %3989 = vmatpush1.bf16.msra.mxu1 %v9132_v0 }
 0x781   : > { %3947 = vmatprep.subr.bf16.mxu0 %v9133_v39  ;;  %3990 = vmatprep.subr.bf16.mxu1 %v9134_v35 }
 0x784   : > { %3948 = vmatpush1.bf16.msra.mxu0 %v9135_v44  ;;  %3991 = vmatpush1.bf16.msra.mxu1 %v9136_v6 }
 0x785   : > { %3949 = vmatprep.subr.bf16.mxu0 %v9137_v43  ;;  %3992 = vmatprep.subr.bf16.mxu1 %v9138_v51 }
 0x788   : > { %3950 = vmatpush1.bf16.msra.mxu0 %v9139_v61  ;;  %3993 = vmatpush1.bf16.msra.mxu1 %v9140_v3 }
 0x789   : > { %3951 = vmatprep.subr.bf16.mxu0 %v9229_v38  ;;  %3994 = vmatprep.subr.bf16.mxu1 %v9230_v45 }
 0x78c   : > { %3952 = vmatpush1.bf16.msra.mxu0 %v9231_v40  ;;  %3995 = vmatpush1.bf16.msra.mxu1 %v9232_v42 }
 0x78d   : > { %3953 = vmatprep.subr.bf16.mxu0 %v9145_v28  ;;  %3996 = vmatprep.subr.bf16.mxu1 %v9146_v56 }
 0x790   : > { %3954 = vmatpush1.bf16.msra.mxu0 %v9147_v57  ;;  %3997 = vmatpush1.bf16.msra.mxu1 %v9233_v5 }
 0x791   : > { %3955 = vmatprep.subr.bf16.mxu0 %v9149_v27  ;;  %3998 = vmatprep.subr.bf16.mxu1 %v9150_v49 }
 0x794   : > { %3956 = vmatpush1.bf16.msra.mxu0 %v9151_v58  ;;  %3999 = vmatpush1.bf16.msra.mxu1 %v9152_v50 }
 0x795   : > { %3957 = vmatprep.subr.bf16.mxu0 %v9153_v48  ;;  %4000 = vmatprep.subr.bf16.mxu1 %v9431_v55 }
 0x798   : > { %3958 = vmatpush1.bf16.msra.mxu0 %v9432_v47  ;;  %4001 = vmatpush1.bf16.msra.mxu1 %v9433_v36 }
 0x799   : > { %3959 = vmatprep.subr.bf16.mxu0 %v9434_v59  ;;  %4002 = vmatprep.subr.bf16.mxu1 %v9435_v4 }
 0x79c   : > { %3960 = vmatpush1.bf16.msra.mxu0 %v9436_v19  ;;  %4003 = vmatpush1.bf16.msra.mxu1 %v9437_v34 }
 0x79d   : > { %3961 = vmatprep.subr.bf16.mxu0 %v9438_v32  ;;  %4004 = vmatprep.subr.bf16.mxu1 %v9439_v60  ;;  %v9526_v60 = vld [vmem:[#allocation153_spill] sm:$0xff]  ;;  %v9527_v32 = vld [vmem:[#allocation154_spill] sm:$0xff] }
 0x7a0   : > { %3962 = vmatpush1.bf16.msra.mxu0 %v9440_v23  ;;  %4005 = vmatpush1.bf16.msra.mxu1 %v9441_v22  ;;  %v9524_v22 = vld [vmem:[#allocation151_spill] sm:$0xff]  ;;  %v9525_v23 = vld [vmem:[#allocation152_spill] sm:$0xff] }
 0x7a1   : > { %3963 = vmatprep.subr.bf16.mxu0 %v9442_v41  ;;  %4006 = vmatprep.subr.bf16.mxu1 %v9443_v62 }
 0x7a4   : > { %3964 = vmatpush1.bf16.msra.mxu0 %v9444_v53  ;;  %4007 = vmatpush1.bf16.msra.mxu1 %v9445_v52  ;;  %v9455_v53 = vld [vmem:[#allocation148_spill] sm:$0xff]  ;;  %v9456_v52 = vld [vmem:[#allocation149_spill] sm:$0xff] }
 0x7a5   : > { %3965 = vmatprep.subr.bf16.mxu0 %v9446_v63  ;;  %4008 = vmatprep.subr.bf16.mxu1 %v9447_v16  ;;  %v9457_v63 = vld [vmem:[#allocation150_spill] sm:$0xff]  ;;  %v9458_v16 = vld [vmem:[#allocation23_spill] sm:$0xff] }
 0x7a8   : > { %3966 = vmatpush1.bf16.msra.mxu0 %v9448_v15  ;;  %4009 = vmatpush1.bf16.msra.mxu1 %v9449_v17  ;;  %v9459_v15 = vld [vmem:[#allocation24_spill] sm:$0xff] }
 0x7a9   : > { %3967 = vmatprep.subr.bf16.mxu0 %v9450_v8  ;;  %4010 = vmatprep.subr.bf16.mxu1 %v9451_v18  ;;  %v9460_v18 = vld [vmem:[#allocation25_spill] sm:$0xff]  ;;  %v9469_v8 = vld [vmem:[#allocation34_spill] sm:$0xff] }
 0x7ac   : > { %3968 = vmatpush1.bf16.msra.mxu0 %v9452_v31  ;;  %4011 = vmatpush1.bf16.msra.mxu1 %v9453_v7  ;;  %v9461_v31 = vld [vmem:[#allocation26_spill] sm:$0xff]  ;;  %v9462_v7 = vld [vmem:[#allocation27_spill] sm:$0xff] }
 0x7ad   : > { %3969 = vmatprep.subr.bf16.mxu0 %v9454_v20  ;;  %4012 = vmatprep.subr.bf16.mxu1 %v9455_v53  ;;  %v9463_v20 = vld [vmem:[#allocation28_spill] sm:$0xff]  ;;  %v9464_v53 = vld [vmem:[#allocation29_spill] sm:$0xff] }
 0x7b0   : > { %3970 = vmatpush1.bf16.msra.mxu0 %v9456_v52  ;;  %4013 = vmatpush1.bf16.msra.mxu1 %v9457_v63  ;;  %v9465_v52 = vld [vmem:[#allocation30_spill] sm:$0xff]  ;;  %v9466_v63 = vld [vmem:[#allocation31_spill] sm:$0xff] }
 0x7b1   : > { %4156 = vmatprep.subr.bf16.mxu0 %v9458_v16  ;;  %4199 = vmatprep.subr.bf16.mxu1 %v9459_v15  ;;  %v9467_v16 = vld [vmem:[#allocation32_spill] sm:$0xff]  ;;  %v9468_v15 = vld [vmem:[#allocation33_spill] sm:$0xff] }
 0x7b3   : > { %3972 = vmatmul.mubr.bf16.vlgmr.msra.gmra.mrb[52].mxu0 %v8032_v1  ;;  %4015 = vmatmul.mubr.bf16.vlgmr.msra.gmra.mrb[52].mxu1 %v8032_v1  ;;  %v9470_v1 = vld [vmem:[#allocation35_spill] sm:$0xff] }
 0x7b4   : > { %4157 = vmatpush1.bf16.msra.mxu0 %v9460_v18  ;;  %4200 = vmatpush1.bf16.msra.mxu1 %v9461_v31  ;;  %v9471_v18 = vld [vmem:[#allocation36_spill] sm:$0xff]  ;;  %v9472_v31 = vld [vmem:[#allocation37_spill] sm:$0xff] }
 0x7b5   : > { %4158 = vmatprep.subr.bf16.mxu0 %v9462_v7  ;;  %4201 = vmatprep.subr.bf16.mxu1 %v9463_v20  ;;  %v9473_v7 = vld [vmem:[#allocation38_spill] sm:$0xff]  ;;  %v9474_v20 = vld [vmem:[#allocation39_spill] sm:$0xff] }
 0x7b8   : > { %4159 = vmatpush1.bf16.msra.mxu0 %v9464_v53  ;;  %4202 = vmatpush1.bf16.msra.mxu1 %v9465_v52  ;;  %v9475_v53 = vld [vmem:[#allocation40_spill] sm:$0xff]  ;;  %v9476_v52 = vld [vmem:[#allocation41_spill] sm:$0xff] }
 0x7b9   : > { %4160 = vmatprep.subr.bf16.mxu0 %v9466_v63  ;;  %4203 = vmatprep.subr.bf16.mxu1 %v9467_v16  ;;  %v9477_v63 = vld [vmem:[#allocation42_spill] sm:$0xff]  ;;  %v9478_v16 = vld [vmem:[#allocation43_spill] sm:$0xff] }
 0x7bc   : > { %4161 = vmatpush1.bf16.msra.mxu0 %v9468_v15  ;;  %4204 = vmatpush1.bf16.msra.mxu1 %v9469_v8  ;;  %v9479_v15 = vld [vmem:[#allocation44_spill] sm:$0xff]  ;;  %v9480_v8 = vld [vmem:[#allocation45_spill] sm:$0xff] }
 0x7bd   : > { %4162 = vmatprep.subr.bf16.mxu0 %v9470_v1  ;;  %4205 = vmatprep.subr.bf16.mxu1 %v9471_v18  ;;  %v9481_v1 = vld [vmem:[#allocation46_spill] sm:$0xff]  ;;  %v9482_v18 = vld [vmem:[#allocation47_spill] sm:$0xff] }
 0x7c0   : > { %4163 = vmatpush1.bf16.msra.mxu0 %v9472_v31  ;;  %4206 = vmatpush1.bf16.msra.mxu1 %v9473_v7  ;;  %v9483_v31 = vld [vmem:[#allocation48_spill] sm:$0xff]  ;;  %v9484_v7 = vld [vmem:[#allocation49_spill] sm:$0xff] }
 0x7c1   : > { %4164 = vmatprep.subr.bf16.mxu0 %v9474_v20  ;;  %4207 = vmatprep.subr.bf16.mxu1 %v9475_v53  ;;  %v9485_v20 = vld [vmem:[#allocation50_spill] sm:$0xff]  ;;  %v9486_v53 = vld [vmem:[#allocation51_spill] sm:$0xff] }
 0x7c4   : > { %4165 = vmatpush1.bf16.msra.mxu0 %v9476_v52  ;;  %4208 = vmatpush1.bf16.msra.mxu1 %v9477_v63  ;;  %v9487_v52 = vld [vmem:[#allocation52_spill] sm:$0xff]  ;;  %v9488_v63 = vld [vmem:[#allocation53_spill] sm:$0xff] }
 0x7c5   : > { %4166 = vmatprep.subr.bf16.mxu0 %v9478_v16  ;;  %4209 = vmatprep.subr.bf16.mxu1 %v9479_v15  ;;  %v9489_v16 = vld [vmem:[#allocation54_spill] sm:$0xff]  ;;  %v9490_v15 = vld [vmem:[#allocation55_spill] sm:$0xff] }
 0x7c8   : > { %4167 = vmatpush1.bf16.msra.mxu0 %v9480_v8  ;;  %4210 = vmatpush1.bf16.msra.mxu1 %v9481_v1  ;;  %v9491_v8 = vld [vmem:[#allocation56_spill] sm:$0xff]  ;;  %v9492_v1 = vld [vmem:[#allocation57_spill] sm:$0xff] }
 0x7c9   : > { %4168 = vmatprep.subr.bf16.mxu0 %v9482_v18  ;;  %4211 = vmatprep.subr.bf16.mxu1 %v9483_v31  ;;  %v9493_v18 = vld [vmem:[#allocation58_spill] sm:$0xff]  ;;  %v9494_v31 = vld [vmem:[#allocation59_spill] sm:$0xff] }
 0x7cc   : > { %4169 = vmatpush1.bf16.msra.mxu0 %v9484_v7  ;;  %4212 = vmatpush1.bf16.msra.mxu1 %v9485_v20  ;;  %v9495_v7 = vld [vmem:[#allocation60_spill] sm:$0xff]  ;;  %v9496_v20 = vld [vmem:[#allocation61_spill] sm:$0xff] }
 0x7cd   : > { %4170 = vmatprep.subr.bf16.mxu0 %v9486_v53  ;;  %4213 = vmatprep.subr.bf16.mxu1 %v9487_v52  ;;  %v9497_v53 = vld [vmem:[#allocation62_spill] sm:$0xff]  ;;  %v9498_v52 = vld [vmem:[#allocation63_spill] sm:$0xff] }
 0x7d0   : > { %4171 = vmatpush1.bf16.msra.mxu0 %v9488_v63  ;;  %4214 = vmatpush1.bf16.msra.mxu1 %v9489_v16  ;;  %v9499_v63 = vld [vmem:[#allocation64_spill] sm:$0xff]  ;;  %v9500_v16 = vld [vmem:[#allocation65_spill] sm:$0xff] }
 0x7d1   : > { %4172 = vmatprep.subr.bf16.mxu0 %v9490_v15  ;;  %4215 = vmatprep.subr.bf16.mxu1 %v9491_v8  ;;  %v9501_v15 = vld [vmem:[#allocation66_spill] sm:$0xff]  ;;  %v9502_v8 = vld [vmem:[#allocation67_spill] sm:$0xff] }
 0x7d4   : > { %4173 = vmatpush1.bf16.msra.mxu0 %v9492_v1  ;;  %4216 = vmatpush1.bf16.msra.mxu1 %v9493_v18  ;;  %v9503_v1 = vld [vmem:[#allocation68_spill] sm:$0xff]  ;;  %v9504_v18 = vld [vmem:[#allocation69_spill] sm:$0xff] }
 0x7d5   : > { %4174 = vmatprep.subr.bf16.mxu0 %v9494_v31  ;;  %4217 = vmatprep.subr.bf16.mxu1 %v9495_v7  ;;  %v9505_v31 = vld [vmem:[#allocation70_spill] sm:$0xff]  ;;  %v9506_v7 = vld [vmem:[#allocation71_spill] sm:$0xff] }
 0x7d8   : > { %4175 = vmatpush1.bf16.msra.mxu0 %v9496_v20  ;;  %4218 = vmatpush1.bf16.msra.mxu1 %v9497_v53  ;;  %v9507_v20 = vld [vmem:[#allocation72_spill] sm:$0xff]  ;;  %v9508_v53 = vld [vmem:[#allocation73_spill] sm:$0xff] }
 0x7d9   : > { %4176 = vmatprep.subr.bf16.mxu0 %v9498_v52  ;;  %4219 = vmatprep.subr.bf16.mxu1 %v9499_v63  ;;  %v9509_v52 = vld [vmem:[#allocation74_spill] sm:$0xff]  ;;  %v9510_v63 = vld [vmem:[#allocation75_spill] sm:$0xff] }
 0x7dc   : > { %4177 = vmatpush1.bf16.msra.mxu0 %v9500_v16  ;;  %4220 = vmatpush1.bf16.msra.mxu1 %v9501_v15  ;;  %v9511_v16 = vld [vmem:[#allocation76_spill] sm:$0xff]  ;;  %v9512_v15 = vld [vmem:[#allocation77_spill] sm:$0xff] }
 0x7dd   : > { %4178 = vmatprep.subr.bf16.mxu0 %v9502_v8  ;;  %4221 = vmatprep.subr.bf16.mxu1 %v9503_v1  ;;  %v9513_v8 = vld [vmem:[#allocation78_spill] sm:$0xff]  ;;  %v9514_v1 = vld [vmem:[#allocation79_spill] sm:$0xff] }
 0x7e0   : > { %4179 = vmatpush1.bf16.msra.mxu0 %v9504_v18  ;;  %4222 = vmatpush1.bf16.msra.mxu1 %v9505_v31  ;;  %v9515_v18 = vld [vmem:[#allocation80_spill] sm:$0xff]  ;;  %v9516_v31 = vld [vmem:[#allocation81_spill] sm:$0xff] }
 0x7e1   : > { %4180 = vmatprep.subr.bf16.mxu0 %v9506_v7  ;;  %4223 = vmatprep.subr.bf16.mxu1 %v9507_v20  ;;  %v9517_v7 = vld [vmem:[#allocation82_spill] sm:$0xff]  ;;  %v9518_v20 = vld [vmem:[#allocation83_spill] sm:$0xff] }
 0x7e4   : > { %4181 = vmatpush1.bf16.msra.mxu0 %v9508_v53  ;;  %4224 = vmatpush1.bf16.msra.mxu1 %v9509_v52  ;;  %v9519_v53 = vld [vmem:[#allocation84_spill] sm:$0xff]  ;;  %v9520_v52 = vld [vmem:[#allocation85_spill] sm:$0xff] }
 0x7e5   : > { %4182 = vmatprep.subr.bf16.mxu0 %v9510_v63  ;;  %4225 = vmatprep.subr.bf16.mxu1 %v9511_v16  ;;  %v9521_v63 = vld [vmem:[#allocation86_spill] sm:$0xff]  ;;  %v9522_v16 = vld [vmem:[#allocation87_spill] sm:$0xff] }
 0x7e8   : > { %4183 = vmatpush1.bf16.msra.mxu0 %v9512_v15  ;;  %4226 = vmatpush1.bf16.msra.mxu1 %v9513_v8  ;;  %v9523_v15 = vld [vmem:[#allocation88_spill] sm:$0xff] }
 0x7e9   : > { %4184 = vmatprep.subr.bf16.mxu0 %v9514_v1  ;;  %4227 = vmatprep.subr.bf16.mxu1 %v9515_v18 }
 0x7ec   : > { %4185 = vmatpush1.bf16.msra.mxu0 %v9516_v31  ;;  %4228 = vmatpush1.bf16.msra.mxu1 %v9517_v7 }
 0x7ed   : > { %4186 = vmatprep.subr.bf16.mxu0 %v9518_v20  ;;  %4229 = vmatprep.subr.bf16.mxu1 %v9519_v53 }
 0x7f0   : > { %4187 = vmatpush1.bf16.msra.mxu0 %v9520_v52  ;;  %4230 = vmatpush1.bf16.msra.mxu1 %v9521_v63 }
 0x7f1   : > { %4242 = vmatprep.subr.bf16.mxu0 %v9522_v16  ;;  %4285 = vmatprep.subr.bf16.mxu1 %v9523_v15 }
 0x846   : > { %v3887_v8 = vpop.f32.mrb[20].mxu0  ;;  %v3930_v1 = vpop.f32.mrb[20].mxu1 }
 0x847   : > { %v3889_v17 = vpop.f32.mrb[21].mxu0  ;;  %v3932_v18 = vpop.f32.mrb[21].mxu1  ;;  %v5444_v20 = vadd.f32 %v3887_v8, %v9524_v22  ;;  %v5476_v53 = vadd.f32 %v3930_v1, %v9525_v23 }
 0x848   : > { %v3891_v62 = vpop.f32.mrb[22].mxu0  ;;  %v3934_v31 = vpop.f32.mrb[22].mxu1  ;;  %v5445_v52 = vadd.f32 %v3889_v17, %v9526_v60  ;;  %v5477_v63 = vadd.f32 %v3932_v18, %v9527_v32 }
 0x849   : > { %v3893_v41 = vpop.f32.mrb[23].mxu0  ;;  %v3936_v7 = vpop.f32.mrb[23].mxu1  ;;  %v5340_v34 = vmul.f32 -1.442695, %v5444_v20  ;;  %v5446_v16 = vadd.f32 %v3891_v62, %v9524_v22  ;;  %v5342_v15 = vmul.f32 -1.442695, %v5476_v53  ;;  %v5478_v19 = vadd.f32 %v3934_v31, %v9525_v23 }
 0x84a   : > { %v5341_v4 = vmul.f32 -1.442695, %v5445_v52  ;;  %v5447_v59 = vadd.f32 %v3893_v41, %v9526_v60  ;;  %v5343_v36 = vmul.f32 -1.442695, %v5477_v63  ;;  %v5479_v47 = vadd.f32 %v3936_v7, %v9527_v32 }
 0x84b   : > { %6126 = vpow2.f32 %v5340_v34  ;;  %v5346_v8 = vmul.f32 -1.442695, %v5446_v16  ;;  %v5348_v1 = vmul.f32 -1.442695, %v5478_v19 }
 0x84c   : > { %6128 = vpow2.f32 %v5342_v15  ;;  %v5347_v17 = vmul.f32 -1.442695, %v5447_v59  ;;  %v5349_v18 = vmul.f32 -1.442695, %v5479_v47 }
 0x84d   : > { %6130 = vpow2.f32 %v5341_v4 }
 0x84e   : > { %6132 = vpow2.f32 %v5343_v36 }
 0x84f   : > { %6134 = vpow2.f32 %v5346_v8 }
 0x850   : > { %6136 = vpow2.f32 %v5348_v1 }
 0x851   : > { %6138 = vpow2.f32 %v5347_v17  ;;  %v9528_v17 = vld [vmem:[#allocation155_spill] sm:$0xff] }
 0x852   : > { %6140 = vpow2.f32 %v5349_v18 }
 0x855   : > { %v6127_v62 = vpop.eup %6126 }
 0x856   : > { %v6129_v53 = vpop.eup %6128  ;;  %v4077_v41 = vadd.f32 1.0, %v6127_v62  ;;  %v9529_v62 = vld [vmem:[#allocation156_spill] sm:$0xff] }
 0x857   : > { %v6131_v52 = vpop.eup %6130  ;;  %v4079_v20 = vadd.f32 1.0, %v6129_v53 }
 0x858   : > { %v6133_v31 = vpop.eup %6132  ;;  %v4078_v34 = vadd.f32 1.0, %v6131_v52  ;;  %6142 = vrcp.f32 %v4077_v41  ;;  %v9530_v41 = vld [vmem:[#allocation157_spill] sm:$0xff] }
 0x859   : > { %v6135_v63 = vpop.eup %6134  ;;  %v4080_v15 = vadd.f32 1.0, %v6133_v31  ;;  %6144 = vrcp.f32 %v4079_v20  ;;  %v9531_v20 = vld [vmem:[#allocation158_spill] sm:$0xff] }
 0x85a   : > { %v6137_v7 = vpop.eup %6136  ;;  %v4083_v59 = vadd.f32 1.0, %v6135_v63  ;;  %6146 = vrcp.f32 %v4078_v34 }
 0x85b   : > { %v6139_v16 = vpop.eup %6138  ;;  %v4085_v47 = vadd.f32 1.0, %v6137_v7  ;;  %6148 = vrcp.f32 %v4080_v15 }
 0x85c   : > { %v6141_v19 = vpop.eup %6140  ;;  %v4084_v36 = vadd.f32 1.0, %v6139_v16  ;;  %6150 = vrcp.f32 %v4083_v59 }
 0x85d   : > { %v4086_v4 = vadd.f32 1.0, %v6141_v19  ;;  %6152 = vrcp.f32 %v4085_v47 }
 0x85e   : > { %6154 = vrcp.f32 %v4084_v36 }
 0x85f   : > { %6156 = vrcp.f32 %v4086_v4 }
 0x862   : > { %v6143_v32 = vpop.eup %6142 }
 0x886   : > { %v3973_v8 = vpop.f32.mrb[52].mxu0  ;;  %v4016_v1 = vpop.f32.mrb[52].mxu1 }
 0x887   : > { %v5508_v18 = vadd.f32 %v3973_v8, %v9528_v17  ;;  %v5540_v53 = vadd.f32 %v4016_v1, %v9529_v62  ;;  %v3975_v52 = vpop.f32.mrb[53].mxu0  ;;  %v4018_v31 = vpop.f32.mrb[53].mxu1 }
 0x888   : > { %v5509_v63 = vadd.f32 %v3975_v52, %v9530_v41  ;;  %v5541_v7 = vadd.f32 %v4018_v31, %v9531_v20  ;;  %v3977_v34 = vpop.f32.mrb[54].mxu0  ;;  %v4020_v16 = vpop.f32.mrb[54].mxu1 }
 0x889   : > { %v5344_v15 = vmul.f32 -1.442695, %v5508_v18  ;;  %6158 = vtanh.f32 %v5540_v53  ;;  %v5510_v19 = vadd.f32 %v3977_v34, %v9528_v17  ;;  %v3979_v59 = vpop.f32.mrb[55].mxu0  ;;  %v4022_v47 = vpop.f32.mrb[55].mxu1  ;;  %v5542_v8 = vadd.f32 %v4020_v16, %v9529_v62 }
 0x88a   : > { %v5345_v36 = vmul.f32 -1.442695, %v5509_v63  ;;  %6160 = vtanh.f32 %v5541_v7  ;;  %v5511_v1 = vadd.f32 %v3979_v59, %v9530_v41  ;;  %v6145_v52 = vpop.eup %6144  ;;  %v5543_v60 = vadd.f32 %v4022_v47, %v9531_v20 }
 0x88b   : > { %6162 = vpow2.f32 %v5344_v15  ;;  %v5350_v4 = vmul.f32 -1.442695, %v5510_v19  ;;  %v6147_v18 = vpop.eup %6146  ;;  %v4117_v15 = vmul.f32 %v6145_v52, %v8018_v14 }
 0x88c   : > { %6164 = vpow2.f32 %v5345_v36  ;;  %v5351_v31 = vmul.f32 -1.442695, %v5511_v1  ;;  %v6149_v53 = vpop.eup %6148 }
 0x88d   : > { %6166 = vpow2.f32 %v5350_v4  ;;  %v6151_v34 = vpop.eup %6150  ;;  %v4118_v36 = vmul.f32 %v6149_v53, %v8020_v26 }
 0x88e   : > { %6168 = vtanh.f32 %v5542_v8  ;;  %v6153_v63 = vpop.eup %6152 }
 0x88f   : > { %6170 = vpow2.f32 %v5351_v31  ;;  %v6155_v7 = vpop.eup %6154  ;;  %v4119_v55 = vmul.f32 %v6153_v63, %v8026_v9 }
 0x890   : > { %6172 = vtanh.f32 %v5543_v60  ;;  %v6157_v16 = vpop.eup %6156 }
 0x893   : > { %v6159_v62 = vpop.eup %6158 }
 0x894   : > { %v6161_v59 = vpop.eup %6160  ;;  %v4121_v19 = vmul.f32 %v6159_v62, %v6143_v32  ;;  %v4120_v62 = vmul.f32 %v6157_v16, %v8029_v10 }
 0x895   : > { %v6163_v41 = vpop.eup %6162  ;;  %v4122_v1 = vmul.f32 %v6161_v59, %v6147_v18 }
 0x896   : > { %v6165_v47 = vpop.eup %6164  ;;  %v4081_v20 = vadd.f32 1.0, %v6163_v41  ;;  %v8184_v4 = vadd.f32 %v4121_v19, %v4117_v15  ;;  %v9532_v19 = vld [vmem:[#allocation124_spill] sm:$0xff] }
 0x897   : > { %v6167_v8 = vpop.eup %6166  ;;  %v4082_v17 = vadd.f32 1.0, %v6165_v47  ;;  %v8186_v31 = vadd.f32 %v4122_v1, %v4118_v36  ;;  %v9533_v36 = vld [vmem:[#allocation125_spill] sm:$0xff]  ;;  %v9534_v1 = vld [vmem:[#allocation126_spill] sm:$0xff]  ;;  %v9535_v47 = vld [vmem:[#allocation127_spill] sm:$0xff] }
 0x898   : > { %v6169_v60 = vpop.eup %6168  ;;  %6174 = vrcp.f32 %v4081_v20  ;;  %v4087_v23 = vadd.f32 1.0, %v6167_v8  ;;  %v9536_v8 = vld [vmem:[#allocation128_spill] sm:$0xff] }
 0x899   : > { %v6171_v22 = vpop.eup %6170  ;;  %6176 = vtanh.f32 %v8184_v4  ;;  %v4123_v14 = vmul.f32 %v6169_v60, %v6151_v34  ;;  %v9537_v60 = vld [vmem:[#allocation129_spill] sm:$0xff] }
 0x89a   : > { %v6173_v32 = vpop.eup %6172  ;;  %6178 = vrcp.f32 %v4082_v17  ;;  %v4088_v26 = vadd.f32 1.0, %v6171_v22 }
 0x89b   : > { %6180 = vtanh.f32 %v8186_v31  ;;  %v8192_v41 = vadd.f32 %v4123_v14, %v4119_v55  ;;  %v4124_v52 = vmul.f32 %v6173_v32, %v6155_v7  ;;  %v9538_v14 = vld [vmem:[#allocation130_spill] sm:$0xff]  ;;  %v9539_v32 = vld [vmem:[#allocation131_spill] sm:$0xff] }
 0x89c   : > { %6182 = vrcp.f32 %v4087_v23 }
 0x89d   : > { %6184 = vtanh.f32 %v8192_v41  ;;  %v8195_v20 = vadd.f32 %v4124_v52, %v4120_v62  ;;  %v9541_v62 = vld [vmem:[#allocation133_spill] sm:$0xff]  ;;  %v9542_v52 = vld [vmem:[#allocation134_spill] sm:$0xff] }
 0x89e   : > { %6186 = vrcp.f32 %v4088_v26  ;;  %v9540_v26 = vld [vmem:[#allocation132_spill] sm:$0xff] }
 0x89f   : > { %6188 = vtanh.f32 %v8195_v20 }
 0x8a2   : > { %v6175_v9 = vpop.eup %6174 }
 0x8a3   : > { %v6177_v18 = vpop.eup %6176 }
 0x8a4   : > { %v6179_v53 = vpop.eup %6178  ;;  %v4133_v63 = vmul.f32 %v6177_v18, %v6175_v9  ;;  %v9543_v9 = vld [vmem:[#allocation135_spill] sm:$0xff]  ;;  %v9544_v18 = vld [vmem:[#allocation136_spill] sm:$0xff] }
 0x8a5   : > { %v6181_v17 = vpop.eup %6180 }
 0x8a6   : > { %v6183_v22 = vpop.eup %6182  ;;  %v4134_v59 = vmul.f32 %v6181_v17, %v6179_v53  ;;  %v9545_v53 = vld [vmem:[#allocation137_spill] sm:$0xff]  ;;  %v9546_v17 = vld [vmem:[#allocation138_spill] sm:$0xff] }
 0x8a7   : > { %v6185_v34 = vpop.eup %6184 }
 0x8a8   : > { %v6187_v10 = vpop.eup %6186  ;;  %v4135_v16 = vmul.f32 %v6185_v34, %v6183_v22  ;;  %v9547_v22 = vld [vmem:[#allocation139_spill] sm:$0xff]  ;;  %v9548_v34 = vld [vmem:[#allocation140_spill] sm:$0xff] }
 0x8a9   : > { %v6189_v55 = vpop.eup %6188 }
 0x8aa   : > { %v4136_v7 = vmul.f32 %v6189_v55, %v6187_v10  ;;  %v8198_v23 = vpack.c.bf16 %v4135_v16, %v4133_v63  ;;  %v9549_v10 = vld [vmem:[#allocation141_spill] sm:$0xff]  ;;  %v9550_v63 = vld [vmem:[#allocation142_spill] sm:$0xff]  ;;  %v9551_v16 = vld [vmem:[#allocation143_spill] sm:$0xff] }
 0x8ab   : > { %v9552_v55 = vld [vmem:[#allocation144_spill] sm:$0xff] }
 0x8ac   : > { %v4155_v15 = vpack.c.bf16 %v4136_v7, %v4134_v59  ;;  %v9553_v59 = vld [vmem:[#allocation145_spill] sm:$0xff]  ;;  %v9554_v7 = vld [vmem:[#allocation146_spill] sm:$0xff] }
 0x8ae   : > { %4188 = vmatprep.mubr.bf16.mxu0 %v4155_v15  ;;  %4231 = vmatprep.mubr.bf16.mxu1 %v4155_v15 }
 0x8af   : > { %4189 = vmatmul.mubr.bf16.vlgmr.msra.gmra.mrb[24].mxu0 %v8198_v23  ;;  %4232 = vmatmul.mubr.bf16.vlgmr.msra.gmra.mrb[24].mxu1 %v8198_v23 }
 0x8b0   : > { %4243 = vmatpush1.bf16.msra.mxu0 %v9031_v46  ;;  %4286 = vmatpush1.bf16.msra.mxu1 %v9032_v12 }
 0x8b1   : > { %4274 = vmatprep.mubr.bf16.mxu0 %v4155_v15  ;;  %4317 = vmatprep.mubr.bf16.mxu1 %v4155_v15  ;;  %v9555_v15 = vld [vmem:[#allocation147_spill] sm:$0xff] }
 0x8b2   : > { %4244 = vmatprep.subr.bf16.mxu0 %v9033_v54  ;;  %4287 = vmatprep.subr.bf16.mxu1 %v9034_v13 }
 0x8b4   : > { %4245 = vmatpush1.bf16.msra.mxu0 %v9035_v21  ;;  %4288 = vmatpush1.bf16.msra.mxu1 %v9036_v29 }
 0x8b5   : > { %4246 = vmatprep.subr.bf16.mxu0 %v9037_v11  ;;  %4289 = vmatprep.subr.bf16.mxu1 %v9038_v30 }
 0x8b8   : > { %4247 = vmatpush1.bf16.msra.mxu0 %v9039_v37  ;;  %4290 = vmatpush1.bf16.msra.mxu1 %v9128_v33 }
 0x8b9   : > { %4248 = vmatprep.subr.bf16.mxu0 %v9129_v25  ;;  %4291 = vmatprep.subr.bf16.mxu1 %v9130_v2 }
 0x8bc   : > { %4249 = vmatpush1.bf16.msra.mxu0 %v9131_v24  ;;  %4292 = vmatpush1.bf16.msra.mxu1 %v9132_v0 }
 0x8bd   : > { %4250 = vmatprep.subr.bf16.mxu0 %v9133_v39  ;;  %4293 = vmatprep.subr.bf16.mxu1 %v9134_v35 }
 0x8c0   : > { %4251 = vmatpush1.bf16.msra.mxu0 %v9135_v44  ;;  %4294 = vmatpush1.bf16.msra.mxu1 %v9136_v6 }
 0x8c1   : > { %4252 = vmatprep.subr.bf16.mxu0 %v9137_v43  ;;  %4295 = vmatprep.subr.bf16.mxu1 %v9138_v51 }
 0x8c4   : > { %4253 = vmatpush1.bf16.msra.mxu0 %v9139_v61  ;;  %4296 = vmatpush1.bf16.msra.mxu1 %v9140_v3 }
 0x8c5   : > { %4254 = vmatprep.subr.bf16.mxu0 %v9229_v38  ;;  %4297 = vmatprep.subr.bf16.mxu1 %v9230_v45 }
 0x8c8   : > { %4255 = vmatpush1.bf16.msra.mxu0 %v9231_v40  ;;  %4298 = vmatpush1.bf16.msra.mxu1 %v9232_v42 }
 0x8c9   : > { %4256 = vmatprep.subr.bf16.mxu0 %v9145_v28  ;;  %4299 = vmatprep.subr.bf16.mxu1 %v9146_v56 }
 0x8cc   : > { %4257 = vmatpush1.bf16.msra.mxu0 %v9147_v57  ;;  %4300 = vmatpush1.bf16.msra.mxu1 %v9233_v5 }
 0x8cd   : > { %4258 = vmatprep.subr.bf16.mxu0 %v9149_v27  ;;  %4301 = vmatprep.subr.bf16.mxu1 %v9150_v49 }
 0x8d0   : > { %4259 = vmatpush1.bf16.msra.mxu0 %v9151_v58  ;;  %4302 = vmatpush1.bf16.msra.mxu1 %v9152_v50 }
 0x8d1   : > { %4260 = vmatprep.subr.bf16.mxu0 %v9153_v48  ;;  %4303 = vmatprep.subr.bf16.mxu1 %v9532_v19 }
 0x8d4   : > { %4261 = vmatpush1.bf16.msra.mxu0 %v9533_v36  ;;  %4304 = vmatpush1.bf16.msra.mxu1 %v9534_v1 }
 0x8d5   : > { %4262 = vmatprep.subr.bf16.mxu0 %v9535_v47  ;;  %4305 = vmatprep.subr.bf16.mxu1 %v9536_v8 }
 0x8d8   : > { %4263 = vmatpush1.bf16.msra.mxu0 %v9537_v60  ;;  %4306 = vmatpush1.bf16.msra.mxu1 %v9538_v14 }
 0x8d9   : > { %4264 = vmatprep.subr.bf16.mxu0 %v9539_v32  ;;  %4307 = vmatprep.subr.bf16.mxu1 %v9540_v26  ;;  %v9627_v26 = vld [vmem:[#allocation153_spill] sm:$0xff]  ;;  %v9628_v32 = vld [vmem:[#allocation154_spill] sm:$0xff] }
 0x8dc   : > { %4265 = vmatpush1.bf16.msra.mxu0 %v9541_v62  ;;  %4308 = vmatpush1.bf16.msra.mxu1 %v9542_v52  ;;  %v9625_v52 = vld [vmem:[#allocation151_spill] sm:$0xff]  ;;  %v9626_v62 = vld [vmem:[#allocation152_spill] sm:$0xff] }
 0x8dd   : > { %4266 = vmatprep.subr.bf16.mxu0 %v9543_v9  ;;  %4309 = vmatprep.subr.bf16.mxu1 %v9544_v18 }
 0x8e0   : > { %4267 = vmatpush1.bf16.msra.mxu0 %v9545_v53  ;;  %4310 = vmatpush1.bf16.msra.mxu1 %v9546_v17  ;;  %v9556_v53 = vld [vmem:[#allocation148_spill] sm:$0xff]  ;;  %v9557_v17 = vld [vmem:[#allocation149_spill] sm:$0xff] }
 0x8e1   : > { %4268 = vmatprep.subr.bf16.mxu0 %v9547_v22  ;;  %4311 = vmatprep.subr.bf16.mxu1 %v9548_v34  ;;  %v9558_v22 = vld [vmem:[#allocation150_spill] sm:$0xff]  ;;  %v9559_v34 = vld [vmem:[#allocation23_spill] sm:$0xff] }
 0x8e4   : > { %4269 = vmatpush1.bf16.msra.mxu0 %v9549_v10  ;;  %4312 = vmatpush1.bf16.msra.mxu1 %v9550_v63  ;;  %v9560_v10 = vld [vmem:[#allocation24_spill] sm:$0xff] }
 0x8e5   : > { %4270 = vmatprep.subr.bf16.mxu0 %v9551_v16  ;;  %4313 = vmatprep.subr.bf16.mxu1 %v9552_v55  ;;  %v9561_v55 = vld [vmem:[#allocation25_spill] sm:$0xff]  ;;  %v9570_v16 = vld [vmem:[#allocation34_spill] sm:$0xff] }
 0x8e8   : > { %4271 = vmatpush1.bf16.msra.mxu0 %v9553_v59  ;;  %4314 = vmatpush1.bf16.msra.mxu1 %v9554_v7  ;;  %v9562_v59 = vld [vmem:[#allocation26_spill] sm:$0xff]  ;;  %v9563_v7 = vld [vmem:[#allocation27_spill] sm:$0xff] }
 0x8e9   : > { %4272 = vmatprep.subr.bf16.mxu0 %v9555_v15  ;;  %4315 = vmatprep.subr.bf16.mxu1 %v9556_v53  ;;  %v9564_v15 = vld [vmem:[#allocation28_spill] sm:$0xff]  ;;  %v9565_v53 = vld [vmem:[#allocation29_spill] sm:$0xff] }
 0x8ec   : > { %4273 = vmatpush1.bf16.msra.mxu0 %v9557_v17  ;;  %4316 = vmatpush1.bf16.msra.mxu1 %v9558_v22  ;;  %v9566_v17 = vld [vmem:[#allocation30_spill] sm:$0xff]  ;;  %v9567_v22 = vld [vmem:[#allocation31_spill] sm:$0xff] }
 0x8ed   : > { %4459 = vmatprep.subr.bf16.mxu0 %v9559_v34  ;;  %4502 = vmatprep.subr.bf16.mxu1 %v9560_v10  ;;  %v9568_v34 = vld [vmem:[#allocation32_spill] sm:$0xff]  ;;  %v9569_v10 = vld [vmem:[#allocation33_spill] sm:$0xff] }
 0x8ef   : > { %4275 = vmatmul.mubr.bf16.vlgmr.msra.gmra.mrb[56].mxu0 %v8198_v23  ;;  %4318 = vmatmul.mubr.bf16.vlgmr.msra.gmra.mrb[56].mxu1 %v8198_v23  ;;  %v9571_v23 = vld [vmem:[#allocation35_spill] sm:$0xff] }
 0x8f0   : > { %4460 = vmatpush1.bf16.msra.mxu0 %v9561_v55  ;;  %4503 = vmatpush1.bf16.msra.mxu1 %v9562_v59  ;;  %v9572_v55 = vld [vmem:[#allocation36_spill] sm:$0xff]  ;;  %v9573_v59 = vld [vmem:[#allocation37_spill] sm:$0xff] }
 0x8f1   : > { %4461 = vmatprep.subr.bf16.mxu0 %v9563_v7  ;;  %4504 = vmatprep.subr.bf16.mxu1 %v9564_v15  ;;  %v9574_v7 = vld [vmem:[#allocation38_spill] sm:$0xff]  ;;  %v9575_v15 = vld [vmem:[#allocation39_spill] sm:$0xff] }
 0x8f4   : > { %4462 = vmatpush1.bf16.msra.mxu0 %v9565_v53  ;;  %4505 = vmatpush1.bf16.msra.mxu1 %v9566_v17  ;;  %v9576_v53 = vld [vmem:[#allocation40_spill] sm:$0xff]  ;;  %v9577_v17 = vld [vmem:[#allocation41_spill] sm:$0xff] }
 0x8f5   : > { %4463 = vmatprep.subr.bf16.mxu0 %v9567_v22  ;;  %4506 = vmatprep.subr.bf16.mxu1 %v9568_v34  ;;  %v9578_v22 = vld [vmem:[#allocation42_spill] sm:$0xff]  ;;  %v9579_v34 = vld [vmem:[#allocation43_spill] sm:$0xff] }
 0x8f8   : > { %4464 = vmatpush1.bf16.msra.mxu0 %v9569_v10  ;;  %4507 = vmatpush1.bf16.msra.mxu1 %v9570_v16  ;;  %v9580_v10 = vld [vmem:[#allocation44_spill] sm:$0xff]  ;;  %v9581_v16 = vld [vmem:[#allocation45_spill] sm:$0xff] }
 0x8f9   : > { %4465 = vmatprep.subr.bf16.mxu0 %v9571_v23  ;;  %4508 = vmatprep.subr.bf16.mxu1 %v9572_v55  ;;  %v9582_v23 = vld [vmem:[#allocation46_spill] sm:$0xff]  ;;  %v9583_v55 = vld [vmem:[#allocation47_spill] sm:$0xff] }
 0x8fc   : > { %4466 = vmatpush1.bf16.msra.mxu0 %v9573_v59  ;;  %4509 = vmatpush1.bf16.msra.mxu1 %v9574_v7  ;;  %v9584_v59 = vld [vmem:[#allocation48_spill] sm:$0xff]  ;;  %v9585_v7 = vld [vmem:[#allocation49_spill] sm:$0xff] }
 0x8fd   : > { %4467 = vmatprep.subr.bf16.mxu0 %v9575_v15  ;;  %4510 = vmatprep.subr.bf16.mxu1 %v9576_v53  ;;  %v9586_v15 = vld [vmem:[#allocation50_spill] sm:$0xff]  ;;  %v9587_v53 = vld [vmem:[#allocation51_spill] sm:$0xff] }
 0x900   : > { %4468 = vmatpush1.bf16.msra.mxu0 %v9577_v17  ;;  %4511 = vmatpush1.bf16.msra.mxu1 %v9578_v22  ;;  %v9588_v17 = vld [vmem:[#allocation52_spill] sm:$0xff]  ;;  %v9589_v22 = vld [vmem:[#allocation53_spill] sm:$0xff] }
 0x901   : > { %4469 = vmatprep.subr.bf16.mxu0 %v9579_v34  ;;  %4512 = vmatprep.subr.bf16.mxu1 %v9580_v10  ;;  %v9590_v34 = vld [vmem:[#allocation54_spill] sm:$0xff]  ;;  %v9591_v10 = vld [vmem:[#allocation55_spill] sm:$0xff] }
 0x904   : > { %4470 = vmatpush1.bf16.msra.mxu0 %v9581_v16  ;;  %4513 = vmatpush1.bf16.msra.mxu1 %v9582_v23  ;;  %v9592_v16 = vld [vmem:[#allocation56_spill] sm:$0xff]  ;;  %v9593_v23 = vld [vmem:[#allocation57_spill] sm:$0xff] }
 0x905   : > { %4471 = vmatprep.subr.bf16.mxu0 %v9583_v55  ;;  %4514 = vmatprep.subr.bf16.mxu1 %v9584_v59  ;;  %v9594_v55 = vld [vmem:[#allocation58_spill] sm:$0xff]  ;;  %v9595_v59 = vld [vmem:[#allocation59_spill] sm:$0xff] }
 0x908   : > { %4472 = vmatpush1.bf16.msra.mxu0 %v9585_v7  ;;  %4515 = vmatpush1.bf16.msra.mxu1 %v9586_v15  ;;  %v9596_v7 = vld [vmem:[#allocation60_spill] sm:$0xff]  ;;  %v9597_v15 = vld [vmem:[#allocation61_spill] sm:$0xff] }
 0x909   : > { %4473 = vmatprep.subr.bf16.mxu0 %v9587_v53  ;;  %4516 = vmatprep.subr.bf16.mxu1 %v9588_v17  ;;  %v9598_v53 = vld [vmem:[#allocation62_spill] sm:$0xff]  ;;  %v9599_v17 = vld [vmem:[#allocation63_spill] sm:$0xff] }
 0x90c   : > { %4474 = vmatpush1.bf16.msra.mxu0 %v9589_v22  ;;  %4517 = vmatpush1.bf16.msra.mxu1 %v9590_v34  ;;  %v9600_v22 = vld [vmem:[#allocation64_spill] sm:$0xff]  ;;  %v9601_v34 = vld [vmem:[#allocation65_spill] sm:$0xff] }
 0x90d   : > { %4475 = vmatprep.subr.bf16.mxu0 %v9591_v10  ;;  %4518 = vmatprep.subr.bf16.mxu1 %v9592_v16  ;;  %v9602_v10 = vld [vmem:[#allocation66_spill] sm:$0xff]  ;;  %v9603_v16 = vld [vmem:[#allocation67_spill] sm:$0xff] }
 0x910   : > { %4476 = vmatpush1.bf16.msra.mxu0 %v9593_v23  ;;  %4519 = vmatpush1.bf16.msra.mxu1 %v9594_v55  ;;  %v9604_v23 = vld [vmem:[#allocation68_spill] sm:$0xff]  ;;  %v9605_v55 = vld [vmem:[#allocation69_spill] sm:$0xff] }
 0x911   : > { %4477 = vmatprep.subr.bf16.mxu0 %v9595_v59  ;;  %4520 = vmatprep.subr.bf16.mxu1 %v9596_v7  ;;  %v9606_v59 = vld [vmem:[#allocation70_spill] sm:$0xff]  ;;  %v9607_v7 = vld [vmem:[#allocation71_spill] sm:$0xff] }
 0x914   : > { %4478 = vmatpush1.bf16.msra.mxu0 %v9597_v15  ;;  %4521 = vmatpush1.bf16.msra.mxu1 %v9598_v53  ;;  %v9608_v15 = vld [vmem:[#allocation72_spill] sm:$0xff]  ;;  %v9609_v53 = vld [vmem:[#allocation73_spill] sm:$0xff] }
 0x915   : > { %4479 = vmatprep.subr.bf16.mxu0 %v9599_v17  ;;  %4522 = vmatprep.subr.bf16.mxu1 %v9600_v22  ;;  %v9610_v17 = vld [vmem:[#allocation74_spill] sm:$0xff]  ;;  %v9611_v22 = vld [vmem:[#allocation75_spill] sm:$0xff] }
 0x918   : > { %4480 = vmatpush1.bf16.msra.mxu0 %v9601_v34  ;;  %4523 = vmatpush1.bf16.msra.mxu1 %v9602_v10  ;;  %v9612_v34 = vld [vmem:[#allocation76_spill] sm:$0xff]  ;;  %v9613_v10 = vld [vmem:[#allocation77_spill] sm:$0xff] }
 0x919   : > { %4481 = vmatprep.subr.bf16.mxu0 %v9603_v16  ;;  %4524 = vmatprep.subr.bf16.mxu1 %v9604_v23  ;;  %v9614_v16 = vld [vmem:[#allocation78_spill] sm:$0xff]  ;;  %v9615_v23 = vld [vmem:[#allocation79_spill] sm:$0xff] }
 0x91c   : > { %4482 = vmatpush1.bf16.msra.mxu0 %v9605_v55  ;;  %4525 = vmatpush1.bf16.msra.mxu1 %v9606_v59  ;;  %v9616_v55 = vld [vmem:[#allocation80_spill] sm:$0xff]  ;;  %v9617_v59 = vld [vmem:[#allocation81_spill] sm:$0xff] }
 0x91d   : > { %4483 = vmatprep.subr.bf16.mxu0 %v9607_v7  ;;  %4526 = vmatprep.subr.bf16.mxu1 %v9608_v15  ;;  %v9618_v7 = vld [vmem:[#allocation82_spill] sm:$0xff]  ;;  %v9619_v15 = vld [vmem:[#allocation83_spill] sm:$0xff] }
 0x920   : > { %4484 = vmatpush1.bf16.msra.mxu0 %v9609_v53  ;;  %4527 = vmatpush1.bf16.msra.mxu1 %v9610_v17  ;;  %v9620_v53 = vld [vmem:[#allocation84_spill] sm:$0xff]  ;;  %v9621_v17 = vld [vmem:[#allocation85_spill] sm:$0xff] }
 0x921   : > { %4485 = vmatprep.subr.bf16.mxu0 %v9611_v22  ;;  %4528 = vmatprep.subr.bf16.mxu1 %v9612_v34  ;;  %v9622_v22 = vld [vmem:[#allocation86_spill] sm:$0xff]  ;;  %v9623_v34 = vld [vmem:[#allocation87_spill] sm:$0xff] }
 0x924   : > { %4486 = vmatpush1.bf16.msra.mxu0 %v9613_v10  ;;  %4529 = vmatpush1.bf16.msra.mxu1 %v9614_v16  ;;  %v9624_v10 = vld [vmem:[#allocation88_spill] sm:$0xff] }
 0x925   : > { %4487 = vmatprep.subr.bf16.mxu0 %v9615_v23  ;;  %4530 = vmatprep.subr.bf16.mxu1 %v9616_v55 }
 0x928   : > { %4488 = vmatpush1.bf16.msra.mxu0 %v9617_v59  ;;  %4531 = vmatpush1.bf16.msra.mxu1 %v9618_v7 }
 0x929   : > { %4489 = vmatprep.subr.bf16.mxu0 %v9619_v15  ;;  %4532 = vmatprep.subr.bf16.mxu1 %v9620_v53 }
 0x92c   : > { %4490 = vmatpush1.bf16.msra.mxu0 %v9621_v17  ;;  %4533 = vmatpush1.bf16.msra.mxu1 %v9622_v22 }
 0x92d   : > { %4545 = vmatprep.subr.bf16.mxu0 %v9623_v34  ;;  %4588 = vmatprep.subr.bf16.mxu1 %v9624_v10 }
 0x982   : > { %v4190_v16 = vpop.f32.mrb[24].mxu0  ;;  %v4233_v23 = vpop.f32.mrb[24].mxu1 }
 0x983   : > { %v4192_v63 = vpop.f32.mrb[25].mxu0  ;;  %v4235_v55 = vpop.f32.mrb[25].mxu1  ;;  %v5448_v15 = vadd.f32 %v4190_v16, %v9625_v52  ;;  %v5480_v53 = vadd.f32 %v4233_v23, %v9626_v62 }
 0x984   : > { %v4194_v18 = vpop.f32.mrb[26].mxu0  ;;  %v4237_v59 = vpop.f32.mrb[26].mxu1  ;;  %v5449_v17 = vadd.f32 %v4192_v63, %v9627_v26  ;;  %v5481_v22 = vadd.f32 %v4235_v55, %v9628_v32 }
 0x985   : > { %v4196_v9 = vpop.f32.mrb[27].mxu0  ;;  %v4239_v7 = vpop.f32.mrb[27].mxu1  ;;  %v5352_v14 = vmul.f32 -1.442695, %v5448_v15  ;;  %v5450_v34 = vadd.f32 %v4194_v18, %v9625_v52  ;;  %v5354_v10 = vmul.f32 -1.442695, %v5480_v53  ;;  %v5482_v60 = vadd.f32 %v4237_v59, %v9626_v62 }
 0x986   : > { %v5353_v8 = vmul.f32 -1.442695, %v5449_v17  ;;  %v5451_v47 = vadd.f32 %v4196_v9, %v9627_v26  ;;  %v5355_v1 = vmul.f32 -1.442695, %v5481_v22  ;;  %v5483_v36 = vadd.f32 %v4239_v7, %v9628_v32 }
 0x987   : > { %6190 = vpow2.f32 %v5352_v14  ;;  %v5358_v16 = vmul.f32 -1.442695, %v5450_v34  ;;  %v5360_v23 = vmul.f32 -1.442695, %v5482_v60 }
 0x988   : > { %6192 = vpow2.f32 %v5354_v10  ;;  %v5359_v63 = vmul.f32 -1.442695, %v5451_v47  ;;  %v5361_v55 = vmul.f32 -1.442695, %v5483_v36 }
 0x989   : > { %6194 = vpow2.f32 %v5353_v8 }
 0x98a   : > { %6196 = vpow2.f32 %v5355_v1 }
 0x98b   : > { %6198 = vpow2.f32 %v5358_v16 }
 0x98c   : > { %6200 = vpow2.f32 %v5360_v23 }
 0x98d   : > { %6202 = vpow2.f32 %v5359_v63  ;;  %v9629_v63 = vld [vmem:[#allocation155_spill] sm:$0xff] }
 0x98e   : > { %6204 = vpow2.f32 %v5361_v55 }
 0x991   : > { %v6191_v18 = vpop.eup %6190 }
 0x992   : > { %v6193_v59 = vpop.eup %6192  ;;  %v4380_v9 = vadd.f32 1.0, %v6191_v18  ;;  %v9630_v18 = vld [vmem:[#allocation156_spill] sm:$0xff] }
 0x993   : > { %v6195_v15 = vpop.eup %6194  ;;  %v4382_v22 = vadd.f32 1.0, %v6193_v59 }
 0x994   : > { %v6197_v53 = vpop.eup %6196  ;;  %v4381_v14 = vadd.f32 1.0, %v6195_v15  ;;  %6206 = vrcp.f32 %v4380_v9  ;;  %v9631_v9 = vld [vmem:[#allocation157_spill] sm:$0xff] }
 0x995   : > { %v6199_v17 = vpop.eup %6198  ;;  %v4383_v10 = vadd.f32 1.0, %v6197_v53  ;;  %6208 = vrcp.f32 %v4382_v22  ;;  %v9632_v22 = vld [vmem:[#allocation158_spill] sm:$0xff] }
 0x996   : > { %v6201_v7 = vpop.eup %6200  ;;  %v4386_v47 = vadd.f32 1.0, %v6199_v17  ;;  %6210 = vrcp.f32 %v4381_v14 }
 0x997   : > { %v6203_v34 = vpop.eup %6202  ;;  %v4388_v36 = vadd.f32 1.0, %v6201_v7  ;;  %6212 = vrcp.f32 %v4383_v10 }
 0x998   : > { %v6205_v60 = vpop.eup %6204  ;;  %v4387_v1 = vadd.f32 1.0, %v6203_v34  ;;  %6214 = vrcp.f32 %v4386_v47 }
 0x999   : > { %v4389_v8 = vadd.f32 1.0, %v6205_v60  ;;  %6216 = vrcp.f32 %v4388_v36 }
 0x99a   : > { %6218 = vrcp.f32 %v4387_v1 }
 0x99b   : > { %6220 = vrcp.f32 %v4389_v8 }
 0x99e   : > { %v6207_v32 = vpop.eup %6206 }
 0x9c2   : > { %v4276_v16 = vpop.f32.mrb[56].mxu0  ;;  %v4319_v23 = vpop.f32.mrb[56].mxu1 }
 0x9c3   : > { %v5512_v55 = vadd.f32 %v4276_v16, %v9629_v63  ;;  %v5544_v59 = vadd.f32 %v4319_v23, %v9630_v18  ;;  %v4278_v15 = vpop.f32.mrb[57].mxu0  ;;  %v4321_v53 = vpop.f32.mrb[57].mxu1 }
 0x9c4   : > { %v5513_v17 = vadd.f32 %v4278_v15, %v9631_v9  ;;  %v5545_v7 = vadd.f32 %v4321_v53, %v9632_v22  ;;  %v4280_v14 = vpop.f32.mrb[58].mxu0  ;;  %v4323_v34 = vpop.f32.mrb[58].mxu1 }
 0x9c5   : > { %v5356_v10 = vmul.f32 -1.442695, %v5512_v55  ;;  %6222 = vtanh.f32 %v5544_v59  ;;  %v5514_v60 = vadd.f32 %v4280_v14, %v9629_v63  ;;  %v4282_v47 = vpop.f32.mrb[59].mxu0  ;;  %v4325_v36 = vpop.f32.mrb[59].mxu1  ;;  %v5546_v16 = vadd.f32 %v4323_v34, %v9630_v18 }
 0x9c6   : > { %v5357_v1 = vmul.f32 -1.442695, %v5513_v17  ;;  %6224 = vtanh.f32 %v5545_v7  ;;  %v5515_v23 = vadd.f32 %v4282_v47, %v9631_v9  ;;  %v6209_v15 = vpop.eup %6208  ;;  %v5547_v26 = vadd.f32 %v4325_v36, %v9632_v22 }
 0x9c7   : > { %6226 = vpow2.f32 %v5356_v10  ;;  %v5362_v8 = vmul.f32 -1.442695, %v5514_v60  ;;  %v6211_v55 = vpop.eup %6210  ;;  %v4420_v10 = vmul.f32 %v6209_v15, %v8184_v4 }
 0x9c8   : > { %6228 = vpow2.f32 %v5357_v1  ;;  %v5363_v53 = vmul.f32 -1.442695, %v5515_v23  ;;  %v6213_v59 = vpop.eup %6212 }
 0x9c9   : > { %6230 = vpow2.f32 %v5362_v8  ;;  %v6215_v14 = vpop.eup %6214  ;;  %v4421_v1 = vmul.f32 %v6213_v59, %v8186_v31 }
 0x9ca   : > { %6232 = vtanh.f32 %v5546_v16  ;;  %v6217_v17 = vpop.eup %6216 }
 0x9cb   : > { %6234 = vpow2.f32 %v5363_v53  ;;  %v6219_v7 = vpop.eup %6218  ;;  %v4422_v19 = vmul.f32 %v6217_v17, %v8192_v41 }
 0x9cc   : > { %6236 = vtanh.f32 %v5547_v26  ;;  %v6221_v34 = vpop.eup %6220 }
 0x9cf   : > { %v6223_v18 = vpop.eup %6222 }
 0x9d0   : > { %v6225_v47 = vpop.eup %6224  ;;  %v4424_v60 = vmul.f32 %v6223_v18, %v6207_v32  ;;  %v4423_v18 = vmul.f32 %v6221_v34, %v8195_v20 }
 0x9d1   : > { %v6227_v9 = vpop.eup %6226  ;;  %v4425_v23 = vmul.f32 %v6225_v47, %v6211_v55 }
 0x9d2   : > { %v6229_v36 = vpop.eup %6228  ;;  %v4384_v22 = vadd.f32 1.0, %v6227_v9  ;;  %v8350_v8 = vadd.f32 %v4424_v60, %v4420_v10  ;;  %v5798_v60 = vld [vmem:[#allocation12 + $0x60] sm:$0xff]  }
 0x9d3   : > { %v6231_v16 = vpop.eup %6230  ;;  %v4385_v63 = vadd.f32 1.0, %v6229_v36  ;;  %v8352_v53 = vadd.f32 %v4425_v23, %v4421_v1  ;;  %v5799_v1 = vld [vmem:[#allocation12 + $0x20] sm:$0xff]   ;;  %v5800_v23 = vld [vmem:[#allocation12 + $0x68] sm:$0xff]  }
 0x9d4   : > { %v6233_v26 = vpop.eup %6232  ;;  %6238 = vrcp.f32 %v4384_v22  ;;  %v4390_v62 = vadd.f32 1.0, %v6231_v16  ;;  %v5801_v36 = vld [vmem:[#allocation12 + $0x28] sm:$0xff]   ;;  %v5802_v16 = vld [vmem:[#allocation12 + $0x70] sm:$0xff]  }
 0x9d5   : > { %v6235_v52 = vpop.eup %6234  ;;  %6240 = vtanh.f32 %v8350_v8  ;;  %v4426_v4 = vmul.f32 %v6233_v26, %v6215_v14  ;;  %v5803_v26 = vld [vmem:[#allocation12 + $0x30] sm:$0xff]  }
 0x9d6   : > { %v6237_v32 = vpop.eup %6236  ;;  %6242 = vrcp.f32 %v4385_v63  ;;  %v4391_v31 = vadd.f32 1.0, %v6235_v52 }
 0x9d7   : > { %6244 = vtanh.f32 %v8352_v53  ;;  %v8358_v9 = vadd.f32 %v4426_v4, %v4422_v19  ;;  %v4427_v15 = vmul.f32 %v6237_v32, %v6219_v7  ;;  %v5804_v4 = vld [vmem:[#allocation12 + $0x78] sm:$0xff]  }
 0x9d8   : > { %6246 = vrcp.f32 %v4390_v62  ;;  %v5805_v32 = vld [vmem:[#allocation12 + $0x38] sm:$0xff]  }
 0x9d9   : > { %6248 = vtanh.f32 %v8358_v9  ;;  %v8361_v22 = vadd.f32 %v4427_v15, %v4423_v18 }
 0x9da   : > { %6250 = vrcp.f32 %v4391_v31 }
 0x9db   : > { %6252 = vtanh.f32 %v8361_v22 }
 0x9de   : > { %v6239_v41 = vpop.eup %6238 }
 0x9df   : > { %v6241_v55 = vpop.eup %6240 }
 0x9e0   : > { %v6243_v59 = vpop.eup %6242  ;;  %v4436_v17 = vmul.f32 %v6241_v55, %v6239_v41 }
 0x9e1   : > { %v6245_v63 = vpop.eup %6244 }
 0x9e2   : > { %v6247_v52 = vpop.eup %6246  ;;  %v4437_v47 = vmul.f32 %v6245_v63, %v6243_v59 }
 0x9e3   : > { %v6249_v14 = vpop.eup %6248 }
 0x9e4   : > { %v6251_v20 = vpop.eup %6250  ;;  %v4438_v34 = vmul.f32 %v6249_v14, %v6247_v52  ;;  %v9660_v14 = vld [vmem:[#allocation151_spill] sm:$0xff] }
 0x9e5   : > { %v6253_v19 = vpop.eup %6252 }
 0x9e6   : > { %v4439_v7 = vmul.f32 %v6253_v19, %v6251_v20  ;;  %v8364_v62 = vpack.c.bf16 %v4438_v34, %v4436_v17  ;;  %v9661_v17 = vld [vmem:[#allocation152_spill] sm:$0xff]  ;;  %v9662_v19 = vld [vmem:[#allocation153_spill] sm:$0xff] }
 0x9e8   : > { %v4458_v10 = vpack.c.bf16 %v4439_v7, %v4437_v47  ;;  %v9663_v7 = vld [vmem:[#allocation154_spill] sm:$0xff] }
 0x9ea   : > { %4491 = vmatprep.mubr.bf16.mxu0 %v4458_v10  ;;  %4534 = vmatprep.mubr.bf16.mxu1 %v4458_v10 }
 0x9eb   : > { %4492 = vmatmul.mubr.bf16.vlgmr.msra.gmra.mrb[28].mxu0 %v8364_v62  ;;  %4535 = vmatmul.mubr.bf16.vlgmr.msra.gmra.mrb[28].mxu1 %v8364_v62 }
 0x9ec   : > { %4546 = vmatpush1.bf16.msra.mxu0 %v9031_v46  ;;  %4589 = vmatpush1.bf16.msra.mxu1 %v9032_v12  ;;  %v9633_v46 = vld [vmem:[#allocation124_spill] sm:$0xff]  ;;  %v9634_v12 = vld [vmem:[#allocation125_spill] sm:$0xff] }
 0x9ed   : > { %4577 = vmatprep.mubr.bf16.mxu0 %v4458_v10  ;;  %4620 = vmatprep.mubr.bf16.mxu1 %v4458_v10 }
 0x9ee   : > { %4547 = vmatprep.subr.bf16.mxu0 %v9033_v54  ;;  %4590 = vmatprep.subr.bf16.mxu1 %v9034_v13  ;;  %v9635_v54 = vld [vmem:[#allocation126_spill] sm:$0xff]  ;;  %v9636_v13 = vld [vmem:[#allocation127_spill] sm:$0xff] }
 0x9f0   : > { %4548 = vmatpush1.bf16.msra.mxu0 %v9035_v21  ;;  %4591 = vmatpush1.bf16.msra.mxu1 %v9036_v29  ;;  %v9637_v21 = vld [vmem:[#allocation128_spill] sm:$0xff]  ;;  %v9638_v29 = vld [vmem:[#allocation129_spill] sm:$0xff] }
 0x9f1   : > { %4549 = vmatprep.subr.bf16.mxu0 %v9037_v11  ;;  %4592 = vmatprep.subr.bf16.mxu1 %v9038_v30  ;;  %v9639_v11 = vld [vmem:[#allocation130_spill] sm:$0xff]  ;;  %v9640_v30 = vld [vmem:[#allocation131_spill] sm:$0xff] }
 0x9f4   : > { %4550 = vmatpush1.bf16.msra.mxu0 %v9039_v37  ;;  %4593 = vmatpush1.bf16.msra.mxu1 %v9128_v33  ;;  %v9641_v37 = vld [vmem:[#allocation132_spill] sm:$0xff]  ;;  %v9642_v33 = vld [vmem:[#allocation133_spill] sm:$0xff] }
 0x9f5   : > { %4551 = vmatprep.subr.bf16.mxu0 %v9129_v25  ;;  %4594 = vmatprep.subr.bf16.mxu1 %v9130_v2  ;;  %v9643_v25 = vld [vmem:[#allocation134_spill] sm:$0xff]  ;;  %v9644_v2 = vld [vmem:[#allocation135_spill] sm:$0xff] }
 0x9f8   : > { %4552 = vmatpush1.bf16.msra.mxu0 %v9131_v24  ;;  %4595 = vmatpush1.bf16.msra.mxu1 %v9132_v0  ;;  %v9645_v24 = vld [vmem:[#allocation136_spill] sm:$0xff]  ;;  %v9646_v0 = vld [vmem:[#allocation137_spill] sm:$0xff] }
 0x9f9   : > { %4553 = vmatprep.subr.bf16.mxu0 %v9133_v39  ;;  %4596 = vmatprep.subr.bf16.mxu1 %v9134_v35  ;;  %v9647_v39 = vld [vmem:[#allocation138_spill] sm:$0xff]  ;;  %v9648_v35 = vld [vmem:[#allocation139_spill] sm:$0xff] }
 0x9fc   : > { %4554 = vmatpush1.bf16.msra.mxu0 %v9135_v44  ;;  %4597 = vmatpush1.bf16.msra.mxu1 %v9136_v6  ;;  %v9649_v44 = vld [vmem:[#allocation140_spill] sm:$0xff]  ;;  %v9650_v6 = vld [vmem:[#allocation141_spill] sm:$0xff] }
 0x9fd   : > { %4555 = vmatprep.subr.bf16.mxu0 %v9137_v43  ;;  %4598 = vmatprep.subr.bf16.mxu1 %v9138_v51  ;;  %v9651_v43 = vld [vmem:[#allocation142_spill] sm:$0xff]  ;;  %v9652_v51 = vld [vmem:[#allocation143_spill] sm:$0xff] }
 0xa00   : > { %4556 = vmatpush1.bf16.msra.mxu0 %v9139_v61  ;;  %4599 = vmatpush1.bf16.msra.mxu1 %v9140_v3  ;;  %v9653_v61 = vld [vmem:[#allocation144_spill] sm:$0xff]  ;;  %v9654_v3 = vld [vmem:[#allocation145_spill] sm:$0xff] }
 0xa01   : > { %4557 = vmatprep.subr.bf16.mxu0 %v9229_v38  ;;  %4600 = vmatprep.subr.bf16.mxu1 %v9230_v45  ;;  %v5793_v38 = vld [vmem:[#allocation12 + $0x8] sm:$0xff]   ;;  %v5794_v45 = vld [vmem:[#allocation12 + $0x50] sm:$0xff]  }
 0xa04   : > { %4558 = vmatpush1.bf16.msra.mxu0 %v9231_v40  ;;  %4601 = vmatpush1.bf16.msra.mxu1 %v9232_v42  ;;  %v5795_v40 = vld [vmem:[#allocation12 + $0x10] sm:$0xff]   ;;  %v5796_v42 = vld [vmem:[#allocation12 + $0x58] sm:$0xff]  }
 0xa05   : > { %4559 = vmatprep.subr.bf16.mxu0 %v9145_v28  ;;  %4602 = vmatprep.subr.bf16.mxu1 %v9146_v56  ;;  %v9657_v28 = vld [vmem:[#allocation148_spill] sm:$0xff]  ;;  %v9658_v56 = vld [vmem:[#allocation149_spill] sm:$0xff] }
 0xa08   : > { %4560 = vmatpush1.bf16.msra.mxu0 %v9147_v57  ;;  %4603 = vmatpush1.bf16.msra.mxu1 %v9233_v5  ;;  %v9659_v57 = vld [vmem:[#allocation150_spill] sm:$0xff] }
 0xa09   : > { %4561 = vmatprep.subr.bf16.mxu0 %v9149_v27  ;;  %4604 = vmatprep.subr.bf16.mxu1 %v9150_v49  ;;  %v5790_v27 = vld [vmem:[#allocation12 + $0x40] sm:$0xff]   ;;  %v5797_v5 = vld [vmem:[#allocation12 + $0x18] sm:$0xff]  }
 0xa0a   : > { %v5791_v49 = vld [vmem:[#allocation12] sm:$0xff]  }
 0xa0c   : > { %4562 = vmatpush1.bf16.msra.mxu0 %v9151_v58  ;;  %4605 = vmatpush1.bf16.msra.mxu1 %v9152_v50  ;;  %v9655_v50 = vld [vmem:[#allocation146_spill] sm:$0xff]  ;;  %v5792_v58 = vld [vmem:[#allocation12 + $0x48] sm:$0xff]  }
 0xa0d   : > { %4563 = vmatprep.subr.bf16.mxu0 %v9153_v48  ;;  %4606 = vmatprep.subr.bf16.mxu1 %v9633_v46  ;;  %v9656_v48 = vld [vmem:[#allocation147_spill] sm:$0xff] }
 0xa10   : > { %4564 = vmatpush1.bf16.msra.mxu0 %v9634_v12  ;;  %4607 = vmatpush1.bf16.msra.mxu1 %v9635_v54 }
 0xa11   : > { %4565 = vmatprep.subr.bf16.mxu0 %v9636_v13  ;;  %4608 = vmatprep.subr.bf16.mxu1 %v9637_v21 }
 0xa14   : > { %4566 = vmatpush1.bf16.msra.mxu0 %v9638_v29  ;;  %4609 = vmatpush1.bf16.msra.mxu1 %v9639_v11 }
 0xa15   : > { %4567 = vmatprep.subr.bf16.mxu0 %v9640_v30  ;;  %4610 = vmatprep.subr.bf16.mxu1 %v9641_v37 }
 0xa18   : > { %4568 = vmatpush1.bf16.msra.mxu0 %v9642_v33  ;;  %4611 = vmatpush1.bf16.msra.mxu1 %v9643_v25 }
 0xa19   : > { %4569 = vmatprep.subr.bf16.mxu0 %v9644_v2  ;;  %4612 = vmatprep.subr.bf16.mxu1 %v9645_v24 }
 0xa1c   : > { %4570 = vmatpush1.bf16.msra.mxu0 %v9646_v0  ;;  %4613 = vmatpush1.bf16.msra.mxu1 %v9647_v39 }
 0xa1d   : > { %4571 = vmatprep.subr.bf16.mxu0 %v9648_v35  ;;  %4614 = vmatprep.subr.bf16.mxu1 %v9649_v44 }
 0xa20   : > { %4572 = vmatpush1.bf16.msra.mxu0 %v9650_v6  ;;  %4615 = vmatpush1.bf16.msra.mxu1 %v9651_v43 }
 0xa21   : > { %4573 = vmatprep.subr.bf16.mxu0 %v9652_v51  ;;  %4616 = vmatprep.subr.bf16.mxu1 %v9653_v61 }
 0xa24   : > { %4574 = vmatpush1.bf16.msra.mxu0 %v9654_v3  ;;  %4617 = vmatpush1.bf16.msra.mxu1 %v9655_v50 }
 0xa25   : > { %4575 = vmatprep.subr.bf16.mxu0 %v9656_v48  ;;  %4618 = vmatprep.subr.bf16.mxu1 %v9657_v28 }
 0xa28   : > { %4576 = vmatpush1.bf16.msra.mxu0 %v9658_v56  ;;  %4619 = vmatpush1.bf16.msra.mxu1 %v9659_v57 }
 0xa29   : > { %5402 = vmatprep.subr.bf16.mxu0 %v5790_v27 }
 0xa2b   : > { %4578 = vmatmul.mubr.bf16.vlgmr.msra.gmra.mrb[60].mxu0 %v8364_v62  ;;  %4621 = vmatmul.mubr.bf16.vlgmr.msra.gmra.mrb[60].mxu1 %v8364_v62 }
 0xa2c   : > { %5403 = vmatpush3.bf16.msra.mxu0 %v5791_v49 }
 0xa2d   : > { %5404 = vmatprep.subr.bf16.mxu0 %v5792_v58  ;;  %v9664_v58 = vld [vmem:[#allocation155_spill] sm:$0xff] }
 0xa30   : > { %5405 = vmatpush3.bf16.msra.mxu0 %v5793_v38 }
 0xa31   : > { %5406 = vmatprep.subr.bf16.mxu0 %v5794_v45  ;;  %v9665_v45 = vld [vmem:[#allocation156_spill] sm:$0xff] }
 0xa34   : > { %5407 = vmatpush3.bf16.msra.mxu0 %v5795_v40 }
 0xa35   : > { %5408 = vmatprep.subr.bf16.mxu0 %v5796_v42 }
 0xa38   : > { %5409 = vmatpush3.bf16.msra.mxu0 %v5797_v5 }
 0xa39   : > { %5410 = vmatprep.subr.bf16.mxu0 %v5798_v60  ;;  %v9666_v60 = vld [vmem:[#allocation157_spill] sm:$0xff] }
 0xa3c   : > { %5411 = vmatpush3.bf16.msra.mxu0 %v5799_v1 }
 0xa3d   : > { %5412 = vmatprep.subr.bf16.mxu0 %v5800_v23  ;;  %v9667_v23 = vld [vmem:[#allocation158_spill] sm:$0xff] }
 0xa40   : > { %5413 = vmatpush3.bf16.msra.mxu0 %v5801_v36 }
 0xa41   : > { %5414 = vmatprep.subr.bf16.mxu0 %v5802_v16 }
 0xa44   : > { %5415 = vmatpush3.bf16.msra.mxu0 %v5803_v26 }
 0xa45   : > { %5416 = vmatprep.subr.bf16.mxu0 %v5804_v4 }
 0xa48   : > { %5417 = vmatpush3.bf16.msra.mxu0 %v5805_v32 }
 0xabe   : > { %v4493_v31 = vpop.f32.mrb[28].mxu0  ;;  %v4536_v18 = vpop.f32.mrb[28].mxu1 }
 0xabf   : > { %v4495_v15 = vpop.f32.mrb[29].mxu0  ;;  %v4538_v41 = vpop.f32.mrb[29].mxu1  ;;  %v5452_v20 = vadd.f32 %v4493_v31, %v9660_v14  ;;  %v5484_v34 = vadd.f32 %v4536_v18, %v9661_v17 }
 0xac0   : > { %v4497_v55 = vpop.f32.mrb[30].mxu0  ;;  %v4540_v59 = vpop.f32.mrb[30].mxu1  ;;  %v5453_v47 = vadd.f32 %v4495_v15, %v9662_v19  ;;  %v5485_v62 = vadd.f32 %v4538_v41, %v9663_v7 }
 0xac1   : > { %v4499_v63 = vpop.f32.mrb[31].mxu0  ;;  %v4542_v52 = vpop.f32.mrb[31].mxu1  ;;  %v5364_v10 = vmul.f32 -1.442695, %v5452_v20  ;;  %v5454_v46 = vadd.f32 %v4497_v55, %v9660_v14  ;;  %v5366_v12 = vmul.f32 -1.442695, %v5484_v34  ;;  %v5486_v54 = vadd.f32 %v4540_v59, %v9661_v17 }
 0xac2   : > { %v5365_v13 = vmul.f32 -1.442695, %v5453_v47  ;;  %v5455_v21 = vadd.f32 %v4499_v63, %v9662_v19  ;;  %v5367_v29 = vmul.f32 -1.442695, %v5485_v62  ;;  %v5487_v11 = vadd.f32 %v4542_v52, %v9663_v7 }
 0xac3   : > { %6254 = vpow2.f32 %v5364_v10  ;;  %v5370_v30 = vmul.f32 -1.442695, %v5454_v46  ;;  %v5372_v37 = vmul.f32 -1.442695, %v5486_v54 }
 0xac4   : > { %6256 = vpow2.f32 %v5366_v12  ;;  %v5371_v33 = vmul.f32 -1.442695, %v5455_v21  ;;  %v5373_v25 = vmul.f32 -1.442695, %v5487_v11 }
 0xac5   : > { %6258 = vpow2.f32 %v5365_v13 }
 0xac6   : > { %6260 = vpow2.f32 %v5367_v29 }
 0xac7   : > { %6262 = vpow2.f32 %v5370_v30 }
 0xac8   : > { %6264 = vpow2.f32 %v5372_v37 }
 0xac9   : > { %6266 = vpow2.f32 %v5371_v33 }
 0xaca   : > { %6268 = vpow2.f32 %v5373_v25 }
 0xacd   : > { %v6255_v2 = vpop.eup %6254 }
 0xace   : > { %v6257_v24 = vpop.eup %6256  ;;  %v4683_v35 = vadd.f32 1.0, %v6255_v2 }
 0xacf   : > { %v6259_v0 = vpop.eup %6258  ;;  %v4685_v6 = vadd.f32 1.0, %v6257_v24 }
 0xad0   : > { %v6261_v39 = vpop.eup %6260  ;;  %v4684_v51 = vadd.f32 1.0, %v6259_v0  ;;  %6270 = vrcp.f32 %v4683_v35 }
 0xad1   : > { %v6263_v44 = vpop.eup %6262  ;;  %v4686_v3 = vadd.f32 1.0, %v6261_v39  ;;  %6272 = vrcp.f32 %v4685_v6 }
 0xad2   : > { %v6265_v43 = vpop.eup %6264  ;;  %v4689_v48 = vadd.f32 1.0, %v6263_v44  ;;  %6274 = vrcp.f32 %v4684_v51 }
 0xad3   : > { %v6267_v61 = vpop.eup %6266  ;;  %v4691_v28 = vadd.f32 1.0, %v6265_v43  ;;  %6276 = vrcp.f32 %v4686_v3 }
 0xad4   : > { %v6269_v50 = vpop.eup %6268  ;;  %v4690_v56 = vadd.f32 1.0, %v6267_v61  ;;  %6278 = vrcp.f32 %v4689_v48 }
 0xad5   : > { %v4692_v57 = vadd.f32 1.0, %v6269_v50  ;;  %6280 = vrcp.f32 %v4691_v28 }
 0xad6   : > { %6282 = vrcp.f32 %v4690_v56 }
 0xad7   : > { %6284 = vrcp.f32 %v4692_v57 }
 0xada   : > { %v6271_v59 = vpop.eup %6270 }
 0xadb   : > { %v6273_v52 = vpop.eup %6272 }
 0xadc   : > { %v6275_v17 = vpop.eup %6274  ;;  %v4723_v12 = vmul.f32 %v6273_v52, %v8350_v8 }
 0xadd   : > { %v6277_v34 = vpop.eup %6276 }
 0xade   : > { %v6279_v19 = vpop.eup %6278  ;;  %v4724_v21 = vmul.f32 %v6277_v34, %v8352_v53 }
 0xadf   : > { %v6281_v47 = vpop.eup %6280 }
 0xae0   : > { %v6283_v7 = vpop.eup %6282  ;;  %v4725_v35 = vmul.f32 %v6281_v47, %v8358_v9 }
 0xae1   : > { %v6285_v62 = vpop.eup %6284 }
 0xae2   : > { %v4726_v53 = vmul.f32 %v6285_v62, %v8361_v22 }
 0xafe   : > { %v4579_v27 = vpop.f32.mrb[60].mxu0  ;;  %v4622_v49 = vpop.f32.mrb[60].mxu1 }
 0xaff   : > { %v5516_v38 = vadd.f32 %v4579_v27, %v9664_v58  ;;  %v5548_v40 = vadd.f32 %v4622_v49, %v9665_v45  ;;  %v4581_v42 = vpop.f32.mrb[61].mxu0  ;;  %v4624_v5 = vpop.f32.mrb[61].mxu1 }
 0xb00   : > { %v5517_v1 = vadd.f32 %v4581_v42, %v9666_v60  ;;  %v5549_v36 = vadd.f32 %v4624_v5, %v9667_v23  ;;  %v4583_v16 = vpop.f32.mrb[62].mxu0  ;;  %v4626_v26 = vpop.f32.mrb[62].mxu1  ;;  %v5376_v5 = vld [vmem:[#allocation3] ss:$0 sm:$0xff] }
 0xb01   : > { %v5368_v4 = vmul.f32 -1.442695, %v5516_v38  ;;  %6286 = vtanh.f32 %v5548_v40  ;;  %v5518_v32 = vadd.f32 %v4583_v16, %v9664_v58  ;;  %v4585_v31 = vpop.f32.mrb[63].mxu0  ;;  %v4628_v18 = vpop.f32.mrb[63].mxu1  ;;  %v5550_v41 = vadd.f32 %v4626_v26, %v9665_v45 }
 0xb02   : > { %v5369_v15 = vmul.f32 -1.442695, %v5517_v1  ;;  %6288 = vtanh.f32 %v5549_v36  ;;  %v5519_v55 = vadd.f32 %v4585_v31, %v9666_v60  ;;  %v5551_v20 = vadd.f32 %v4628_v18, %v9667_v23 }
 0xb03   : > { %6290 = vpow2.f32 %v5368_v4  ;;  %v5374_v63 = vmul.f32 -1.442695, %v5518_v32 }
 0xb04   : > { %6292 = vpow2.f32 %v5369_v15  ;;  %v5375_v14 = vmul.f32 -1.442695, %v5519_v55 }
 0xb05   : > { %6294 = vpow2.f32 %v5374_v63 }
 0xb06   : > { %6296 = vtanh.f32 %v5550_v41 }
 0xb07   : > { %6298 = vpow2.f32 %v5375_v14 }
 0xb08   : > { %6300 = vtanh.f32 %v5551_v20 }
 0xb0b   : > { %v6287_v10 = vpop.eup %6286 }
 0xb0c   : > { %v6289_v46 = vpop.eup %6288  ;;  %v4727_v54 = vmul.f32 %v6287_v10, %v6271_v59 }
 0xb0d   : > { %v6291_v13 = vpop.eup %6290  ;;  %v4728_v29 = vmul.f32 %v6289_v46, %v6275_v17 }
 0xb0e   : > { %v6293_v11 = vpop.eup %6292  ;;  %v4687_v30 = vadd.f32 1.0, %v6291_v13  ;;  %v4731_v37 = vadd.f32 %v4727_v54, %v4723_v12 }
 0xb0f   : > { %v6295_v33 = vpop.eup %6294  ;;  %v4688_v25 = vadd.f32 1.0, %v6293_v11  ;;  %v4732_v2 = vadd.f32 %v4728_v29, %v4724_v21 }
 0xb10   : > { %v6297_v24 = vpop.eup %6296  ;;  %6302 = vrcp.f32 %v4687_v30  ;;  %v4693_v0 = vadd.f32 1.0, %v6295_v33 }
 0xb11   : > { %v6299_v39 = vpop.eup %6298  ;;  %6304 = vtanh.f32 %v4731_v37  ;;  %v4729_v44 = vmul.f32 %v6297_v24, %v6279_v19 }
 0xb12   : > { %v6301_v8 = vpop.eup %6300  ;;  %6306 = vrcp.f32 %v4688_v25  ;;  %v4694_v6 = vadd.f32 1.0, %v6299_v39 }
 0xb13   : > { %6308 = vtanh.f32 %v4732_v2  ;;  %v4733_v43 = vadd.f32 %v4729_v44, %v4725_v35  ;;  %v4730_v51 = vmul.f32 %v6301_v8, %v6283_v7 }
 0xb14   : > { %6310 = vrcp.f32 %v4693_v0 }
 0xb15   : > { %6312 = vtanh.f32 %v4733_v43  ;;  %v4734_v61 = vadd.f32 %v4730_v51, %v4726_v53 }
 0xb16   : > { %6314 = vrcp.f32 %v4694_v6 }
 0xb17   : > { %6316 = vtanh.f32 %v4734_v61 }
 0xb1a   : > { %v6303_v3 = vpop.eup %6302 }
 0xb1b   : > { %v6305_v50 = vpop.eup %6304 }
 0xb1c   : > { %v6307_v48 = vpop.eup %6306  ;;  %v4739_v28 = vmul.f32 %v6305_v50, %v6303_v3 }
 0xb1d   : > { %v6309_v9 = vpop.eup %6308 }
 0xb1e   : > { %v6311_v56 = vpop.eup %6310  ;;  %v4740_v57 = vmul.f32 %v6309_v9, %v6307_v48 }
 0xb1f   : > { %v6313_v27 = vpop.eup %6312 }
 0xb20   : > { %v6315_v49 = vpop.eup %6314  ;;  %v4741_v58 = vmul.f32 %v6313_v27, %v6311_v56 }
 0xb21   : > { %v6317_v38 = vpop.eup %6316 }
 0xb22   : > { %v4742_v22 = vmul.f32 %v6317_v38, %v6315_v49  ;;  %v4743_v45 = vpack.c.bf16 %v4741_v58, %v4739_v28 }
 0xb24   : > { %v4744_v40 = vpack.c.bf16 %v4742_v22, %v4740_v57 }
 0xb26   : > { %4912 = vmatprep.mubr.bf16.mxu0 %v4744_v40 }
 0xb27   : > { %4913 = vmatmul.mubr.bf16.vlgmr.msra.gmra.mrb[64].mxu0 %v4743_v45 }
 0xbfa   : > { %v5418_v42 = vpop.f32.mrb[64].mxu0 }
 0xbfb   : > { %v5419_v60 = vpop.f32.mrb[65].mxu0 }
 0xbfc   : > { %v5420_v1 = vadd.f32 %v5419_v60, %v5418_v42  ;;  %v5421_v23 = vpop.f32.mrb[66].mxu0 }
 0xbfd   : > { %v5422_v36 = vpop.f32.mrb[67].mxu0 }
 0xbfe   : > { %v4915_v16 = vadd.f32 %v5420_v1, %v5376_v5  ;;  %v5423_v26 = vadd.f32 %v5422_v36, %v5421_v23 }
 0xc00   : > { %v5393_v4 = vmul.f32 -1.442695, %v4915_v16  ;;  %v4918_v32 = vadd.f32 %v5423_v26, %v5376_v5 }
 0xc02   : > { %6318 = vpow2.f32 %v5393_v4  ;;  %v5394_v31 = vmul.f32 -1.442695, %v4918_v32 }
 0xc04   : > { %6320 = vpow2.f32 %v5394_v31 }
 0xc0c   : > { %v6319_v18 = vpop.eup %6318 }
 0xc0d   : > { %v4927_v15 = vadd.f32 1.0, %v6319_v18 }
 0xc0e   : > { %v6321_v41 = vpop.eup %6320 }
 0xc0f   : > { %6322 = vrcp.f32 %v4927_v15  ;;  %v4928_v55 = vadd.f32 1.0, %v6321_v41 }
 0xc11   : > { %6324 = vrcp.f32 %v4928_v55 }
 0xc19   : > { %v6323_v59 = vpop.eup %6322 }
 0xc1a   : > { %4934 = vst.msk [vmem:[%s352_s12] sm:$0xff] %vm4933_vm0, %v6323_v59 }
 0xc1b   : > { %v6325_v63 = vpop.eup %6324 }
 0xc1c   : > { %4935 = vst.msk [vmem:[%s352_s12 + $0x8] sm:$0xff] %vm4933_vm0, %v6325_v63 }
 0xc1d   : > { %6451 = shalt.err (!%p6448_p3)
}
 0xc1e   : > { %s6452_s15 = scalar_lea.hbm %s8457_s20, 256  ;;  %s6456_s14 = scalar_lea.hbm %s8509_s6, 512 }
 0xc1f   : > { %p6453_p5 = scmp.ne.s32.totalorder %s8457_s20, %s6452_s15  ;;  %p6457_p12 = scmp.lt.u32.totalorder %s8457_s20, %s8509_s6 }
 0xc20   : > { %p6458_p13 = scmp.lt.u32.totalorder %s6456_s14, %s6452_s15  ;;  %p6460_p8 = scmp.lt.u32.totalorder %s6452_s15, %s8457_s20 }
 0xc21   : > { %p6454_p6 = pnand %p6453_p5, %p9668_p7 }
 0xc22   : > { %p6459_p0 = por %p6458_p13, %p6457_p12 }
 0xc23   : > { %p6455_p11 = pneg %p6454_p6 }
 0xc24   : > { %p6461_p9 = por %p6460_p8, %p6459_p0 }
 0xc26   : > { %p6462_p10 = pnand %p6461_p9, %p6455_p11 }
 0xc28   : > { %6465 = shalt.err (!%p6462_p10)
}
 0xc29   : > { %s6530_s8 = smov 128   ;;  %s6531_s9 = smov 8  }
 0xc2a   : > { %5705 = dma.vmem_to_hbm [thread:$0]  (%p9668_p7), %s8459_s27, 256, %s8457_s20, %s4937_s16, %s6530_s8, %s6530_s8, %s6531_s9  }
 0xc2b PF: > { %s4965_s12 = sand.u32 1, %s6500_s23   ;;  %p9669_p1 = scmp.ne.s32.totalorder %s8858_s11, 0 }
 0xc2c   : > { %s4966_s22 = scalar_lea.sflag [#allocation6], %s4965_s12 }
 0xc2d   : > { %p5721_p2 = pnand %p5067_p4, %p9669_p1 }
 0xc2f   : > { %6495 = dma.done.wait (!%p5721_p2), %s4966_s22, 256  }
 0xc30   : > { %6497 = vsyncadd (!%p5721_p2), %s4966_s22, 4294967040  ;;  %s9670_s26 = sld [smem:[#allocation21_spill]]  ;;  %s9671_s28 = sld [smem:[#allocation22_spill]] }
 0xc31   : > { %s9672_s23 = smov %s6504_s24  ;;  %s9673_s24 = smov %s6508_s25 }
 0xc36   : > { %p23_p3 = scmp.ge.s32.totalorder %s9670_s26, 4   ;;  %s9674_s25 = smov %s9671_s28 }
 0xc38   :  { %25 = sbr.rel (!%p23_p3) target bundleno = 10 (0xa), region = 117 }
 0xc3f   :  { %4971 = vsyncpa [#allocation5], 1 }
 0xc40   :  { %4973 = vsyncpa [#allocation5 + $0x1], 1 }
 0xc41   :  { %4974 = vsyncpa [#allocation8], 1 }
 0xc42   :  { %4975 = vsyncpa [#allocation11], 1 }
 0xc43   :  { %4976 = vsyncpa [#allocation6], 1 }
 0xc44   :  { %4978 = vsyncpa [#allocation6 + $0x1], 1 }

</bundles_post_ra>
